<compile_context>
chip_gen: v7x
topology: tpu7x:2x2x1
jax: 0.10.0
libtpu: 0.0.40
codegen_flags: <defaults>
</compile_context>

<pallas_src>
import jax
import jax.numpy as jnp
import numpy as np
from jax import lax
from jax.experimental import pallas as pl
from jax.experimental.pallas import tpu as pltpu


# Layout constants.
_STRIDE = 18          # row stride of the padded 18x18 conv2-input canvas
_CANVAS = 384         # 18*18 = 324, padded to 3*128 lanes
_ZCOLS = 256          # conv2 output canvas width (>= 13*18 + 13 + 1, 2*128)
_MCOLS = 232          # pooled-max slab width (>= 12*18 + 12 + 1)


# ----------------------------- fused kernel --------------------------------

def fused_lenet_kernel(p1_ref, w1_ref, w2_ref, sel_ref, wfc_hbm, out_ref,
                       wfc_vmem, flat_ref, dma_sem):
    """conv1 + pool + conv2 + pool + flatten + FC + sigmoid, fully in VMEM."""
    # Kick off the FC-weight DMA (HBM -> VMEM) so it overlaps the conv compute.
    wfc_cp = pltpu.make_async_copy(wfc_hbm, wfc_vmem, dma_sem)
    wfc_cp.start()

    # ---- conv1: (16, 32) @ (32, 4*384) -> pool-partner max -> ReLU ----------
    r1 = jnp.dot(w1_ref[...], p1_ref[...],
                 preferred_element_type=jnp.float32)          # (16, 1536)
    a1 = jnp.maximum(jnp.maximum(r1[:, 0:_CANVAS], r1[:, _CANVAS:2 * _CANVAS]),
                     jnp.maximum(r1[:, 2 * _CANVAS:3 * _CANVAS],
                                 r1[:, 3 * _CANVAS:4 * _CANVAS]))
    a1 = jnp.maximum(a1, 0.0)      # (16, 384): padded 18x18 canvas, flat

    # ---- conv2 im2col: 25 static shifted slices of the canvas ---------------
    slabs = [a1[:, ki * _STRIDE + kj: ki * _STRIDE + kj + _ZCOLS]
             for ki in range(5) for kj in range(5)]
    b2 = jnp.concatenate(slabs, axis=0)                       # (400, 256)
    z = jnp.dot(w2_ref[...], b2,
                preferred_element_type=jnp.float32)           # (32, 256)

    # ---- 2x2 max-pool (shifted maxes) + ReLU --------------------------------
    m = jnp.maximum(jnp.maximum(z[:, 0:_MCOLS], z[:, 1:1 + _MCOLS]),
                    jnp.maximum(z[:, _STRIDE:_STRIDE + _MCOLS],
                                z[:, _STRIDE + 1:_STRIDE + 1 + _MCOLS]))
    p = jnp.maximum(m, 0.0)                                   # (32, 232)

    # ---- stride-2 subsample back to 7x7 via a 0/1 selection matmul ----------
    a2 = jnp.dot(p, sel_ref[...],
                 preferred_element_type=jnp.float32)          # (32, 49)

    # ---- flatten to torch NCHW order (co*49 + qr*7 + qc) --------------------
    for co in range(32):
        flat_ref[:, pl.ds(co * 49, 49)] = a2[co:co + 1, :]

    # ---- FC (bf16 MXU, f32 accumulate) + sigmoid ----------------------------
    wfc_cp.wait()
    xf = flat_ref[...].astype(jnp.bfloat16)                   # (1, 1568)
    y = jnp.dot(xf, wfc_vmem[...],
                preferred_element_type=jnp.float32)           # (1, 1024)
    out_ref[...] = pl.reciprocal(1.0 + jnp.exp(-y), approx=True)


_VMEM_SPEC = pl.BlockSpec(memory_space=pltpu.MemorySpace.VMEM)


def _fused_call(patches1, kp):
    return pl.pallas_call(
        fused_lenet_kernel,
        out_shape=jax.ShapeDtypeStruct((1, 1024), jnp.float32),
        in_specs=[
            _VMEM_SPEC,                            # conv1 im2col patches
            _VMEM_SPEC,                            # w1 (16, 32)
            _VMEM_SPEC,                            # w2 (32, 400)
            _VMEM_SPEC,                            # pool selection matrix
            pl.BlockSpec(memory_space=pl.ANY),     # FC weight stays in HBM
        ],
        out_specs=_VMEM_SPEC,
        scratch_shapes=[
            pltpu.VMEM((1568, 1024), jnp.bfloat16),   # FC weight landing buffer
            pltpu.VMEM((1, 1568), jnp.float32),       # flattened activations
            pltpu.SemaphoreType.DMA,
        ],
        compiler_params=pltpu.CompilerParams(vmem_limit_bytes=32 * 1024 * 1024),
    )(patches1, kp["w1k"], kp["w2k"], kp["sel"], kp["wfct"])


# --------------------------- parameter preparation --------------------------

def prepare_params(params):
    """One-time (outside the jitted forward) conversion to kernel layouts."""
    w1, w2, wfc = params["w1"], params["w2"], params["wfc"]
    # Patch rows are ordered (kh, kw, cin); pad conv1 K (25) to 32.
    w1k = jnp.transpose(w1, (0, 2, 3, 1)).reshape(16, 25).astype(jnp.float32)
    w1k = jnp.pad(w1k, ((0, 0), (0, 7)))                          # (16, 32)
    w2k = jnp.transpose(w2, (0, 2, 3, 1)).reshape(32, 400).astype(jnp.float32)
    # FC weight: transpose ONCE here (not per call) and cast to bf16.
    wfct = jnp.asarray(wfc).T.astype(jnp.bfloat16)                # (1568, 1024)
    # 0/1 selector: column j = qr*7+qc picks conv2-canvas column 36*qr + 2*qc.
    sel = np.zeros((_MCOLS, 49), np.float32)
    j = np.arange(49)
    sel[36 * (j // 7) + 2 * (j % 7), j] = 1.0
    return {"w1k": w1k, "w2k": w2k, "wfct": wfct, "sel": jnp.asarray(sel)}


# ------------------------------ JAX wrapper ---------------------------------

def mnist_lenet_forward(x, kp):
    """Pallas implementation of MNIST_LeNet.forward.  x: (B, 28, 28) f32."""
    img = x[0].astype(jnp.float32)                    # torch: x[0, :, :]
    xpad = jnp.pad(img, ((2, 2), (2, 2)))             # (32, 32) zero-padded

    # conv1 im2col, grouped by 2x2 max-pool partner, with columns laid out on
    # the zero-padded 18x18 conv2-input canvas (static strided slices only).
    shifted = {}
    for a in range(6):
        for b in range(6):
            v = xpad[a:a + 28:2, b:b + 28:2]          # (14, 14)
            v = jnp.pad(v, ((2, 2), (2, 2)))          # (18, 18) canvas
            shifted[(a, b)] = jnp.pad(v.reshape(-1), (0, _CANVAS - 324))

    blocks = []
    for dr in (0, 1):
        for dc in (0, 1):
            rows = [shifted[(dr + ki, dc + kj)]
                    for ki in range(5) for kj in range(5)]
            blk = jnp.stack(rows, axis=0)             # (25, 384)
            blocks.append(jnp.pad(blk, ((0, 7), (0, 0))))   # pad K to 32
    patches1 = jnp.concatenate(blocks, axis=1)        # (32, 4*384)

    return _fused_call(patches1, kp)


def mnist_lenet_reference(x, params):
    """Pure-JAX reference (sanity check)."""
    w1, w2, wfc = params["w1"], params["w2"], params["wfc"]
    dn = ("NCHW", "OIHW", "NCHW")
    y = x[0][None, None]                              # (1, 1, 28, 28)
    y = lax.conv_general_dilated(y, w1, (1, 1), ((2, 2), (2, 2)),
                                 dimension_numbers=dn)
    y = jnp.maximum(y, 0.0)
    y = lax.reduce_window(y, -jnp.inf, lax.max, (1, 1, 2, 2), (1, 1, 2, 2),
                          "VALID")
    y = lax.conv_general_dilated(y, w2, (1, 1), ((2, 2), (2, 2)),
                                 dimension_numbers=dn)
    y = jnp.maximum(y, 0.0)
    y = lax.reduce_window(y, -jnp.inf, lax.max, (1, 1, 2, 2), (1, 1, 2, 2),
                          "VALID")
    y = y.reshape(1, -1)
    return jax.nn.sigmoid(y @ wfc.T)


# ------------------------------- main ---------------------------------------

if __name__ == "__main__":
    key = jax.random.PRNGKey(0)
    k_x, k1, k2, k3 = jax.random.split(key, 4)

    # Input: (B, 28, 28); only x[0] is used (as in the torch forward).
    # Spatial 28x28 is forced by the 1568-feature classifier.
    x = jax.random.normal(k_x, (2, 28, 28), dtype=jnp.float32)

    params = {
        "w1": jax.random.uniform(k1, (16, 1, 5, 5), jnp.float32, -0.2, 0.2),
        "w2": jax.random.uniform(k2, (32, 16, 5, 5), jnp.float32, -0.05, 0.05),
        "wfc": jax.random.uniform(k3, (1024, 1568), jnp.float32, -0.025, 0.025),
    }

    kparams = prepare_params(params)                  # one-time weight prep

    out = jax.jit(mnist_lenet_forward)(x, kparams)
    out = jax.block_until_ready(out)
    assert out.shape == (1, 1024) and out.dtype == jnp.float32

    ref = jax.block_until_ready(mnist_lenet_reference(x, params))
    np.testing.assert_allclose(np.asarray(out), np.asarray(ref), atol=2e-2, rtol=0)

    print("KERNEL_OK")
</pallas_src>

<mosaic_0001>
module attributes {stable_mosaic.version = 11 : i64} {
  func.func @fused_lenet_kernel(%arg0: memref<32x1536xf32, #tpu.memory_space<vmem>>, %arg1: memref<16x32xf32, #tpu.memory_space<vmem>>, %arg2: memref<32x400xf32, #tpu.memory_space<vmem>>, %arg3: memref<232x49xf32, #tpu.memory_space<vmem>>, %arg4: memref<1568x1024xbf16, #tpu.memory_space<any>>, %arg5: memref<1x1024xf32, #tpu.memory_space<vmem>>, %arg6: memref<1568x1024xbf16, #tpu.memory_space<vmem>>, %arg7: memref<1x1568xf32, #tpu.memory_space<vmem>>, %arg8: memref<!tpu.dma_semaphore, #tpu.memory_space<semaphore_mem>>) attributes {dimension_semantics = [], scalar_prefetch = 0 : i64, scratch_operands = 3 : i64, tpu.core_type = #tpu.core_type<tc>} {
    tpu.enqueue_dma source(%arg4 : memref<1568x1024xbf16, #tpu.memory_space<any>>) target(%arg6 : memref<1568x1024xbf16, #tpu.memory_space<vmem>>) target_semaphore(%arg8 : memref<!tpu.dma_semaphore, #tpu.memory_space<semaphore_mem>>)
    %c0 = arith.constant 0 : index
    %c0_0 = arith.constant 0 : index
    %0 = vector.load %arg1[%c0, %c0_0] : memref<16x32xf32, #tpu.memory_space<vmem>>, vector<16x32xf32>
    %c0_1 = arith.constant 0 : index
    %c0_2 = arith.constant 0 : index
    %1 = vector.load %arg0[%c0_1, %c0_2] : memref<32x1536xf32, #tpu.memory_space<vmem>>, vector<32x1536xf32>
    %cst = arith.constant dense<0.000000e+00> : vector<16x1536xf32>
    %2 = tpu.matmul %0, %1, %cst {dimension_numbers = #tpu.dot_dimension_numbers<[1], [0], [0], [1], [0, 0, 1, 1], [], []>} : vector<16x32xf32>, vector<32x1536xf32>, vector<16x1536xf32> -> vector<16x1536xf32>
    %3 = vector.extract_strided_slice %2 {offsets = [0, 0], sizes = [16, 384], strides = [1, 1]} : vector<16x1536xf32> to vector<16x384xf32>
    %4 = vector.extract_strided_slice %2 {offsets = [0, 384], sizes = [16, 384], strides = [1, 1]} : vector<16x1536xf32> to vector<16x384xf32>
    %5 = arith.maximumf %3, %4 : vector<16x384xf32>
    %6 = vector.extract_strided_slice %2 {offsets = [0, 768], sizes = [16, 384], strides = [1, 1]} : vector<16x1536xf32> to vector<16x384xf32>
    %7 = vector.extract_strided_slice %2 {offsets = [0, 1152], sizes = [16, 384], strides = [1, 1]} : vector<16x1536xf32> to vector<16x384xf32>
    %8 = arith.maximumf %6, %7 : vector<16x384xf32>
    %9 = arith.maximumf %5, %8 : vector<16x384xf32>
    %cst_3 = arith.constant 0.000000e+00 : f32
    %10 = vector.broadcast %cst_3 : f32 to vector<16x384xf32>
    %11 = arith.maximumf %9, %10 : vector<16x384xf32>
    %12 = vector.extract_strided_slice %11 {offsets = [0, 0], sizes = [16, 256], strides = [1, 1]} : vector<16x384xf32> to vector<16x256xf32>
    %13 = vector.extract_strided_slice %11 {offsets = [0, 1], sizes = [16, 256], strides = [1, 1]} : vector<16x384xf32> to vector<16x256xf32>
    %14 = vector.extract_strided_slice %11 {offsets = [0, 2], sizes = [16, 256], strides = [1, 1]} : vector<16x384xf32> to vector<16x256xf32>
    %15 = vector.extract_strided_slice %11 {offsets = [0, 3], sizes = [16, 256], strides = [1, 1]} : vector<16x384xf32> to vector<16x256xf32>
    %16 = vector.extract_strided_slice %11 {offsets = [0, 4], sizes = [16, 256], strides = [1, 1]} : vector<16x384xf32> to vector<16x256xf32>
    %17 = vector.extract_strided_slice %11 {offsets = [0, 18], sizes = [16, 256], strides = [1, 1]} : vector<16x384xf32> to vector<16x256xf32>
    %18 = vector.extract_strided_slice %11 {offsets = [0, 19], sizes = [16, 256], strides = [1, 1]} : vector<16x384xf32> to vector<16x256xf32>
    %19 = vector.extract_strided_slice %11 {offsets = [0, 20], sizes = [16, 256], strides = [1, 1]} : vector<16x384xf32> to vector<16x256xf32>
    %20 = vector.extract_strided_slice %11 {offsets = [0, 21], sizes = [16, 256], strides = [1, 1]} : vector<16x384xf32> to vector<16x256xf32>
    %21 = vector.extract_strided_slice %11 {offsets = [0, 22], sizes = [16, 256], strides = [1, 1]} : vector<16x384xf32> to vector<16x256xf32>
    %22 = vector.extract_strided_slice %11 {offsets = [0, 36], sizes = [16, 256], strides = [1, 1]} : vector<16x384xf32> to vector<16x256xf32>
    %23 = vector.extract_strided_slice %11 {offsets = [0, 37], sizes = [16, 256], strides = [1, 1]} : vector<16x384xf32> to vector<16x256xf32>
    %24 = vector.extract_strided_slice %11 {offsets = [0, 38], sizes = [16, 256], strides = [1, 1]} : vector<16x384xf32> to vector<16x256xf32>
    %25 = vector.extract_strided_slice %11 {offsets = [0, 39], sizes = [16, 256], strides = [1, 1]} : vector<16x384xf32> to vector<16x256xf32>
    %26 = vector.extract_strided_slice %11 {offsets = [0, 40], sizes = [16, 256], strides = [1, 1]} : vector<16x384xf32> to vector<16x256xf32>
    %27 = vector.extract_strided_slice %11 {offsets = [0, 54], sizes = [16, 256], strides = [1, 1]} : vector<16x384xf32> to vector<16x256xf32>
    %28 = vector.extract_strided_slice %11 {offsets = [0, 55], sizes = [16, 256], strides = [1, 1]} : vector<16x384xf32> to vector<16x256xf32>
    %29 = vector.extract_strided_slice %11 {offsets = [0, 56], sizes = [16, 256], strides = [1, 1]} : vector<16x384xf32> to vector<16x256xf32>
    %30 = vector.extract_strided_slice %11 {offsets = [0, 57], sizes = [16, 256], strides = [1, 1]} : vector<16x384xf32> to vector<16x256xf32>
    %31 = vector.extract_strided_slice %11 {offsets = [0, 58], sizes = [16, 256], strides = [1, 1]} : vector<16x384xf32> to vector<16x256xf32>
    %32 = vector.extract_strided_slice %11 {offsets = [0, 72], sizes = [16, 256], strides = [1, 1]} : vector<16x384xf32> to vector<16x256xf32>
    %33 = vector.extract_strided_slice %11 {offsets = [0, 73], sizes = [16, 256], strides = [1, 1]} : vector<16x384xf32> to vector<16x256xf32>
    %34 = vector.extract_strided_slice %11 {offsets = [0, 74], sizes = [16, 256], strides = [1, 1]} : vector<16x384xf32> to vector<16x256xf32>
    %35 = vector.extract_strided_slice %11 {offsets = [0, 75], sizes = [16, 256], strides = [1, 1]} : vector<16x384xf32> to vector<16x256xf32>
    %36 = vector.extract_strided_slice %11 {offsets = [0, 76], sizes = [16, 256], strides = [1, 1]} : vector<16x384xf32> to vector<16x256xf32>
    %37 = tpu.concatenate %12, %13, %14, %15, %16, %17, %18, %19, %20, %21, %22, %23, %24, %25, %26, %27 in 0 : vector<16x256xf32>, vector<16x256xf32>, vector<16x256xf32>, vector<16x256xf32>, vector<16x256xf32>, vector<16x256xf32>, vector<16x256xf32>, vector<16x256xf32>, vector<16x256xf32>, vector<16x256xf32>, vector<16x256xf32>, vector<16x256xf32>, vector<16x256xf32>, vector<16x256xf32>, vector<16x256xf32>, vector<16x256xf32> -> vector<256x256xf32>
    %38 = tpu.concatenate %28, %29, %30, %31, %32, %33, %34, %35, %36 in 0 : vector<16x256xf32>, vector<16x256xf32>, vector<16x256xf32>, vector<16x256xf32>, vector<16x256xf32>, vector<16x256xf32>, vector<16x256xf32>, vector<16x256xf32>, vector<16x256xf32> -> vector<144x256xf32>
    %39 = tpu.concatenate %37, %38 in 0 : vector<256x256xf32>, vector<144x256xf32> -> vector<400x256xf32>
    %c0_4 = arith.constant 0 : index
    %c0_5 = arith.constant 0 : index
    %40 = vector.load %arg2[%c0_4, %c0_5] : memref<32x400xf32, #tpu.memory_space<vmem>>, vector<32x400xf32>
    %cst_6 = arith.constant dense<0.000000e+00> : vector<32x256xf32>
    %41 = tpu.matmul %40, %39, %cst_6 {dimension_numbers = #tpu.dot_dimension_numbers<[1], [0], [0], [1], [0, 0, 1, 1], [], []>} : vector<32x400xf32>, vector<400x256xf32>, vector<32x256xf32> -> vector<32x256xf32>
    %42 = vector.extract_strided_slice %41 {offsets = [0, 0], sizes = [32, 232], strides = [1, 1]} : vector<32x256xf32> to vector<32x232xf32>
    %43 = vector.extract_strided_slice %41 {offsets = [0, 1], sizes = [32, 232], strides = [1, 1]} : vector<32x256xf32> to vector<32x232xf32>
    %44 = arith.maximumf %42, %43 : vector<32x232xf32>
    %45 = vector.extract_strided_slice %41 {offsets = [0, 18], sizes = [32, 232], strides = [1, 1]} : vector<32x256xf32> to vector<32x232xf32>
    %46 = vector.extract_strided_slice %41 {offsets = [0, 19], sizes = [32, 232], strides = [1, 1]} : vector<32x256xf32> to vector<32x232xf32>
    %47 = arith.maximumf %45, %46 : vector<32x232xf32>
    %48 = arith.maximumf %44, %47 : vector<32x232xf32>
    %cst_7 = arith.constant 0.000000e+00 : f32
    %49 = vector.broadcast %cst_7 : f32 to vector<32x232xf32>
    %50 = arith.maximumf %48, %49 : vector<32x232xf32>
    %c0_8 = arith.constant 0 : index
    %c0_9 = arith.constant 0 : index
    %51 = vector.load %arg3[%c0_8, %c0_9] : memref<232x49xf32, #tpu.memory_space<vmem>>, vector<232x49xf32>
    %cst_10 = arith.constant dense<0.000000e+00> : vector<32x49xf32>
    %52 = tpu.matmul %50, %51, %cst_10 {dimension_numbers = #tpu.dot_dimension_numbers<[1], [0], [0], [1], [0, 0, 1, 1], [], []>} : vector<32x232xf32>, vector<232x49xf32>, vector<32x49xf32> -> vector<32x49xf32>
    %53 = vector.extract_strided_slice %52 {offsets = [0, 0], sizes = [1, 49], strides = [1, 1]} : vector<32x49xf32> to vector<1x49xf32>
    %c0_11 = arith.constant 0 : index
    %c0_12 = arith.constant 0 : index
    %54 = vector.load %arg7[%c0_11, %c0_12] : memref<1x1568xf32, #tpu.memory_space<vmem>>, vector<1x49xf32>
    tpu.vector_store %arg7[%c0_11, %c0_12], %53 {strides = array<i32>} : memref<1x1568xf32, #tpu.memory_space<vmem>>, vector<1x49xf32>,
    %55 = vector.extract_strided_slice %52 {offsets = [1, 0], sizes = [1, 49], strides = [1, 1]} : vector<32x49xf32> to vector<1x49xf32>
    %c0_13 = arith.constant 0 : index
    %c49 = arith.constant 49 : index
    %56 = vector.load %arg7[%c0_13, %c49] : memref<1x1568xf32, #tpu.memory_space<vmem>>, vector<1x49xf32>
    tpu.vector_store %arg7[%c0_13, %c49], %55 {strides = array<i32>} : memref<1x1568xf32, #tpu.memory_space<vmem>>, vector<1x49xf32>,
    %57 = vector.extract_strided_slice %52 {offsets = [2, 0], sizes = [1, 49], strides = [1, 1]} : vector<32x49xf32> to vector<1x49xf32>
    %c0_14 = arith.constant 0 : index
    %c98 = arith.constant 98 : index
    %58 = vector.load %arg7[%c0_14, %c98] : memref<1x1568xf32, #tpu.memory_space<vmem>>, vector<1x49xf32>
    tpu.vector_store %arg7[%c0_14, %c98], %57 {strides = array<i32>} : memref<1x1568xf32, #tpu.memory_space<vmem>>, vector<1x49xf32>,
    %59 = vector.extract_strided_slice %52 {offsets = [3, 0], sizes = [1, 49], strides = [1, 1]} : vector<32x49xf32> to vector<1x49xf32>
    %c0_15 = arith.constant 0 : index
    %c147 = arith.constant 147 : index
    %60 = vector.load %arg7[%c0_15, %c147] : memref<1x1568xf32, #tpu.memory_space<vmem>>, vector<1x49xf32>
    tpu.vector_store %arg7[%c0_15, %c147], %59 {strides = array<i32>} : memref<1x1568xf32, #tpu.memory_space<vmem>>, vector<1x49xf32>,
    %61 = vector.extract_strided_slice %52 {offsets = [4, 0], sizes = [1, 49], strides = [1, 1]} : vector<32x49xf32> to vector<1x49xf32>
    %c0_16 = arith.constant 0 : index
    %c196 = arith.constant 196 : index
    %62 = vector.load %arg7[%c0_16, %c196] : memref<1x1568xf32, #tpu.memory_space<vmem>>, vector<1x49xf32>
    tpu.vector_store %arg7[%c0_16, %c196], %61 {strides = array<i32>} : memref<1x1568xf32, #tpu.memory_space<vmem>>, vector<1x49xf32>,
    %63 = vector.extract_strided_slice %52 {offsets = [5, 0], sizes = [1, 49], strides = [1, 1]} : vector<32x49xf32> to vector<1x49xf32>
    %c0_17 = arith.constant 0 : index
    %c245 = arith.constant 245 : index
    %64 = vector.load %arg7[%c0_17, %c245] : memref<1x1568xf32, #tpu.memory_space<vmem>>, vector<1x49xf32>
    tpu.vector_store %arg7[%c0_17, %c245], %63 {strides = array<i32>} : memref<1x1568xf32, #tpu.memory_space<vmem>>, vector<1x49xf32>,
    %65 = vector.extract_strided_slice %52 {offsets = [6, 0], sizes = [1, 49], strides = [1, 1]} : vector<32x49xf32> to vector<1x49xf32>
    %c0_18 = arith.constant 0 : index
    %c294 = arith.constant 294 : index
    %66 = vector.load %arg7[%c0_18, %c294] : memref<1x1568xf32, #tpu.memory_space<vmem>>, vector<1x49xf32>
    tpu.vector_store %arg7[%c0_18, %c294], %65 {strides = array<i32>} : memref<1x1568xf32, #tpu.memory_space<vmem>>, vector<1x49xf32>,
    %67 = vector.extract_strided_slice %52 {offsets = [7, 0], sizes = [1, 49], strides = [1, 1]} : vector<32x49xf32> to vector<1x49xf32>
    %c0_19 = arith.constant 0 : index
    %c343 = arith.constant 343 : index
    %68 = vector.load %arg7[%c0_19, %c343] : memref<1x1568xf32, #tpu.memory_space<vmem>>, vector<1x49xf32>
    tpu.vector_store %arg7[%c0_19, %c343], %67 {strides = array<i32>} : memref<1x1568xf32, #tpu.memory_space<vmem>>, vector<1x49xf32>,
    %69 = vector.extract_strided_slice %52 {offsets = [8, 0], sizes = [1, 49], strides = [1, 1]} : vector<32x49xf32> to vector<1x49xf32>
    %c0_20 = arith.constant 0 : index
    %c392 = arith.constant 392 : index
    %70 = vector.load %arg7[%c0_20, %c392] : memref<1x1568xf32, #tpu.memory_space<vmem>>, vector<1x49xf32>
    tpu.vector_store %arg7[%c0_20, %c392], %69 {strides = array<i32>} : memref<1x1568xf32, #tpu.memory_space<vmem>>, vector<1x49xf32>,
    %71 = vector.extract_strided_slice %52 {offsets = [9, 0], sizes = [1, 49], strides = [1, 1]} : vector<32x49xf32> to vector<1x49xf32>
    %c0_21 = arith.constant 0 : index
    %c441 = arith.constant 441 : index
    %72 = vector.load %arg7[%c0_21, %c441] : memref<1x1568xf32, #tpu.memory_space<vmem>>, vector<1x49xf32>
    tpu.vector_store %arg7[%c0_21, %c441], %71 {strides = array<i32>} : memref<1x1568xf32, #tpu.memory_space<vmem>>, vector<1x49xf32>,
    %73 = vector.extract_strided_slice %52 {offsets = [10, 0], sizes = [1, 49], strides = [1, 1]} : vector<32x49xf32> to vector<1x49xf32>
    %c0_22 = arith.constant 0 : index
    %c490 = arith.constant 490 : index
    %74 = vector.load %arg7[%c0_22, %c490] : memref<1x1568xf32, #tpu.memory_space<vmem>>, vector<1x49xf32>
    tpu.vector_store %arg7[%c0_22, %c490], %73 {strides = array<i32>} : memref<1x1568xf32, #tpu.memory_space<vmem>>, vector<1x49xf32>,
    %75 = vector.extract_strided_slice %52 {offsets = [11, 0], sizes = [1, 49], strides = [1, 1]} : vector<32x49xf32> to vector<1x49xf32>
    %c0_23 = arith.constant 0 : index
    %c539 = arith.constant 539 : index
    %76 = vector.load %arg7[%c0_23, %c539] : memref<1x1568xf32, #tpu.memory_space<vmem>>, vector<1x49xf32>
    tpu.vector_store %arg7[%c0_23, %c539], %75 {strides = array<i32>} : memref<1x1568xf32, #tpu.memory_space<vmem>>, vector<1x49xf32>,
    %77 = vector.extract_strided_slice %52 {offsets = [12, 0], sizes = [1, 49], strides = [1, 1]} : vector<32x49xf32> to vector<1x49xf32>
    %c0_24 = arith.constant 0 : index
    %c588 = arith.constant 588 : index
    %78 = vector.load %arg7[%c0_24, %c588] : memref<1x1568xf32, #tpu.memory_space<vmem>>, vector<1x49xf32>
    tpu.vector_store %arg7[%c0_24, %c588], %77 {strides = array<i32>} : memref<1x1568xf32, #tpu.memory_space<vmem>>, vector<1x49xf32>,
    %79 = vector.extract_strided_slice %52 {offsets = [13, 0], sizes = [1, 49], strides = [1, 1]} : vector<32x49xf32> to vector<1x49xf32>
    %c0_25 = arith.constant 0 : index
    %c637 = arith.constant 637 : index
    %80 = vector.load %arg7[%c0_25, %c637] : memref<1x1568xf32, #tpu.memory_space<vmem>>, vector<1x49xf32>
    tpu.vector_store %arg7[%c0_25, %c637], %79 {strides = array<i32>} : memref<1x1568xf32, #tpu.memory_space<vmem>>, vector<1x49xf32>,
    %81 = vector.extract_strided_slice %52 {offsets = [14, 0], sizes = [1, 49], strides = [1, 1]} : vector<32x49xf32> to vector<1x49xf32>
    %c0_26 = arith.constant 0 : index
    %c686 = arith.constant 686 : index
    %82 = vector.load %arg7[%c0_26, %c686] : memref<1x1568xf32, #tpu.memory_space<vmem>>, vector<1x49xf32>
    tpu.vector_store %arg7[%c0_26, %c686], %81 {strides = array<i32>} : memref<1x1568xf32, #tpu.memory_space<vmem>>, vector<1x49xf32>,
    %83 = vector.extract_strided_slice %52 {offsets = [15, 0], sizes = [1, 49], strides = [1, 1]} : vector<32x49xf32> to vector<1x49xf32>
    %c0_27 = arith.constant 0 : index
    %c735 = arith.constant 735 : index
    %84 = vector.load %arg7[%c0_27, %c735] : memref<1x1568xf32, #tpu.memory_space<vmem>>, vector<1x49xf32>
    tpu.vector_store %arg7[%c0_27, %c735], %83 {strides = array<i32>} : memref<1x1568xf32, #tpu.memory_space<vmem>>, vector<1x49xf32>,
    %85 = vector.extract_strided_slice %52 {offsets = [16, 0], sizes = [1, 49], strides = [1, 1]} : vector<32x49xf32> to vector<1x49xf32>
    %c0_28 = arith.constant 0 : index
    %c784 = arith.constant 784 : index
    %86 = vector.load %arg7[%c0_28, %c784] : memref<1x1568xf32, #tpu.memory_space<vmem>>, vector<1x49xf32>
    tpu.vector_store %arg7[%c0_28, %c784], %85 {strides = array<i32>} : memref<1x1568xf32, #tpu.memory_space<vmem>>, vector<1x49xf32>,
    %87 = vector.extract_strided_slice %52 {offsets = [17, 0], sizes = [1, 49], strides = [1, 1]} : vector<32x49xf32> to vector<1x49xf32>
    %c0_29 = arith.constant 0 : index
    %c833 = arith.constant 833 : index
    %88 = vector.load %arg7[%c0_29, %c833] : memref<1x1568xf32, #tpu.memory_space<vmem>>, vector<1x49xf32>
    tpu.vector_store %arg7[%c0_29, %c833], %87 {strides = array<i32>} : memref<1x1568xf32, #tpu.memory_space<vmem>>, vector<1x49xf32>,
    %89 = vector.extract_strided_slice %52 {offsets = [18, 0], sizes = [1, 49], strides = [1, 1]} : vector<32x49xf32> to vector<1x49xf32>
    %c0_30 = arith.constant 0 : index
    %c882 = arith.constant 882 : index
    %90 = vector.load %arg7[%c0_30, %c882] : memref<1x1568xf32, #tpu.memory_space<vmem>>, vector<1x49xf32>
    tpu.vector_store %arg7[%c0_30, %c882], %89 {strides = array<i32>} : memref<1x1568xf32, #tpu.memory_space<vmem>>, vector<1x49xf32>,
    %91 = vector.extract_strided_slice %52 {offsets = [19, 0], sizes = [1, 49], strides = [1, 1]} : vector<32x49xf32> to vector<1x49xf32>
    %c0_31 = arith.constant 0 : index
    %c931 = arith.constant 931 : index
    %92 = vector.load %arg7[%c0_31, %c931] : memref<1x1568xf32, #tpu.memory_space<vmem>>, vector<1x49xf32>
    tpu.vector_store %arg7[%c0_31, %c931], %91 {strides = array<i32>} : memref<1x1568xf32, #tpu.memory_space<vmem>>, vector<1x49xf32>,
    %93 = vector.extract_strided_slice %52 {offsets = [20, 0], sizes = [1, 49], strides = [1, 1]} : vector<32x49xf32> to vector<1x49xf32>
    %c0_32 = arith.constant 0 : index
    %c980 = arith.constant 980 : index
    %94 = vector.load %arg7[%c0_32, %c980] : memref<1x1568xf32, #tpu.memory_space<vmem>>, vector<1x49xf32>
    tpu.vector_store %arg7[%c0_32, %c980], %93 {strides = array<i32>} : memref<1x1568xf32, #tpu.memory_space<vmem>>, vector<1x49xf32>,
    %95 = vector.extract_strided_slice %52 {offsets = [21, 0], sizes = [1, 49], strides = [1, 1]} : vector<32x49xf32> to vector<1x49xf32>
    %c0_33 = arith.constant 0 : index
    %c1029 = arith.constant 1029 : index
    %96 = vector.load %arg7[%c0_33, %c1029] : memref<1x1568xf32, #tpu.memory_space<vmem>>, vector<1x49xf32>
    tpu.vector_store %arg7[%c0_33, %c1029], %95 {strides = array<i32>} : memref<1x1568xf32, #tpu.memory_space<vmem>>, vector<1x49xf32>,
    %97 = vector.extract_strided_slice %52 {offsets = [22, 0], sizes = [1, 49], strides = [1, 1]} : vector<32x49xf32> to vector<1x49xf32>
    %c0_34 = arith.constant 0 : index
    %c1078 = arith.constant 1078 : index
    %98 = vector.load %arg7[%c0_34, %c1078] : memref<1x1568xf32, #tpu.memory_space<vmem>>, vector<1x49xf32>
    tpu.vector_store %arg7[%c0_34, %c1078], %97 {strides = array<i32>} : memref<1x1568xf32, #tpu.memory_space<vmem>>, vector<1x49xf32>,
    %99 = vector.extract_strided_slice %52 {offsets = [23, 0], sizes = [1, 49], strides = [1, 1]} : vector<32x49xf32> to vector<1x49xf32>
    %c0_35 = arith.constant 0 : index
    %c1127 = arith.constant 1127 : index
    %100 = vector.load %arg7[%c0_35, %c1127] : memref<1x1568xf32, #tpu.memory_space<vmem>>, vector<1x49xf32>
    tpu.vector_store %arg7[%c0_35, %c1127], %99 {strides = array<i32>} : memref<1x1568xf32, #tpu.memory_space<vmem>>, vector<1x49xf32>,
    %101 = vector.extract_strided_slice %52 {offsets = [24, 0], sizes = [1, 49], strides = [1, 1]} : vector<32x49xf32> to vector<1x49xf32>
    %c0_36 = arith.constant 0 : index
    %c1176 = arith.constant 1176 : index
    %102 = vector.load %arg7[%c0_36, %c1176] : memref<1x1568xf32, #tpu.memory_space<vmem>>, vector<1x49xf32>
    tpu.vector_store %arg7[%c0_36, %c1176], %101 {strides = array<i32>} : memref<1x1568xf32, #tpu.memory_space<vmem>>, vector<1x49xf32>,
    %103 = vector.extract_strided_slice %52 {offsets = [25, 0], sizes = [1, 49], strides = [1, 1]} : vector<32x49xf32> to vector<1x49xf32>
    %c0_37 = arith.constant 0 : index
    %c1225 = arith.constant 1225 : index
    %104 = vector.load %arg7[%c0_37, %c1225] : memref<1x1568xf32, #tpu.memory_space<vmem>>, vector<1x49xf32>
    tpu.vector_store %arg7[%c0_37, %c1225], %103 {strides = array<i32>} : memref<1x1568xf32, #tpu.memory_space<vmem>>, vector<1x49xf32>,
    %105 = vector.extract_strided_slice %52 {offsets = [26, 0], sizes = [1, 49], strides = [1, 1]} : vector<32x49xf32> to vector<1x49xf32>
    %c0_38 = arith.constant 0 : index
    %c1274 = arith.constant 1274 : index
    %106 = vector.load %arg7[%c0_38, %c1274] : memref<1x1568xf32, #tpu.memory_space<vmem>>, vector<1x49xf32>
    tpu.vector_store %arg7[%c0_38, %c1274], %105 {strides = array<i32>} : memref<1x1568xf32, #tpu.memory_space<vmem>>, vector<1x49xf32>,
    %107 = vector.extract_strided_slice %52 {offsets = [27, 0], sizes = [1, 49], strides = [1, 1]} : vector<32x49xf32> to vector<1x49xf32>
    %c0_39 = arith.constant 0 : index
    %c1323 = arith.constant 1323 : index
    %108 = vector.load %arg7[%c0_39, %c1323] : memref<1x1568xf32, #tpu.memory_space<vmem>>, vector<1x49xf32>
    tpu.vector_store %arg7[%c0_39, %c1323], %107 {strides = array<i32>} : memref<1x1568xf32, #tpu.memory_space<vmem>>, vector<1x49xf32>,
    %109 = vector.extract_strided_slice %52 {offsets = [28, 0], sizes = [1, 49], strides = [1, 1]} : vector<32x49xf32> to vector<1x49xf32>
    %c0_40 = arith.constant 0 : index
    %c1372 = arith.constant 1372 : index
    %110 = vector.load %arg7[%c0_40, %c1372] : memref<1x1568xf32, #tpu.memory_space<vmem>>, vector<1x49xf32>
    tpu.vector_store %arg7[%c0_40, %c1372], %109 {strides = array<i32>} : memref<1x1568xf32, #tpu.memory_space<vmem>>, vector<1x49xf32>,
    %111 = vector.extract_strided_slice %52 {offsets = [29, 0], sizes = [1, 49], strides = [1, 1]} : vector<32x49xf32> to vector<1x49xf32>
    %c0_41 = arith.constant 0 : index
    %c1421 = arith.constant 1421 : index
    %112 = vector.load %arg7[%c0_41, %c1421] : memref<1x1568xf32, #tpu.memory_space<vmem>>, vector<1x49xf32>
    tpu.vector_store %arg7[%c0_41, %c1421], %111 {strides = array<i32>} : memref<1x1568xf32, #tpu.memory_space<vmem>>, vector<1x49xf32>,
    %113 = vector.extract_strided_slice %52 {offsets = [30, 0], sizes = [1, 49], strides = [1, 1]} : vector<32x49xf32> to vector<1x49xf32>
    %c0_42 = arith.constant 0 : index
    %c1470 = arith.constant 1470 : index
    %114 = vector.load %arg7[%c0_42, %c1470] : memref<1x1568xf32, #tpu.memory_space<vmem>>, vector<1x49xf32>
    tpu.vector_store %arg7[%c0_42, %c1470], %113 {strides = array<i32>} : memref<1x1568xf32, #tpu.memory_space<vmem>>, vector<1x49xf32>,
    %115 = vector.extract_strided_slice %52 {offsets = [31, 0], sizes = [1, 49], strides = [1, 1]} : vector<32x49xf32> to vector<1x49xf32>
    %c0_43 = arith.constant 0 : index
    %c1519 = arith.constant 1519 : index
    %116 = vector.load %arg7[%c0_43, %c1519] : memref<1x1568xf32, #tpu.memory_space<vmem>>, vector<1x49xf32>
    tpu.vector_store %arg7[%c0_43, %c1519], %115 {strides = array<i32>} : memref<1x1568xf32, #tpu.memory_space<vmem>>, vector<1x49xf32>,
    tpu.wait_dma2 semaphore(%arg8 : memref<!tpu.dma_semaphore, #tpu.memory_space<semaphore_mem>>) src(%arg4 : memref<1568x1024xbf16, #tpu.memory_space<any>>) dst(%arg6 : memref<1568x1024xbf16, #tpu.memory_space<vmem>>)
    %c0_44 = arith.constant 0 : index
    %c0_45 = arith.constant 0 : index
    %117 = vector.load %arg7[%c0_44, %c0_45] : memref<1x1568xf32, #tpu.memory_space<vmem>>, vector<1x1568xf32>
    %118 = arith.truncf %117 : vector<1x1568xf32> to vector<1x1568xbf16>
    %c0_46 = arith.constant 0 : index
    %c0_47 = arith.constant 0 : index
    %119 = vector.load %arg6[%c0_46, %c0_47] : memref<1568x1024xbf16, #tpu.memory_space<vmem>>, vector<1568x1024xbf16>
    %cst_48 = arith.constant dense<0.000000e+00> : vector<1x1024xf32>
    %120 = tpu.matmul %118, %119, %cst_48 {dimension_numbers = #tpu.dot_dimension_numbers<[1], [0], [0], [1], [0, 0, 1, 1], [], []>} : vector<1x1568xbf16>, vector<1568x1024xbf16>, vector<1x1024xf32> -> vector<1x1024xf32>
    %cst_49 = arith.constant 0.000000e+00 : f32
    %121 = vector.broadcast %cst_49 : f32 to vector<1x1024xf32>
    %122 = arith.subf %121, %120 : vector<1x1024xf32>
    %123 = math.exp %122 : vector<1x1024xf32>
    %cst_50 = arith.constant 1.000000e+00 : f32
    %124 = vector.broadcast %cst_50 : f32 to vector<1x1024xf32>
    %125 = arith.addf %124, %123 : vector<1x1024xf32>
    %126 = tpu.reciprocal %125 {approx = true} : vector<1x1024xf32> -> vector<1x1024xf32>
    %c0_51 = arith.constant 0 : index
    %c0_52 = arith.constant 0 : index
    %127 = vector.load %arg5[%c0_51, %c0_52] : memref<1x1024xf32, #tpu.memory_space<vmem>>, vector<1x1024xf32>
    tpu.vector_store %arg5[%c0_51, %c0_52], %126 {strides = array<i32>} : memref<1x1024xf32, #tpu.memory_space<vmem>>, vector<1x1024xf32>,
    return
  }
}

</mosaic_0001>

<bundles_post_ra>
// kernel: mnist_lenet_forward.1
= control target key start
LH: loop header
LB: loop body
LE: loop exit
PB: predicated region body
PF: predicated region fallthrough
CT: control target
= control target key end

     0   :  { %10 = vsyncpa [#allocation6], 0  ;;  %s6495_s0 = inlined_call_operand.vmem [shape: f32[32,1536], index: 0, kind: input, shape index: {}]   ;;  %s6496_s1 = inlined_call_operand.hbm [shape: f32[16,32], index: 1, kind: input, shape index: {}]   ;;  %s6497_s2 = inlined_call_operand.vmem [shape: f32[32,400], index: 2, kind: input, shape index: {}]   ;;  %s6498_s3 = inlined_call_operand.vmem [shape: f32[232,49], index: 3, kind: input, shape index: {}]   ;;  %s6499_s4 = inlined_call_operand.hbm [shape: bf16[1568,1024], index: 4, kind: input, shape index: {}]   ;;  %s6500_s5 = inlined_call_operand.hbm [shape: f32[1,1024], index: 5, kind: output, shape index: {}]  }
   0x1   :  { %11 = vsyncpa [#allocation7], 0  ;;  %s4992_s18 = smov [#allocation5]   ;;  %s4942_s22 = scalar_lea.hbm %s6496_s1, 256 }
   0x2   :  { %s19_s19 = sshll.u32 %s4992_s18, 4  ;;  %p4943_p0 = scmp.ne.s32.totalorder %s6496_s1, %s4942_s22  ;;  %s20_s19 = int_to_ptr.vmem [resolvable:$true] %s19_s19 }
   0x3   :  { %p4946_p1 = scmp.lt.u32.totalorder %s4942_s22, %s6496_s1 }
   0x5   :  { %p4948_p2 = pnand %p4946_p1, %p4943_p0 }
   0x7   :  { %4951 = shalt.err (!%p4948_p2)
}
   0x8   :  { %s4952_s27 = scalar_lea.vmem %s20_s19, 256  ;;  %p4957_p4 = scmp.lt.s32.totalorder %s20_s19, %s20_s19 }
   0x9   :  { %p4953_p3 = scmp.ne.s32.totalorder %s20_s19, %s4952_s27  ;;  %p4958_p5 = scmp.lt.s32.totalorder %s4952_s27, %s4952_s27 }
   0xb   :  { %p4959_p6 = por %p4958_p5, %p4957_p4 }
   0xd   :  { %p4960_p7 = pnand %p4959_p6, %p4953_p3 }
   0xf   :  { %4963 = shalt.err (!%p4960_p7)
}
  0x10   :  { %s4993_s28 = smov 128   ;;  %s4994_s29 = smov 8  }
  0x11   :  { %25 = dma.hbm_to_vmem [thread:$0]  %s6496_s1, 256, %s20_s19, [#allocation6], %s4993_s28, %s4993_s28, %s4994_s29  }
  0x12   :  { %4986 = dma.done.wait [#allocation6], 256  }
  0x13   :  { %4987 = vsyncadd [#allocation6], 4294967040  ;;  %s38_s7 = sld [smem:[#allocation0]]   ;;  %s4995_s8 = smov 1024   ;;  %v4996_v0 = vmov 0.0   ;;  %vm6501_vm0 = vcmask 261120  }
  0x14   :  { %50 = sst [smem:[#allocation10]] %s4995_s8  ;;  %190 = vmatprep.mubr.f32.mxu1 %v4996_v0  ;;  %s4997_s9 = smov 64   ;;  %vm630_vm1 = vcmask 1039360   ;;  %vm672_vm2 = vcmask 1022976   ;;  %vm651_vm3 = vcmask 1031168   ;;  %vm945_vm4 = vcmask 908288  }
  0x15   :  { %52 = sst [smem:[#allocation10 + $0x1]] %s4995_s8  ;;  %s4998_s10 = smov 2   ;;  %vm714_vm5 = vcmask 900096   ;;  %vm693_vm6 = vcmask 1014784   ;;  %vm735_vm7 = vcmask 891904   ;;  %vm756_vm8 = vcmask 883712  }
  0x16   :  { %54 = sst [smem:[#allocation10 + $0x2]] %s4994_s29  ;;  %s4999_s11 = smov [#allocation2]   ;;  %vm777_vm9 = vcmask 875520   ;;  %vm798_vm10 = vcmask 867328   ;;  %vm819_vm11 = vcmask 752640   ;;  %vm861_vm12 = vcmask 736256  }
  0x17   :  { %56 = sst [smem:[#allocation10 + $0x3]] %s4997_s9  ;;  %s46_s12 = sshll.u32 %s4999_s11, 4  ;;  %vm840_vm13 = vcmask 744448   ;;  %vm882_vm14 = vcmask 728064   ;;  %vm903_vm15 = vcmask 719872   ;;  %s47_s12 = int_to_ptr.vmem [resolvable:$true] %s46_s12 }
  0x18   :  { %58 = sst [smem:[#allocation10 + $0x4]] %s4993_s28  ;;  %s5000_s1 = smov 512  }
  0x19   :  { %60 = sst [smem:[#allocation10 + $0x5]] %s4998_s10  ;;  %s4156_s13 = sshll.u32 %s38_s7, 26 }
  0x1a   :  { %62 = sst [smem:[#allocation10 + $0x6]] %s5000_s1  ;;  %s4157_s14 = sadd.s32 134217728, %s4156_s13 }
  0x1b   :  { %64 = sst [smem:[#allocation10 + $0x7]] %s4997_s9  ;;  %s5001_s15 = smov 4  }
  0x1c   :  { %66 = sst [smem:[#allocation10 + $0x8]] %s5001_s15  ;;  %s5002_s16 = smov [#allocation4]  }
  0x1d   :  { %s5003_s17 = smov [#allocation9]   ;;  %s5005_s13 = smov 127  }
  0x1e   :  { %68 = dma.general %s6499_s4, 100352, %s47_s12, %s5002_s16, %s5003_s17, [#allocation10], %s4157_s14, 0  }
  0x1f   :  { %v72_v1 = vld [vmem:[%s6495_s0 + $0x8] sm:$0xff]  ;;  %v71_v3 = vld [vmem:[%s6495_s0] sm:$0xff]  ;;  %v74_v12 = vld [vmem:[%s6495_s0 + $0x18] sm:$0xff]  ;;  %s5006_s1 = smov 110   ;;  %s5007_s14 = smov 126  }
  0x20   :  { %v84_v2 = vld [vmem:[%s6495_s0 + $0x68] sm:$0xff]  ;;  %v83_v5 = vld [vmem:[%s6495_s0 + $0x60] sm:$0xff]  ;;  %v86_v13 = vld [vmem:[%s6495_s0 + $0x78] sm:$0xff]  ;;  %s5008_s15 = smov 109   ;;  %s5009_s16 = smov 124  }
  0x21   :  { %v4183_v4 = vpack.c.bf16 %v84_v2, %v72_v1  ;;  %v96_v6 = vld [vmem:[%s6495_s0 + $0xc8] sm:$0xff]  ;;  %v4185_v8 = vpack.c.bf16 %v83_v5, %v71_v3  ;;  %v95_v10 = vld [vmem:[%s6495_s0 + $0xc0] sm:$0xff]  ;;  %v4191_v15 = vpack.c.bf16 %v86_v13, %v74_v12  ;;  %v73_v16 = vld [vmem:[%s6495_s0 + $0x10] sm:$0xff]  ;;  %s5010_s17 = smov 107   ;;  %s5011_s18 = smov 111  }
  0x22   :  { %v108_v7 = vld [vmem:[%s6495_s0 + $0x128] sm:$0xff]  ;;  %v107_v11 = vld [vmem:[%s6495_s0 + $0x120] sm:$0xff]  ;;  %v85_v17 = vld [vmem:[%s6495_s0 + $0x70] sm:$0xff]  ;;  %s5012_s19 = smov 92   ;;  %s5013_s20 = smov 108  }
  0x23   :  { %v4187_v9 = vpack.c.bf16 %v108_v7, %v96_v6  ;;  %4184 = vmatprep.subr.bf16.mxu1 %v4183_v4  ;;  %v4189_v14 = vpack.c.bf16 %v107_v11, %v95_v10  ;;  %v98_v18 = vld [vmem:[%s6495_s0 + $0xd8] sm:$0xff]  ;;  %v4193_v21 = vpack.c.bf16 %v85_v17, %v73_v16  ;;  %v97_v23 = vld [vmem:[%s6495_s0 + $0xd0] sm:$0xff]  ;;  %v76_v25 = vld [vmem:[%s6495_s0 + $0x28] sm:$0xff]  ;;  %s5014_s21 = smov 90   ;;  %s5015_s22 = smov 106  }
  0x24   :  { %4186 = vmatpush1.bf16.msra.mxu1 %v4185_v8  ;;  %v110_v19 = vld [vmem:[%s6495_s0 + $0x138] sm:$0xff]  ;;  %v109_v24 = vld [vmem:[%s6495_s0 + $0x130] sm:$0xff]  ;;  %v88_v26 = vld [vmem:[%s6495_s0 + $0x88] sm:$0xff]  ;;  %s5016_s23 = smov 91   ;;  %s5017_s24 = smov 89  }
  0x25   :  { %4188 = vmatprep.subr.bf16.mxu1 %v4187_v9  ;;  %v5140_v20 = vld [vmem:[#allocation5] sm:$0xff]  ;;  %v4195_v22 = vpack.c.bf16 %v110_v19, %v98_v18  ;;  %v5157_v27 = vld [vmem:[#allocation5 + $0x8] sm:$0xff]  ;;  %v4197_v28 = vpack.c.bf16 %v109_v24, %v97_v23  ;;  %v4199_v29 = vpack.c.bf16 %v88_v26, %v76_v25  ;;  %v77_v42 = vld [vmem:[%s6495_s0 + $0x30] sm:$0xff]  ;;  %s5018_s25 = smov 88   ;;  %s5019_s26 = smov 74  }
  0x26   :  { %v75_v30 = vld [vmem:[%s6495_s0 + $0x20] sm:$0xff]  ;;  %v100_v32 = vld [vmem:[%s6495_s0 + $0xe8] sm:$0xff]  ;;  %v78_v38 = vld [vmem:[%s6495_s0 + $0x38] sm:$0xff]  ;;  %s5020_s27 = smov 73   ;;  %s5025_s8 = smov 68  }
  0x27   :  { %v87_v31 = vld [vmem:[%s6495_s0 + $0x80] sm:$0xff]  ;;  %v112_v33 = vld [vmem:[%s6495_s0 + $0x148] sm:$0xff]  ;;  %v90_v39 = vld [vmem:[%s6495_s0 + $0x98] sm:$0xff]  ;;  %s5026_s9 = smov 19   ;;  %s5027_s10 = smov 117  }
  0x28   :  { %4190 = vmatpush1.bf16.msra.mxu1 %v4189_v14  ;;  %v4201_v34 = vpack.c.bf16 %v87_v31, %v75_v30  ;;  %v4203_v35 = vpack.c.bf16 %v112_v33, %v100_v32  ;;  %v99_v36 = vld [vmem:[%s6495_s0 + $0xe0] sm:$0xff]  ;;  %v4207_v41 = vpack.c.bf16 %v90_v39, %v78_v38  ;;  %v89_v43 = vld [vmem:[%s6495_s0 + $0x90] sm:$0xff]  ;;  %v102_v44 = vld [vmem:[%s6495_s0 + $0xf8] sm:$0xff]  ;;  %s5028_s11 = smov 87   ;;  %s5029_s12 = smov 38  }
  0x29   :  { %4192 = vmatprep.subr.bf16.mxu1 %v4191_v15  ;;  %v111_v37 = vld [vmem:[%s6495_s0 + $0x140] sm:$0xff]  ;;  %v114_v45 = vld [vmem:[%s6495_s0 + $0x158] sm:$0xff]  ;;  %v4209_v46 = vpack.c.bf16 %v89_v43, %v77_v42  ;;  %v101_v48 = vld [vmem:[%s6495_s0 + $0xf0] sm:$0xff]  ;;  %s5045_s28 = smov 43   ;;  %s5046_s30 = smov 13  }
  0x2a   :  { %v4205_v40 = vpack.c.bf16 %v111_v37, %v99_v36  ;;  %v4211_v47 = vpack.c.bf16 %v114_v45, %v102_v44  ;;  %v113_v49 = vld [vmem:[%s6495_s0 + $0x150] sm:$0xff]  ;;  %v80_v50 = vld [vmem:[%s6495_s0 + $0x48] sm:$0xff]  ;;  %v79_v54 = vld [vmem:[%s6495_s0 + $0x40] sm:$0xff]  ;;  %s5047_s4 = smov 62  }
  0x2b   :  { %4158 = vmatmul.mubr.msk.f32.vlgmr.msra.gmra.mrb[0].mxu1 %vm6501_vm0, %v5140_v20  ;;  %v92_v51 = vld [vmem:[%s6495_s0 + $0xa8] sm:$0xff]  ;;  %v4213_v52 = vpack.c.bf16 %v113_v49, %v101_v48  ;;  %v91_v55 = vld [vmem:[%s6495_s0 + $0xa0] sm:$0xff]  ;;  %v82_v62 = vld [vmem:[%s6495_s0 + $0x58] sm:$0xff] }
  0x2c   :  { %4194 = vmatpush1.bf16.msra.mxu1 %v4193_v21  ;;  %196 = vmatprep.mubr.f32.mxu1 %v4996_v0  ;;  %v4215_v53 = vpack.c.bf16 %v92_v51, %v80_v50  ;;  %v104_v56 = vld [vmem:[%s6495_s0 + $0x108] sm:$0xff]  ;;  %v4217_v58 = vpack.c.bf16 %v91_v55, %v79_v54  ;;  %v103_v60 = vld [vmem:[%s6495_s0 + $0x100] sm:$0xff]  ;;  %v94_v63 = vld [vmem:[%s6495_s0 + $0xb8] sm:$0xff] }
  0x2d   :  { %4196 = vmatprep.subr.bf16.mxu1 %v4195_v22  ;;  %v116_v57 = vld [vmem:[%s6495_s0 + $0x168] sm:$0xff]  ;;  %v115_v61 = vld [vmem:[%s6495_s0 + $0x160] sm:$0xff]  ;;  %v4223_v2 = vpack.c.bf16 %v94_v63, %v82_v62  ;;  %v81_v3 = vld [vmem:[%s6495_s0 + $0x50] sm:$0xff] }
  0x2e   :  { %v4219_v59 = vpack.c.bf16 %v116_v57, %v104_v56  ;;  %v4221_v1 = vpack.c.bf16 %v115_v61, %v103_v60  ;;  %v93_v4 = vld [vmem:[%s6495_s0 + $0xb0] sm:$0xff]  ;;  %v106_v5 = vld [vmem:[%s6495_s0 + $0x118] sm:$0xff] }
  0x2f   :  { %4159 = vmatmul.mubr.msk.f32.gmra.mrb[2].mxu1 %vm6501_vm0, %v5157_v27  ;;  %v118_v6 = vld [vmem:[%s6495_s0 + $0x178] sm:$0xff]  ;;  %v4225_v7 = vpack.c.bf16 %v93_v4, %v81_v3  ;;  %v105_v9 = vld [vmem:[%s6495_s0 + $0x110] sm:$0xff] }
  0x30   :  { %4198 = vmatpush1.bf16.msra.mxu1 %v4197_v28  ;;  %267 = vmatprep.mubr.f32.mxu1 %v4996_v0  ;;  %v4227_v8 = vpack.c.bf16 %v118_v6, %v106_v5  ;;  %v117_v10 = vld [vmem:[%s6495_s0 + $0x170] sm:$0xff]  ;;  %s5004_s0 = smov 125  }
  0x31   :  { %4200 = vmatprep.subr.bf16.mxu1 %v4199_v29  ;;  %v4229_v11 = vpack.c.bf16 %v117_v10, %v105_v9 }
  0x33   :  { %4160 = vmatmul.mubr.msk.f32.vlgmr.msra.gmra.mrb[4].mxu1 %vm6501_vm0, %v5140_v20 }
  0x34   :  { %4202 = vmatpush1.bf16.msra.mxu1 %v4201_v34  ;;  %273 = vmatprep.mubr.f32.mxu1 %v4996_v0 }
  0x35   :  { %4204 = vmatprep.subr.bf16.mxu1 %v4203_v35 }
  0x37   :  { %4161 = vmatmul.mubr.msk.f32.gmra.mrb[6].mxu1 %vm6501_vm0, %v5157_v27 }
  0x38   :  { %4206 = vmatpush1.bf16.msra.mxu1 %v4205_v40  ;;  %344 = vmatprep.mubr.f32.mxu1 %v4996_v0 }
  0x39   :  { %4208 = vmatprep.subr.bf16.mxu1 %v4207_v41 }
  0x3b   :  { %4162 = vmatmul.mubr.msk.f32.vlgmr.msra.gmra.mrb[8].mxu1 %vm6501_vm0, %v5140_v20 }
  0x3c   :  { %4210 = vmatpush1.bf16.msra.mxu1 %v4209_v46  ;;  %350 = vmatprep.mubr.f32.mxu1 %v4996_v0 }
  0x3d   :  { %4212 = vmatprep.subr.bf16.mxu1 %v4211_v47 }
  0x3f   :  { %4163 = vmatmul.mubr.msk.f32.gmra.mrb[10].mxu1 %vm6501_vm0, %v5157_v27 }
  0x40   :  { %4214 = vmatpush1.bf16.msra.mxu1 %v4213_v52  ;;  %421 = vmatprep.mubr.f32.mxu1 %v4996_v0 }
  0x41   :  { %4216 = vmatprep.subr.bf16.mxu1 %v4215_v53 }
  0x43   :  { %4164 = vmatmul.mubr.msk.f32.vlgmr.msra.gmra.mrb[12].mxu1 %vm6501_vm0, %v5140_v20 }
  0x44   :  { %4218 = vmatpush1.bf16.msra.mxu1 %v4217_v58  ;;  %427 = vmatprep.mubr.f32.mxu1 %v4996_v0 }
  0x45   :  { %4220 = vmatprep.subr.bf16.mxu1 %v4219_v59 }
  0x47   :  { %4165 = vmatmul.mubr.msk.f32.gmra.mrb[14].mxu1 %vm6501_vm0, %v5157_v27 }
  0x48   :  { %4222 = vmatpush1.bf16.msra.mxu1 %v4221_v1  ;;  %498 = vmatprep.mubr.f32.mxu1 %v4996_v0 }
  0x49   :  { %4224 = vmatprep.subr.bf16.mxu1 %v4223_v2  ;;  %v1132_v2 = vld [vmem:[%s6497_s2 + $0x8] sm:$0xff] }
  0x4a   :  { %1224 = vmatprep.mubr.f32.mxu0 %v1132_v2 }
  0x4b   :  { %4166 = vmatmul.mubr.msk.f32.vlgmr.msra.gmra.mrb[16].mxu1 %vm6501_vm0, %v5140_v20 }
  0x4c   :  { %4226 = vmatpush1.bf16.msra.mxu1 %v4225_v7  ;;  %504 = vmatprep.mubr.f32.mxu1 %v4996_v0 }
  0x4d   :  { %4228 = vmatprep.subr.bf16.mxu1 %v4227_v8 }
  0x4f   :  { %4167 = vmatmul.mubr.msk.f32.gmra.mrb[18].mxu1 %vm6501_vm0, %v5157_v27 }
  0x50   :  { %4230 = vmatpush1.bf16.msra.mxu1 %v4229_v11  ;;  %575 = vmatprep.mubr.f32.mxu1 %v4996_v0 }
  0x53   :  { %4168 = vmatmul.mubr.msk.f32.vlgmr.msra.gmra.mrb[20].mxu1 %vm6501_vm0, %v5140_v20 }
  0x54   :  { %581 = vmatprep.mubr.f32.mxu1 %v4996_v0 }
  0x57   :  { %4169 = vmatmul.mubr.msk.f32.gmra.mrb[22].mxu1 %vm6501_vm0, %v5157_v27 }
  0xfe   :  { %v192_v12 = vpop.f32.mrb[0].mxu1 }
  0xff   :  { %v194_v13 = vpop.f32.mrb[1].mxu1 }
 0x102   :  { %v198_v14 = vpop.f32.mrb[2].mxu1 }
 0x103   :  { %v200_v15 = vpop.f32.mrb[3].mxu1 }
 0x106   :  { %v269_v16 = vpop.f32.mrb[4].mxu1 }
 0x107   :  { %v271_v17 = vpop.f32.mrb[5].mxu1 }
 0x108   :  { %v588_v18 = vmax.f32 %v192_v12, %v271_v17 }
 0x10a   :  { %v275_v19 = vpop.f32.mrb[6].mxu1 }
 0x10b   :  { %v277_v21 = vpop.f32.mrb[7].mxu1 }
 0x10c   :  { %v591_v22 = vmax.f32 %v198_v14, %v277_v21 }
 0x10e   :  { %v346_v23 = vpop.f32.mrb[8].mxu1 }
 0x10f   :  { %v589_v24 = vmax.f32 %v194_v13, %v346_v23  ;;  %v348_v25 = vpop.f32.mrb[9].mxu1 }
 0x110   :  { %v590_v26 = vmax.f32 %v269_v16, %v348_v25 }
 0x112   :  { %v352_v20 = vpop.f32.mrb[10].mxu1 }
 0x113   :  { %v592_v28 = vmax.f32 %v200_v15, %v352_v20  ;;  %v354_v29 = vpop.f32.mrb[11].mxu1 }
 0x114   :  { %v593_v30 = vmax.f32 %v275_v19, %v354_v29 }
 0x116   :  { %v423_v31 = vpop.f32.mrb[12].mxu1 }
 0x117   :  { %v425_v27 = vpop.f32.mrb[13].mxu1 }
 0x11a   :  { %v429_v32 = vpop.f32.mrb[14].mxu1 }
 0x11b   :  { %v431_v33 = vpop.f32.mrb[15].mxu1 }
 0x11e   :  { %v500_v34 = vpop.f32.mrb[16].mxu1 }
 0x11f   :  { %v502_v35 = vpop.f32.mrb[17].mxu1 }
 0x120   :  { %v594_v36 = vmax.f32 %v423_v31, %v502_v35 }
 0x122   :  { %v600_v37 = vmax.f32 %v588_v18, %v594_v36  ;;  %v506_v38 = vpop.f32.mrb[18].mxu1 }
 0x123   :  { %v508_v39 = vpop.f32.mrb[19].mxu1 }
 0x124   :  { %v597_v40 = vmax.f32 %v429_v32, %v508_v39  ;;  %v606_v45 = vmax.f32 %v600_v37, 0.0 }
 0x126   :  { %v603_v41 = vmax.f32 %v591_v22, %v597_v40  ;;  %v577_v42 = vpop.f32.mrb[20].mxu1 }
 0x127   :  { %v595_v43 = vmax.f32 %v425_v27, %v577_v42  ;;  %v579_v44 = vpop.f32.mrb[21].mxu1 }
 0x128   :  { %v609_v46 = vmax.f32 %v603_v41, 0.0  ;;  %v596_v47 = vmax.f32 %v500_v34, %v579_v44 }
 0x129   :  { %v601_v48 = vmax.f32 %v589_v24, %v595_v43 }
 0x12a   :  { %v602_v49 = vmax.f32 %v590_v26, %v596_v47  ;;  %v583_v50 = vpop.f32.mrb[22].mxu1  ;;  %v5281_v51 = vpack.i.bf16 %v609_v46, %v606_v45  ;;  %v4233_v57 = vpack.c.bf16 %v609_v46, %v606_v45 }
 0x12b   :  { %v607_v52 = vmax.f32 %v601_v48, 0.0  ;;  %v598_v53 = vmax.f32 %v431_v33, %v583_v50  ;;  %v585_v54 = vpop.f32.mrb[23].mxu1 }
 0x12c   :  { %v608_v55 = vmax.f32 %v602_v49, 0.0  ;;  %v599_v56 = vmax.f32 %v506_v38, %v585_v54  ;;  %4546 = vrot.lane.b32.xlu0 %v5281_v51, %s5004_s0  ;;  %4536 = vrot.lane.b32.xlu1 %v5281_v51, %s5005_s13 }
 0x12d   :  { %v604_v58 = vmax.f32 %v592_v28, %v598_v53 }
 0x12e   :  { %v605_v59 = vmax.f32 %v593_v30, %v599_v56  ;;  %v4605_v61 = vpack.i.bf16 %v608_v55, %v607_v52 }
 0x12f   :  { %v610_v60 = vmax.f32 %v604_v58, 0.0 }
 0x130   :  { %v611_v62 = vmax.f32 %v605_v59, 0.0  ;;  %4556 = vrot.lane.b32.xlu0 %v5281_v51, %s5006_s1  ;;  %4541 = vrot.lane.b32.xlu1 %v5281_v51, %s5007_s14 }
 0x131   :  { %v4231_v63 = vpack.c.bf16 %v610_v60, %v607_v52 }
 0x132   :  { %v4675_v1 = vpack.i.bf16 %v611_v62, %v610_v60 }
 0x133   :  { %4232 = vmatprep.subr.bf16.mxu0 %v4231_v63 }
 0x134   :  { %4566 = vrot.lane.b32.xlu0 %v5281_v51, %s5008_s15  ;;  %4551 = vrot.lane.b32.xlu1 %v5281_v51, %s5009_s16 }
 0x135   :  { %4234 = vmatpush1.bf16.msra.mxu0 %v4233_v57 }
 0x138   :  { %4576 = vrot.lane.b32.xlu0 %v5281_v51, %s5010_s17  ;;  %4561 = vrot.lane.b32.xlu1 %v5281_v51, %s5011_s18 }
 0x13c   :  { %4586 = vrot.lane.b32.xlu0 %v5281_v51, %s5012_s19  ;;  %4571 = vrot.lane.b32.xlu1 %v5281_v51, %s5013_s20 }
 0x140   :  { %4596 = vrot.lane.b32.xlu0 %v5281_v51, %s5014_s21  ;;  %4581 = vrot.lane.b32.xlu1 %v5281_v51, %s5015_s22 }
 0x144   :  { %4591 = vrot.lane.b32.xlu1 %v5281_v51, %s5016_s23  ;;  %4606 = vrot.lane.b32.xlu0 %v4605_v61, %s5005_s13 }
 0x148   :  { %4601 = vrot.lane.b32.xlu1 %v5281_v51, %s5017_s24  ;;  %4616 = vrot.lane.b32.xlu0 %v4605_v61, %s5004_s0 }
 0x14c   :  { %4611 = vrot.lane.b32.xlu1 %v4605_v61, %s5007_s14  ;;  %4626 = vrot.lane.b32.xlu0 %v4605_v61, %s5006_s1 }
 0x150   :  { %4621 = vrot.lane.b32.xlu1 %v4605_v61, %s5009_s16  ;;  %4636 = vrot.lane.b32.xlu0 %v4605_v61, %s5008_s15 }
 0x154   :  { %4631 = vrot.lane.b32.xlu1 %v4605_v61, %s5011_s18  ;;  %4646 = vrot.lane.b32.xlu0 %v4605_v61, %s5010_s17 }
 0x158   :  { %4641 = vrot.lane.b32.xlu1 %v4605_v61, %s5013_s20  ;;  %4656 = vrot.lane.b32.xlu0 %v4605_v61, %s5012_s19 }
 0x15c   :  { %4651 = vrot.lane.b32.xlu1 %v4605_v61, %s5015_s22  ;;  %4666 = vrot.lane.b32.xlu0 %v4605_v61, %s5014_s21 }
 0x160   :  { %4661 = vrot.lane.b32.xlu1 %v4605_v61, %s5016_s23  ;;  %4676 = vrot.lane.b32.xlu0 %v4675_v1, %s5005_s13 }
 0x164   :  { %4671 = vrot.lane.b32.xlu1 %v4605_v61, %s5017_s24  ;;  %4681 = vrot.lane.b32.xlu0 %v4675_v1, %s5007_s14  ;;  %s5030_s14 = smov 57  }
 0x168   :  { %4691 = vrot.lane.b32.xlu1 %v4675_v1, %s5004_s0  ;;  %4686 = vrot.lane.b32.xlu0 %v4605_v61, %s5018_s25 }
 0x16c   :  { %4706 = vrot.lane.b32.xlu1 %v4605_v61, %s5019_s26  ;;  %4696 = vrot.lane.b32.xlu0 %v4675_v1, %s5009_s16  ;;  %s5032_s16 = smov 27  }
 0x170   :  { %4711 = vrot.lane.b32.xlu1 %v4675_v1, %s5006_s1  ;;  %4701 = vrot.lane.b32.xlu0 %v5281_v51, %s5018_s25 }
 0x174   :  { %4721 = vrot.lane.b32.xlu1 %v4675_v1, %s5008_s15  ;;  %4716 = vrot.lane.b32.xlu0 %v4675_v1, %s5011_s18  ;;  %s5031_s15 = smov 76  }
 0x178   :  { %4726 = vrot.lane.b32.xlu1 %v5281_v51, %s5019_s26  ;;  %4731 = vrot.lane.b32.xlu0 %v4675_v1, %s5013_s20  ;;  %s5037_s20 = smov 65  }
 0x17c   :  { %4741 = vrot.lane.b32.xlu1 %v4675_v1, %s5010_s17  ;;  %4736 = vrot.lane.b32.xlu0 %v4605_v61, %s5020_s27  ;;  %s5036_s17 = smov 16  }
 0x180   :  { %4756 = vrot.lane.b32.xlu1 %v4675_v1, %s5012_s19  ;;  %4746 = vrot.lane.b32.xlu0 %v4675_v1, %s5015_s22 }
 0x184   :  { %4766 = vrot.lane.b32.xlu1 %v4675_v1, %s5014_s21  ;;  %4751 = vrot.lane.b32.xlu0 %v5281_v51, %s5020_s27  ;;  %s5039_s21 = smov 35  }
 0x188   :  { %4776 = vrot.lane.b32.xlu1 %v4675_v1, %s5018_s25  ;;  %4761 = vrot.lane.b32.xlu0 %v4675_v1, %s5016_s23  ;;  %s5041_s23 = smov 5   ;;  %s5043_s25 = smov 122  }
 0x18c   :  { %4786 = vrot.lane.b32.xlu1 %v4675_v1, %s5020_s27  ;;  %4771 = vrot.lane.b32.xlu0 %v4675_v1, %s5017_s24  ;;  %s5042_s24 = smov 24  }
 0x190   :  { %4781 = vrot.lane.b32.xlu0 %v4675_v1, %s5019_s26  ;;  %s5044_s26 = smov 103  }
 0x19e   :  { %v5348_v3 = vpop.permute.xlu0 %4546  ;;  %v4537_v4 = vpop.permute.xlu1 %4536 }
 0x19f   :  { %v4539_v47 = vunpack.i.h.bf16 %v4537_v4  ;;  %v4538_v48 = vunpack.i.l.bf16 %v4537_v4  ;;  %v4549_v63 = vunpack.i.h.bf16 %v5348_v3 }
 0x1a2   :  { %v5350_v5 = vpop.permute.xlu0 %4556  ;;  %v5352_v6 = vpop.permute.xlu1 %4541 }
 0x1a3   :  { %v4544_v59 = vunpack.i.h.bf16 %v5352_v6  ;;  %v4543_v60 = vunpack.i.l.bf16 %v5352_v6  ;;  %v4548_v6 = vunpack.i.l.bf16 %v5348_v3 }
 0x1a6   :  { %v5354_v7 = vpop.permute.xlu0 %4566  ;;  %v5356_v8 = vpop.permute.xlu1 %4551 }
 0x1aa   :  { %v5358_v9 = vpop.permute.xlu0 %4576  ;;  %v5360_v10 = vpop.permute.xlu1 %4561 }
 0x1ae   :  { %v5362_v11 = vpop.permute.xlu0 %4586  ;;  %v5364_v12 = vpop.permute.xlu1 %4571 }
 0x1b2   :  { %v5366_v13 = vpop.permute.xlu0 %4596  ;;  %v5368_v14 = vpop.permute.xlu1 %4581 }
 0x1b6   :  { %v5370_v15 = vpop.permute.xlu1 %4591  ;;  %v4607_v16 = vpop.permute.xlu0 %4606 }
 0x1b7   :  { %v4609_v17 = vunpack.i.h.bf16 %v4607_v16  ;;  %v4608_v18 = vunpack.i.l.bf16 %v4607_v16 }
 0x1b9   :  { %v632_v19 = vsel %vm630_vm1, %v4608_v18, %v4609_v17  ;;  %v631_v52 = vsel %vm630_vm1, %v4538_v48, %v4608_v18  ;;  %v4553_v48 = vunpack.i.l.bf16 %v5356_v8 }
 0x1ba   :  { %v5373_v21 = vpop.permute.xlu1 %4601  ;;  %v5375_v22 = vpop.permute.xlu0 %4616  ;;  %v4790_v23 = vpack.i.bf16 %v4609_v17, %v632_v19 }
 0x1bb   :  { %v4619_v24 = vunpack.i.h.bf16 %v5375_v22  ;;  %v4618_v25 = vunpack.i.l.bf16 %v5375_v22 }
 0x1bc   :  { %4791 = vrot.lane.b32.xlu1 %v4790_v23, %s5020_s27 }
 0x1bd   :  { %v5383_v26 = vsel %vm672_vm2, %v4618_v25, %v4619_v24  ;;  %v673_v3 = vsel %vm672_vm2, %v4548_v6, %v4618_v25  ;;  %v4568_v6 = vunpack.i.l.bf16 %v5354_v7 }
 0x1be   :  { %v4612_v20 = vpop.permute.xlu1 %4611  ;;  %v5385_v28 = vpop.permute.xlu0 %4626  ;;  %v4800_v29 = vpack.i.bf16 %v4619_v24, %v5383_v26 }
 0x1bf   :  { %v4614_v30 = vunpack.i.h.bf16 %v4612_v20  ;;  %v4613_v31 = vunpack.i.l.bf16 %v4612_v20  ;;  %v4629_v24 = vunpack.i.h.bf16 %v5385_v28  ;;  %v4628_v20 = vunpack.i.l.bf16 %v5385_v28 }
 0x1c0   :  { %4801 = vrot.lane.b32.xlu1 %v4800_v29, %s5020_s27 }
 0x1c1   :  { %v653_v27 = vsel %vm651_vm3, %v4613_v31, %v4614_v30  ;;  %v652_v2 = vsel %vm651_vm3, %v4543_v60, %v4613_v31  ;;  %v4554_v31 = vunpack.i.h.bf16 %v5356_v8  ;;  %v4559_v60 = vunpack.i.h.bf16 %v5350_v5 }
 0x1c2   :  { %v5390_v32 = vpop.permute.xlu1 %4621  ;;  %v5392_v33 = vpop.permute.xlu0 %4636  ;;  %v4795_v34 = vpack.i.bf16 %v4614_v30, %v653_v27 }
 0x1c4   :  { %4796 = vrot.lane.b32.xlu0 %v4795_v34, %s5020_s27  ;;  %v4623_v34 = vunpack.i.l.bf16 %v5390_v32 }
 0x1c6   :  { %v5395_v35 = vpop.permute.xlu1 %4631  ;;  %v5397_v36 = vpop.permute.xlu0 %4646 }
 0x1c7   :  { %v4634_v37 = vunpack.i.h.bf16 %v5395_v35  ;;  %v4633_v38 = vunpack.i.l.bf16 %v5395_v35  ;;  %v4573_v35 = vunpack.i.l.bf16 %v5364_v12 }
 0x1c9   :  { %v947_v39 = vsel %vm945_vm4, %v4633_v38, %v4634_v37 }
 0x1ca   :  { %v5404_v40 = vpop.permute.xlu1 %4641  ;;  %v5406_v41 = vpop.permute.xlu0 %4656  ;;  %v4805_v42 = vpack.i.bf16 %v4634_v37, %v947_v39 }
 0x1cc   :  { %4806 = vrot.lane.b32.xlu0 %v4805_v42, %s5020_s27 }
 0x1ce   :  { %v5409_v43 = vpop.permute.xlu1 %4651  ;;  %v5411_v44 = vpop.permute.xlu0 %4666 }
 0x1d2   :  { %v5413_v45 = vpop.permute.xlu1 %4661  ;;  %v4677_v46 = vpop.permute.xlu0 %4676 }
 0x1d3   :  { %v4679_v49 = vunpack.i.h.bf16 %v4677_v46  ;;  %v4678_v50 = vunpack.i.l.bf16 %v4677_v46 }
 0x1d5   :  { %v634_v51 = vsel %vm630_vm1, %v4678_v50, %v4679_v49  ;;  %v633_v53 = vsel %vm630_vm1, %v4539_v47, %v4678_v50 }
 0x1d6   :  { %v5418_v54 = vpop.permute.xlu1 %4671  ;;  %v5420_v55 = vpop.permute.xlu0 %4681  ;;  %v4235_v56 = vpack.c.bf16 %v634_v51, %v632_v19  ;;  %v4810_v57 = vpack.i.bf16 %v633_v53, %v631_v52  ;;  %v4237_v58 = vpack.c.bf16 %v633_v53, %v631_v52  ;;  %v4825_v39 = vpack.i.bf16 %v4679_v49, %v634_v51 }
 0x1d7   :  { %v4684_v61 = vunpack.i.h.bf16 %v5420_v55  ;;  %v4683_v62 = vunpack.i.l.bf16 %v5420_v55  ;;  %v716_v52 = vsel %vm714_vm5, %v4628_v20, %v4629_v24  ;;  %v694_v53 = vsel %vm693_vm6, %v4553_v48, %v4623_v34 }
 0x1d8   :  { %4236 = vmatprep.subr.bf16.mxu0 %v4235_v56  ;;  %4811 = vrot.lane.b32.xlu1 %v4810_v57, %s5020_s27  ;;  %v4835_v57 = vpack.i.bf16 %v4629_v24, %v716_v52 }
 0x1d9   :  { %v5431_v1 = vsel %vm651_vm3, %v4683_v62, %v4684_v61  ;;  %4238 = vmatpush1.bf16.msra.mxu0 %v4237_v58  ;;  %v654_v4 = vsel %vm651_vm3, %v4544_v59, %v4683_v62  ;;  %v4558_v62 = vunpack.i.l.bf16 %v5350_v5  ;;  %vm924_vm3 = vcmask 605184  }
 0x1da   :  { %v5436_v16 = vpop.permute.xlu1 %4691  ;;  %v5438_v17 = vpop.permute.xlu0 %4686  ;;  %v4815_v18 = vpack.i.bf16 %v654_v4, %v652_v2  ;;  %v4239_v19 = vpack.c.bf16 %v5431_v1, %v653_v27  ;;  %v4241_v23 = vpack.c.bf16 %v654_v4, %v652_v2  ;;  %v4624_v27 = vunpack.i.h.bf16 %v5390_v32 }
 0x1db   :  { %v4694_v29 = vunpack.i.h.bf16 %v5436_v16  ;;  %v4693_v30 = vunpack.i.l.bf16 %v5436_v16  ;;  %v4569_v4 = vunpack.i.h.bf16 %v5354_v7  ;;  %v715_v24 = vsel %vm714_vm5, %v4558_v62, %v4628_v20 }
 0x1dc   :  { %4816 = vrot.lane.b32.xlu0 %v4815_v18, %s5020_s27  ;;  %4240 = vmatprep.subr.bf16.mxu0 %v4239_v19  ;;  %v695_v49 = vsel %vm693_vm6, %v4623_v34, %v4624_v27  ;;  %v4639_v18 = vunpack.i.h.bf16 %v5392_v33  ;;  %v4638_v19 = vunpack.i.l.bf16 %v5392_v33  ;;  %v4563_v7 = vunpack.i.l.bf16 %v5360_v10 }
 0x1dd   :  { %v5455_v28 = vsel %vm672_vm2, %v4693_v30, %v4694_v29  ;;  %4242 = vmatpush1.bf16.msra.mxu0 %v4241_v23  ;;  %v675_v37 = vsel %vm672_vm2, %v4549_v63, %v4693_v30  ;;  %v4564_v23 = vunpack.i.h.bf16 %v5360_v10  ;;  %v4574_v10 = vunpack.i.h.bf16 %v5364_v12 }
 0x1de   :  { %v5458_v42 = vpop.permute.xlu1 %4706  ;;  %v4697_v22 = vpop.permute.xlu0 %4696  ;;  %v4820_v46 = vpack.i.bf16 %v675_v37, %v673_v3  ;;  %v4243_v25 = vpack.c.bf16 %v5455_v28, %v5383_v26  ;;  %v4245_v47 = vpack.c.bf16 %v675_v37, %v673_v3  ;;  %v946_v55 = vsel %vm945_vm4, %v4563_v7, %v4633_v38 }
 0x1df   :  { %v4699_v32 = vunpack.i.h.bf16 %v4697_v22  ;;  %v4698_v50 = vunpack.i.l.bf16 %v4697_v22  ;;  %v4649_v12 = vunpack.i.h.bf16 %v5397_v36 }
 0x1e0   :  { %4826 = vrot.lane.b32.xlu0 %v4825_v39, %s5020_s27  ;;  %4821 = vrot.lane.b32.xlu1 %v4820_v46, %s5020_s27 }
 0x1e1   :  { %4244 = vmatprep.subr.bf16.mxu0 %v4243_v25  ;;  %v697_v51 = vsel %vm693_vm6, %v4698_v50, %v4699_v32  ;;  %v696_v26 = vsel %vm693_vm6, %v4554_v31, %v4698_v50  ;;  %v4840_v31 = vpack.i.bf16 %v4684_v61, %v5431_v1  ;;  %v4644_v25 = vunpack.i.h.bf16 %v5404_v40 }
 0x1e2   :  { %4246 = vmatpush1.bf16.msra.mxu0 %v4245_v47  ;;  %v5470_v8 = vpop.permute.xlu1 %4711  ;;  %v5472_v56 = vpop.permute.xlu0 %4701  ;;  %v4247_v58 = vpack.c.bf16 %v697_v51, %v695_v49  ;;  %v4249_v59 = vpack.c.bf16 %v696_v26, %v694_v53  ;;  %v737_v61 = vsel %vm735_vm7, %v4638_v19, %v4639_v18  ;;  %v4643_v1 = vunpack.i.l.bf16 %v5404_v40 }
 0x1e3   :  { %v4714_v63 = vunpack.i.h.bf16 %v5470_v8  ;;  %v4713_v2 = vunpack.i.l.bf16 %v5470_v8  ;;  %v4589_v8 = vunpack.i.h.bf16 %v5362_v11  ;;  %vm1058_vm6 = vcmask 596992  }
 0x1e4   :  { %4836 = vrot.lane.b32.xlu1 %v4835_v57, %s5020_s27  ;;  %4248 = vmatprep.subr.bf16.mxu0 %v4247_v58  ;;  %v5529_v57 = vsel %vm735_vm7, %v4568_v6, %v4638_v19  ;;  %v4648_v58 = vunpack.i.l.bf16 %v5397_v36  ;;  %v758_v62 = vsel %vm756_vm8, %v4643_v1, %v4644_v25  ;;  %v4850_v6 = vpack.i.bf16 %v4694_v29, %v5455_v28 }
 0x1e5   :  { %v5487_v5 = vsel %vm714_vm5, %v4713_v2, %v4714_v63  ;;  %v717_v30 = vsel %vm714_vm5, %v4559_v60, %v4713_v2  ;;  %v5544_v2 = vsel %vm756_vm8, %v4573_v35, %v4643_v1  ;;  %v4584_v29 = vunpack.i.h.bf16 %v5368_v14 }
 0x1e6   :  { %4250 = vmatpush1.bf16.msra.mxu0 %v4249_v59  ;;  %v5495_v3 = vpop.permute.xlu1 %4721  ;;  %v4717_v27 = vpop.permute.xlu0 %4716  ;;  %v4251_v34 = vpack.c.bf16 %v5487_v5, %v716_v52  ;;  %v4253_v37 = vpack.c.bf16 %v717_v30, %v715_v24  ;;  %v4845_v49 = vpack.i.bf16 %v717_v30, %v715_v24  ;;  %v4583_v28 = vunpack.i.l.bf16 %v5368_v14 }
 0x1e7   :  { %v4724_v39 = vunpack.i.h.bf16 %v5495_v3  ;;  %v4723_v20 = vunpack.i.l.bf16 %v5495_v3  ;;  %v4719_v22 = vunpack.i.h.bf16 %v4717_v27  ;;  %v4718_v46 = vunpack.i.l.bf16 %v4717_v27 }
 0x1e8   :  { %4841 = vrot.lane.b32.xlu1 %v4840_v31, %s5020_s27  ;;  %4252 = vmatprep.subr.bf16.mxu0 %v4251_v34  ;;  %v4579_v31 = vunpack.i.h.bf16 %v5358_v9  ;;  %v4578_v27 = vunpack.i.l.bf16 %v5358_v9  ;;  %v4875_v1 = vpack.i.bf16 %v4644_v25, %v758_v62  ;;  %v4603_v36 = vunpack.i.l.bf16 %v5373_v21 }
 0x1e9   :  { %v5513_v47 = vsel %vm735_vm7, %v4723_v20, %v4724_v39  ;;  %v948_v48 = vsel %vm945_vm4, %v4564_v23, %v4718_v46  ;;  %v5517_v32 = vsel %vm735_vm7, %v4569_v4, %v4723_v20  ;;  %v949_v51 = vsel %vm945_vm4, %v4718_v46, %v4719_v22 }
 0x1ea   :  { %4254 = vmatpush1.bf16.msra.mxu0 %v4253_v37  ;;  %v5520_v38 = vpop.permute.xlu1 %4726  ;;  %v5522_v50 = vpop.permute.xlu0 %4731  ;;  %v4830_v52 = vpack.i.bf16 %v948_v48, %v946_v55  ;;  %v4255_v40 = vpack.c.bf16 %v5513_v47, %v737_v61  ;;  %v4257_v59 = vpack.c.bf16 %v5517_v32, %v5529_v57  ;;  %v4860_v19 = vpack.i.bf16 %v4719_v22, %v949_v51 }
 0x1eb   :  { %v4734_v53 = vunpack.i.h.bf16 %v5522_v50  ;;  %v4733_v26 = vunpack.i.l.bf16 %v5522_v50  ;;  %v4654_v37 = vunpack.i.h.bf16 %v5409_v43  ;;  %v4653_v20 = vunpack.i.l.bf16 %v5409_v43 }
 0x1ec   :  { %4831 = vrot.lane.b32.xlu0 %v4830_v52, %s5020_s27  ;;  %4846 = vrot.lane.b32.xlu1 %v4845_v49, %s5020_s27  ;;  %v5577_v22 = vsel %vm777_vm9, %v4648_v58, %v4649_v12  ;;  %v5580_v14 = vsel %vm777_vm9, %v4578_v27, %v4648_v58  ;;  %v4855_v55 = vpack.i.bf16 %v4639_v18, %v737_v61  ;;  %v4658_v58 = vunpack.i.l.bf16 %v5406_v41 }
 0x1ed   :  { %v5540_v60 = vsel %vm756_vm8, %v4733_v26, %v4734_v53  ;;  %4256 = vmatprep.subr.bf16.mxu0 %v4255_v40  ;;  %v5547_v4 = vsel %vm756_vm8, %v4574_v10, %v4733_v26  ;;  %v4659_v26 = vunpack.i.h.bf16 %v5406_v41  ;;  %v800_v33 = vsel %vm798_vm10, %v4653_v20, %v4654_v37 }
 0x1ee   :  { %4258 = vmatpush1.bf16.msra.mxu0 %v4257_v59  ;;  %v5552_v23 = vpop.permute.xlu1 %4741  ;;  %v5554_v24 = vpop.permute.xlu0 %4736  ;;  %v4259_v30 = vpack.c.bf16 %v5540_v60, %v758_v62  ;;  %v4261_v7 = vpack.c.bf16 %v5547_v4, %v5544_v2  ;;  %v4865_v18 = vpack.i.bf16 %v4714_v63, %v5487_v5  ;;  %v799_v61 = vsel %vm798_vm10, %v4583_v28, %v4653_v20 }
 0x1ef   :  { %v4744_v34 = vunpack.i.h.bf16 %v5552_v23  ;;  %v4743_v16 = vunpack.i.l.bf16 %v5552_v23  ;;  %v4880_v41 = vpack.i.bf16 %v4724_v39, %v5513_v47  ;;  %v4664_v5 = vunpack.i.h.bf16 %v5413_v45 }
 0x1f0   :  { %4851 = vrot.lane.b32.xlu0 %v4850_v6, %s5020_s27  ;;  %4861 = vrot.lane.b32.xlu1 %v4860_v19, %s5020_s27  ;;  %v821_v3 = vsel %vm819_vm11, %v4658_v58, %v4659_v26  ;;  %v4588_v39 = vunpack.i.l.bf16 %v5362_v11  ;;  %v4594_v47 = vunpack.i.h.bf16 %v5370_v15  ;;  %v4885_v37 = vpack.i.bf16 %v5547_v4, %v5544_v2 }
 0x1f1   :  { %v5572_v9 = vsel %vm777_vm9, %v4743_v16, %v4744_v34  ;;  %4260 = vmatprep.subr.bf16.mxu0 %v4259_v30  ;;  %v5583_v43 = vsel %vm777_vm9, %v4579_v31, %v4743_v16  ;;  %v4593_v20 = vunpack.i.l.bf16 %v5370_v15  ;;  %v4890_v15 = vpack.i.bf16 %v4734_v53, %v5540_v60 }
 0x1f2   :  { %4262 = vmatpush1.bf16.msra.mxu0 %v4261_v7  ;;  %v4757_v46 = vpop.permute.xlu1 %4756  ;;  %v4747_v10 = vpop.permute.xlu0 %4746  ;;  %v4263_v48 = vpack.c.bf16 %v5572_v9, %v5577_v22  ;;  %v4265_v35 = vpack.c.bf16 %v5583_v43, %v5580_v14  ;;  %v4663_v7 = vunpack.i.l.bf16 %v5413_v45  ;;  %v4870_v45 = vpack.i.bf16 %v5517_v32, %v5529_v57 }
 0x1f3   :  { %v4759_v52 = vunpack.i.h.bf16 %v4757_v46  ;;  %v4758_v49 = vunpack.i.l.bf16 %v4757_v46  ;;  %v4749_v40 = vunpack.i.h.bf16 %v4747_v10  ;;  %v4748_v51 = vunpack.i.l.bf16 %v4747_v10 }
 0x1f4   :  { %4856 = vrot.lane.b32.xlu0 %v4855_v55, %s5020_s27  ;;  %4876 = vrot.lane.b32.xlu1 %v4875_v1, %s5020_s27  ;;  %v820_v10 = vsel %vm819_vm11, %v4588_v39, %v4658_v58  ;;  %v4669_v55 = vunpack.i.h.bf16 %v5411_v44  ;;  %v4668_v1 = vunpack.i.l.bf16 %v5411_v44  ;;  %v842_v32 = vsel %vm840_vm13, %v4663_v7, %v4664_v5 }
 0x1f5   :  { %4264 = vmatprep.subr.bf16.mxu0 %v4263_v48  ;;  %v802_v25 = vsel %vm798_vm10, %v4748_v51, %v4749_v40  ;;  %v801_v59 = vsel %vm798_vm10, %v4584_v29, %v4748_v51  ;;  %v823_v30 = vsel %vm819_vm11, %v4758_v49, %v4759_v52  ;;  %v822_v27 = vsel %vm819_vm11, %v4589_v8, %v4758_v49 }
 0x1f6   :  { %4266 = vmatpush1.bf16.msra.mxu0 %v4265_v35  ;;  %v5605_v62 = vpop.permute.xlu0 %4751  ;;  %v4267_v6 = vpack.c.bf16 %v802_v25, %v800_v33  ;;  %v4269_v19 = vpack.c.bf16 %v801_v59, %v799_v61  ;;  %v4767_v63 = vpop.permute.xlu1 %4766  ;;  %v4271_v31 = vpack.c.bf16 %v823_v30, %v821_v3  ;;  %v4273_v48 = vpack.c.bf16 %v822_v27, %v820_v10 }
 0x1f7   :  { %v4769_v16 = vunpack.i.h.bf16 %v4767_v63  ;;  %v4768_v29 = vunpack.i.l.bf16 %v4767_v63  ;;  %v841_v2 = vsel %vm840_vm13, %v4593_v20, %v4663_v7  ;;  %v4900_v44 = vpack.i.bf16 %v4744_v34, %v5572_v9 }
 0x1f8   :  { %4866 = vrot.lane.b32.xlu0 %v4865_v18, %s5020_s27  ;;  %4881 = vrot.lane.b32.xlu1 %v4880_v41, %s5020_s27  ;;  %v4599_v51 = vunpack.i.h.bf16 %v5366_v13  ;;  %v4674_v26 = vunpack.i.h.bf16 %v5418_v54  ;;  %v4673_v58 = vunpack.i.l.bf16 %v5418_v54  ;;  %v863_v23 = vsel %vm861_vm12, %v4668_v1, %v4669_v55 }
 0x1f9   :  { %4268 = vmatprep.subr.bf16.mxu0 %v4267_v6  ;;  %v865_v40 = vsel %vm861_vm12, %v4768_v29, %v4769_v16  ;;  %v4598_v34 = vunpack.i.l.bf16 %v5366_v13  ;;  %v4895_v54 = vpack.i.bf16 %v4649_v12, %v5577_v22  ;;  %v4604_v59 = vunpack.i.h.bf16 %v5373_v21 }
 0x1fa   :  { %4270 = vmatpush1.bf16.msra.mxu0 %v4269_v19  ;;  %v4762_v28 = vpop.permute.xlu0 %4761  ;;  %v4777_v50 = vpop.permute.xlu1 %4776  ;;  %v4279_v9 = vpack.c.bf16 %v865_v40, %v863_v23  ;;  %v864_v33 = vsel %vm861_vm12, %v4599_v51, %v4768_v29  ;;  %v4689_v6 = vunpack.i.h.bf16 %v5438_v17  ;;  %v4688_v19 = vunpack.i.l.bf16 %v5438_v17  ;;  %v1135_v40 = vld [vmem:[%s6497_s2 + $0x20] sm:$0xff]  ;;  %v1140_v51 = vld [vmem:[%s6497_s2 + $0x48] sm:$0xff] }
 0x1fb   :  { %v4764_v46 = vunpack.i.h.bf16 %v4762_v28  ;;  %v4763_v11 = vunpack.i.l.bf16 %v4762_v28  ;;  %4272 = vmatprep.subr.bf16.mxu0 %v4271_v31  ;;  %v4779_v18 = vunpack.i.h.bf16 %v4777_v50  ;;  %v4778_v25 = vunpack.i.l.bf16 %v4777_v50  ;;  %v1139_v50 = vld [vmem:[%s6497_s2 + $0x40] sm:$0xff] }
 0x1fc   :  { %4871 = vrot.lane.b32.xlu0 %v4870_v45, %s5020_s27  ;;  %4886 = vrot.lane.b32.xlu1 %v4885_v37, %s5020_s27  ;;  %v862_v13 = vsel %vm861_vm12, %v4598_v34, %v4668_v1  ;;  %v884_v8 = vsel %vm882_vm14, %v4673_v58, %v4674_v26  ;;  %v4905_v7 = vpack.i.bf16 %v5583_v43, %v5580_v14  ;;  %v4704_v17 = vunpack.i.h.bf16 %v5472_v56  ;;  %v1134_v26 = vld [vmem:[%s6497_s2 + $0x18] sm:$0xff] }
 0x1fd   :  { %v844_v57 = vsel %vm840_vm13, %v4763_v11, %v4764_v46  ;;  %v843_v4 = vsel %vm840_vm13, %v4594_v47, %v4763_v11  ;;  %v4281_v30 = vpack.c.bf16 %v864_v33, %v862_v13  ;;  %v907_v3 = vsel %vm903_vm15, %v4778_v25, %v4779_v18 }
 0x1fe   :  { %4274 = vmatpush1.bf16.msra.mxu0 %v4273_v48  ;;  %v4772_v35 = vpop.permute.xlu0 %4771  ;;  %v4275_v52 = vpack.c.bf16 %v844_v57, %v842_v32  ;;  %v4277_v49 = vpack.c.bf16 %v843_v4, %v841_v2  ;;  %v4703_v39 = vunpack.i.l.bf16 %v5472_v56  ;;  %v4787_v47 = vpop.permute.xlu1 %4786  ;;  %v883_v21 = vsel %vm882_vm14, %v4603_v36, %v4673_v58 }
 0x1ff   :  { %v4774_v53 = vunpack.i.h.bf16 %v4772_v35  ;;  %v4773_v60 = vunpack.i.l.bf16 %v4772_v35  ;;  %v4709_v31 = vunpack.i.h.bf16 %v5458_v42  ;;  %v4708_v27 = vunpack.i.l.bf16 %v5458_v42  ;;  %v1131_v35 = vld [vmem:[%s6497_s2] sm:$0xff] }
 0x200   :  { %4891 = vrot.lane.b32.xlu0 %v4890_v15, %s5020_s27  ;;  %4901 = vrot.lane.b32.xlu1 %v4900_v44, %s5020_s27  ;;  %v905_v29 = vsel %vm903_vm15, %v4688_v19, %v4689_v6  ;;  %v906_v43 = vsel %vm903_vm15, %v4704_v17, %v4778_v25  ;;  %v4789_v28 = vunpack.i.h.bf16 %v4787_v47  ;;  %v4788_v45 = vunpack.i.l.bf16 %v4787_v47 }
 0x201   :  { %4276 = vmatprep.subr.bf16.mxu0 %v4275_v52  ;;  %v886_v61 = vsel %vm882_vm14, %v4773_v60, %v4774_v53  ;;  %v885_v22 = vsel %vm882_vm14, %v4604_v59, %v4773_v60  ;;  %v4287_v14 = vpack.c.bf16 %v907_v3, %v905_v29  ;;  %v4729_v37 = vunpack.i.h.bf16 %v5520_v38  ;;  %v1144_v53 = vld [vmem:[%s6497_s2 + $0x68] sm:$0xff]  ;;  %v1143_v60 = vld [vmem:[%s6497_s2 + $0x60] sm:$0xff] }
 0x202   :  { %4278 = vmatpush1.bf16.msra.mxu0 %v4277_v49  ;;  %v4782_v41 = vpop.permute.xlu0 %4781  ;;  %v4283_v12 = vpack.c.bf16 %v886_v61, %v884_v8  ;;  %v4285_v16 = vpack.c.bf16 %v885_v22, %v883_v21  ;;  %v4728_v20 = vunpack.i.l.bf16 %v5520_v38  ;;  %v904_v42 = vsel %vm903_vm15, %v4703_v39, %v4688_v19 }
 0x203   :  { %4280 = vmatprep.subr.bf16.mxu0 %v4279_v9  ;;  %v4784_v63 = vunpack.i.h.bf16 %v4782_v41  ;;  %v4783_v5 = vunpack.i.l.bf16 %v4782_v41  ;;  %v4739_v46 = vunpack.i.h.bf16 %v5554_v24  ;;  %v4738_v11 = vunpack.i.l.bf16 %v5554_v24 }
 0x204   :  { %4896 = vrot.lane.b32.xlu0 %v4895_v54, %s5020_s27  ;;  %v4289_v10 = vpack.c.bf16 %v906_v43, %v904_v42  ;;  %v926_v55 = vsel %vm924_vm3, %v4708_v27, %v4709_v31  ;;  %v1062_v32 = vsel %vm1058_vm6, %v4788_v45, %v4789_v28  ;;  %v4754_v15 = vunpack.i.h.bf16 %v5605_v62 }
 0x205   :  { %v928_v56 = vsel %vm924_vm3, %v4783_v5, %v4784_v63  ;;  %v927_v48 = vsel %vm924_vm3, %v4729_v37, %v4783_v5  ;;  %v4753_v38 = vunpack.i.l.bf16 %v5605_v62  ;;  %v925_v57 = vsel %vm924_vm3, %v4728_v20, %v4708_v27  ;;  %v1136_v62 = vld [vmem:[%s6497_s2 + $0x28] sm:$0xff] }
 0x206   :  { %4282 = vmatpush1.bf16.msra.mxu0 %v4281_v30  ;;  %v4291_v1 = vpack.c.bf16 %v928_v56, %v926_v55  ;;  %v4293_v2 = vpack.c.bf16 %v927_v48, %v925_v57  ;;  %v1060_v24 = vsel %vm1058_vm6, %v4738_v11, %v4739_v46  ;;  %v1061_v4 = vsel %vm1058_vm6, %v4754_v15, %v4788_v45 }
 0x207   :  { %4284 = vmatprep.subr.bf16.mxu0 %v4283_v12  ;;  %v4295_v44 = vpack.c.bf16 %v1062_v32, %v1060_v24  ;;  %v1059_v52 = vsel %vm1058_vm6, %v4753_v38, %v4738_v11  ;;  %vm1147_vm7 = vcmask 130048   ;;  %vm1463_vm8 = vcmask 850944  }
 0x208   :  { %4906 = vrot.lane.b32.xlu0 %v4905_v7, %s5020_s27  ;;  %v4297_v49 = vpack.c.bf16 %v1061_v4, %v1059_v52 }
 0x20a   :  { %4286 = vmatpush1.bf16.msra.mxu0 %v4285_v16 }
 0x20b   :  { %4288 = vmatprep.subr.bf16.mxu0 %v4287_v14 }
 0x20e   :  { %4290 = vmatpush1.bf16.msra.mxu0 %v4289_v10 }
 0x20f   :  { %4292 = vmatprep.subr.bf16.mxu0 %v4291_v1 }
 0x212   :  { %4294 = vmatpush1.bf16.msra.mxu0 %v4293_v2 }
 0x213   :  { %4296 = vmatprep.subr.bf16.mxu0 %v4295_v44 }
 0x215   :  { %1225 = vmatmul.mubr.f32.vlgmr.msra.gmra.mrb[0].mxu0 %v1131_v35 }
 0x216   :  { %4298 = vmatpush1.bf16.msra.mxu0 %v4297_v49  ;;  %1230 = vmatprep.mubr.f32.mxu0 %v1136_v62 }
 0x219   :  { %1231 = vmatmul.mubr.f32.gmra.mrb[2].mxu0 %v1135_v40 }
 0x21a   :  { %1236 = vmatprep.mubr.f32.mxu0 %v1140_v51 }
 0x21d   :  { %1237 = vmatmul.mubr.f32.gmra.mrb[4].mxu0 %v1139_v50 }
 0x21e   :  { %1242 = vmatprep.mubr.f32.mxu0 %v1144_v53 }
 0x221   :  { %1243 = vmatmul.mubr.f32.gmra.mrb[6].mxu0 %v1143_v60 }
 0x222   :  { %4170 = vmatprep.mubr.msk.f32.mxu0 %vm1147_vm7, %v1134_v26 }
 0x22e   :  { %v4792_v58 = vpop.permute.xlu1 %4791 }
 0x22f   :  { %v4794_v25 = vunpack.i.h.bf16 %v4792_v58  ;;  %v4793_v54 = vunpack.i.l.bf16 %v4792_v58 }
 0x231   :  { %v1064_v36 = vsel %vm1058_vm6, %v4793_v54, %v4794_v25 }
 0x232   :  { %v4802_v34 = vpop.permute.xlu1 %4801 }
 0x233   :  { %v4804_v37 = vunpack.i.h.bf16 %v4802_v34  ;;  %v4803_v20 = vunpack.i.l.bf16 %v4802_v34 }
 0x235   :  { %v1072_v24 = vsel %vm1058_vm6, %v4803_v20, %v4804_v37 }
 0x236   :  { %v4797_v23 = vpop.permute.xlu0 %4796 }
 0x237   :  { %v4799_v7 = vunpack.i.h.bf16 %v4797_v23  ;;  %v4798_v3 = vunpack.i.l.bf16 %v4797_v23 }
 0x239   :  { %v1068_v29 = vsel %vm1058_vm6, %v4798_v3, %v4799_v7 }
 0x23e   :  { %v5709_v9 = vpop.permute.xlu0 %4806 }
 0x23f   :  { %v4809_v46 = vunpack.i.h.bf16 %v5709_v9  ;;  %v4808_v11 = vunpack.i.l.bf16 %v5709_v9 }
 0x241   :  { %v1076_v53 = vsel %vm1058_vm6, %v4808_v11, %v4809_v46 }
 0x24a   :  { %v4812_v33 = vpop.permute.xlu1 %4811 }
 0x24b   :  { %v4813_v61 = vunpack.i.l.bf16 %v4812_v33  ;;  %v4814_v13 = vunpack.i.h.bf16 %v4812_v33 }
 0x24d   :  { %v1063_v30 = vsel %vm1058_vm6, %v4813_v61, %v4793_v54 }
 0x24e   :  { %v4817_v18 = vpop.permute.xlu0 %4816 }
 0x24f   :  { %v4818_v17 = vunpack.i.l.bf16 %v4817_v18  ;;  %v4819_v47 = vunpack.i.h.bf16 %v4817_v18 }
 0x251   :  { %v1067_v27 = vsel %vm1058_vm6, %v4818_v17, %v4798_v3 }
 0x252   :  { %v4827_v59 = vpop.permute.xlu0 %4826  ;;  %v4822_v41 = vpop.permute.xlu1 %4821 }
 0x253   :  { %v4829_v6 = vunpack.i.h.bf16 %v4827_v59  ;;  %v4828_v19 = vunpack.i.l.bf16 %v4827_v59  ;;  %v4823_v42 = vunpack.i.l.bf16 %v4822_v41  ;;  %v4824_v10 = vunpack.i.h.bf16 %v4822_v41 }
 0x255   :  { %v1065_v8 = vsel %vm1058_vm6, %v4814_v13, %v4828_v19  ;;  %v1066_v12 = vsel %vm1058_vm6, %v4828_v19, %v4829_v6  ;;  %v1071_v57 = vsel %vm1058_vm6, %v4823_v42, %v4803_v20 }
 0x256   :  { %v4301_v22 = vpack.c.bf16 %v1065_v8, %v1063_v30  ;;  %v5715_v63 = vpop.permute.xlu1 %4836  ;;  %v4299_v5 = vpack.c.bf16 %v1066_v12, %v1064_v36 }
 0x257   :  { %v4839_v60 = vunpack.i.h.bf16 %v5715_v63  ;;  %v4838_v26 = vunpack.i.l.bf16 %v5715_v63 }
 0x258   :  { %4300 = vmatprep.subr.bf16.mxu0 %v4299_v5 }
 0x259   :  { %4302 = vmatpush1.bf16.msra.mxu0 %v4301_v22  ;;  %v1080_v19 = vsel %vm1058_vm6, %v4838_v26, %v4839_v60  ;;  %v1141_v60 = vld [vmem:[%s6497_s2 + $0x50] sm:$0xff] }
 0x25a   :  { %v4842_v39 = vpop.permute.xlu1 %4841 }
 0x25b   :  { %v4844_v21 = vunpack.i.h.bf16 %v4842_v39  ;;  %v4843_v31 = vunpack.i.l.bf16 %v4842_v39 }
 0x25d   :  { %v1069_v16 = vsel %vm1058_vm6, %v4819_v47, %v4843_v31  ;;  %v1070_v14 = vsel %vm1058_vm6, %v4843_v31, %v4844_v21 }
 0x25e   :  { %v4305_v43 = vpack.c.bf16 %v1069_v16, %v1067_v27  ;;  %v4832_v28 = vpop.permute.xlu0 %4831  ;;  %v4847_v45 = vpop.permute.xlu1 %4846  ;;  %v4303_v56 = vpack.c.bf16 %v1070_v14, %v1068_v29 }
 0x25f   :  { %v4834_v2 = vunpack.i.h.bf16 %v4832_v28  ;;  %v4833_v4 = vunpack.i.l.bf16 %v4832_v28  ;;  %v4848_v34 = vunpack.i.l.bf16 %v4847_v45  ;;  %v4849_v9 = vunpack.i.h.bf16 %v4847_v45 }
 0x260   :  { %4304 = vmatprep.subr.bf16.mxu0 %v4303_v56 }
 0x261   :  { %4306 = vmatpush1.bf16.msra.mxu0 %v4305_v43  ;;  %v1075_v23 = vsel %vm1058_vm6, %v4833_v4, %v4808_v11  ;;  %v1079_v30 = vsel %vm1058_vm6, %v4848_v34, %v4838_v26  ;;  %v1146_v26 = vld [vmem:[%s6497_s2 + $0x78] sm:$0xff] }
 0x262   :  { %v4852_v55 = vpop.permute.xlu0 %4851  ;;  %v4862_v1 = vpop.permute.xlu1 %4861 }
 0x263   :  { %v4854_v48 = vunpack.i.h.bf16 %v4852_v55  ;;  %v4853_v32 = vunpack.i.l.bf16 %v4852_v55  ;;  %v4864_v15 = vunpack.i.h.bf16 %v4862_v1  ;;  %v4863_v38 = vunpack.i.l.bf16 %v4862_v1 }
 0x265   :  { %v1073_v44 = vsel %vm1058_vm6, %v4824_v10, %v4853_v32  ;;  %v1074_v35 = vsel %vm1058_vm6, %v4853_v32, %v4854_v48  ;;  %v1078_v52 = vsel %vm1058_vm6, %v4863_v38, %v4864_v15  ;;  %v1077_v50 = vsel %vm1058_vm6, %v4834_v2, %v4863_v38 }
 0x266   :  { %v4309_v62 = vpack.c.bf16 %v1073_v44, %v1071_v57  ;;  %v4857_v49 = vpop.permute.xlu0 %4856  ;;  %v4877_v40 = vpop.permute.xlu1 %4876  ;;  %v4307_v51 = vpack.c.bf16 %v1074_v35, %v1072_v24  ;;  %v4311_v58 = vpack.c.bf16 %v1078_v52, %v1076_v53  ;;  %v4313_v33 = vpack.c.bf16 %v1077_v50, %v1075_v23  ;;  %v1137_v50 = vld [vmem:[%s6497_s2 + $0x30] sm:$0xff]  ;;  %v1142_v53 = vld [vmem:[%s6497_s2 + $0x58] sm:$0xff] }
 0x267   :  { %v4859_v18 = vunpack.i.h.bf16 %v4857_v49  ;;  %v4858_v25 = vunpack.i.l.bf16 %v4857_v49  ;;  %v4879_v47 = vunpack.i.h.bf16 %v4877_v40  ;;  %v4878_v21 = vunpack.i.l.bf16 %v4877_v40  ;;  %v1133_v40 = vld [vmem:[%s6497_s2 + $0x10] sm:$0xff] }
 0x268   :  { %4308 = vmatprep.subr.bf16.mxu0 %v4307_v51  ;;  %v1138_v51 = vld [vmem:[%s6497_s2 + $0x38] sm:$0xff] }
 0x269   :  { %4310 = vmatpush1.bf16.msra.mxu0 %v4309_v62  ;;  %v1084_v39 = vsel %vm1058_vm6, %v4858_v25, %v4859_v18  ;;  %v1088_v42 = vsel %vm1058_vm6, %v4878_v21, %v4879_v47  ;;  %v1435_v18 = vld [vmem:[%s6498_s3 + $0x8] sm:$0xff]  ;;  %v1444_v47 = vld [vmem:[%s6498_s3 + $0x50] sm:$0xff] }
 0x26a   :  { %v4867_v54 = vpop.permute.xlu0 %4866  ;;  %v4882_v61 = vpop.permute.xlu1 %4881  ;;  %4312 = vmatprep.subr.bf16.mxu0 %v4311_v58  ;;  %v1145_v58 = vld [vmem:[%s6497_s2 + $0x70] sm:$0xff]  ;;  %s5040_s2 = smov 54  }
 0x26b   :  { %v4869_v59 = vunpack.i.h.bf16 %v4867_v54  ;;  %v4868_v41 = vunpack.i.l.bf16 %v4867_v54  ;;  %v4884_v13 = vunpack.i.h.bf16 %v4882_v61  ;;  %v4883_v6 = vunpack.i.l.bf16 %v4882_v61 }
 0x26c   :  { %v5021_v61 = vmov 0.0|0.0  }
 0x26d   :  { %v1081_v8 = vsel %vm1058_vm6, %v4849_v9, %v4868_v41  ;;  %4314 = vmatpush1.bf16.msra.mxu0 %v4313_v33  ;;  %v1082_v36 = vsel %vm1058_vm6, %v4868_v41, %v4869_v59  ;;  %v1086_v12 = vsel %vm1058_vm6, %v4883_v6, %v4884_v13  ;;  %v1434_v33 = vld [vmem:[%s6498_s3] sm:$0xff]  ;;  %4331 = vmatprep.subr.bf16.mxu1 %v5021_v61  ;;  %v1437_v41 = vld [vmem:[%s6498_s3 + $0x18] sm:$0xff] }
 0x26e   :  { %v4317_v22 = vpack.c.bf16 %v1081_v8, %v1079_v30  ;;  %v4872_v63 = vpop.permute.xlu0 %4871  ;;  %v4887_v5 = vpop.permute.xlu1 %4886  ;;  %v4315_v7 = vpack.c.bf16 %v1082_v36, %v1080_v19  ;;  %v4319_v27 = vpack.c.bf16 %v1086_v12, %v1084_v39  ;;  %v4332_v59 = vpack.c.bf16 %v1435_v18, %v1434_v33  ;;  %v1438_v19 = vld [vmem:[%s6498_s3 + $0x20] sm:$0xff]  ;;  %v1439_v30 = vld [vmem:[%s6498_s3 + $0x28] sm:$0xff] }
 0x26f   :  { %v4874_v3 = vunpack.i.h.bf16 %v4872_v63  ;;  %v4873_v17 = vunpack.i.l.bf16 %v4872_v63  ;;  %v4888_v31 = vunpack.i.l.bf16 %v4887_v5  ;;  %v4889_v45 = vunpack.i.h.bf16 %v4887_v5  ;;  %v1441_v63 = vld [vmem:[%s6498_s3 + $0x38] sm:$0xff] }
 0x270   :  { %4316 = vmatprep.subr.bf16.mxu0 %v4315_v7  ;;  %4333 = vmatpush1.bf16.msra.mxu1 %v4332_v59  ;;  %v4338_v36 = vpack.c.bf16 %v1439_v30, %v1438_v19 }
 0x271   :  { %v1083_v16 = vsel %vm1058_vm6, %v4873_v17, %v4858_v25  ;;  %v1085_v29 = vsel %vm1058_vm6, %v4874_v3, %v4883_v6  ;;  %4318 = vmatpush1.bf16.msra.mxu0 %v4317_v22  ;;  %v1087_v20 = vsel %vm1058_vm6, %v4888_v31, %v4878_v21  ;;  %v1436_v25 = vld [vmem:[%s6498_s3 + $0x10] sm:$0xff]  ;;  %4334 = vmatprep.subr.bf16.mxu1 %v5021_v61  ;;  %v1442_v3 = vld [vmem:[%s6498_s3 + $0x40] sm:$0xff]  ;;  %v1443_v17 = vld [vmem:[%s6498_s3 + $0x48] sm:$0xff] }
 0x272   :  { %v4321_v14 = vpack.c.bf16 %v1085_v29, %v1083_v16  ;;  %v4892_v43 = vpop.permute.xlu0 %4891  ;;  %v4902_v28 = vpop.permute.xlu1 %4901  ;;  %4320 = vmatprep.subr.bf16.mxu0 %v4319_v27  ;;  %v4335_v13 = vpack.c.bf16 %v1437_v41, %v1436_v25  ;;  %v1440_v22 = vld [vmem:[%s6498_s3 + $0x30] sm:$0xff]  ;;  %v4344_v39 = vpack.c.bf16 %v1443_v17, %v1442_v3  ;;  %v1445_v21 = vld [vmem:[%s6498_s3 + $0x58] sm:$0xff]  ;;  %v1446_v27 = vld [vmem:[%s6498_s3 + $0x60] sm:$0xff] }
 0x273   :  { %v4894_v56 = vunpack.i.h.bf16 %v4892_v43  ;;  %v4893_v37 = vunpack.i.l.bf16 %v4892_v43  ;;  %v4904_v11 = vunpack.i.h.bf16 %v4902_v28  ;;  %v4903_v10 = vunpack.i.l.bf16 %v4902_v28  ;;  %v1447_v16 = vld [vmem:[%s6498_s3 + $0x68] sm:$0xff]  ;;  %v1449_v43 = vld [vmem:[%s6498_s3 + $0x78] sm:$0xff] }
 0x274   :  { %4336 = vmatpush1.bf16.msra.mxu1 %v4335_v13  ;;  %v4341_v7 = vpack.c.bf16 %v1441_v63, %v1440_v22  ;;  %v4347_v31 = vpack.c.bf16 %v1445_v21, %v1444_v47  ;;  %v4350_v29 = vpack.c.bf16 %v1447_v16, %v1446_v27 }
 0x275   :  { %v1089_v46 = vsel %vm1058_vm6, %v4889_v45, %v4893_v37  ;;  %4322 = vmatpush1.bf16.msra.mxu0 %v4321_v14  ;;  %v1090_v55 = vsel %vm1058_vm6, %v4893_v37, %v4894_v56  ;;  %v1094_v2 = vsel %vm1058_vm6, %v4903_v10, %v4904_v11  ;;  %4337 = vmatprep.subr.bf16.mxu1 %v5021_v61  ;;  %v1448_v14 = vld [vmem:[%s6498_s3 + $0x70] sm:$0xff]  ;;  %v1450_v45 = vld [vmem:[%s6498_s3 + $0x80] sm:$0xff]  ;;  %v1451_v56 = vld [vmem:[%s6498_s3 + $0x88] sm:$0xff] }
 0x276   :  { %v4325_v1 = vpack.c.bf16 %v1089_v46, %v1087_v20  ;;  %v4897_v48 = vpop.permute.xlu0 %4896  ;;  %v4323_v32 = vpack.c.bf16 %v1090_v55, %v1088_v42  ;;  %v4353_v28 = vpack.c.bf16 %v1449_v43, %v1448_v14  ;;  %v4356_v37 = vpack.c.bf16 %v1451_v56, %v1450_v45  ;;  %v1452_v20 = vld [vmem:[%s6498_s3 + $0x90] sm:$0xff]  ;;  %v1453_v42 = vld [vmem:[%s6498_s3 + $0x98] sm:$0xff]  ;;  %v1454_v11 = vld [vmem:[%s6498_s3 + $0xa0] sm:$0xff] }
 0x277   :  { %v4899_v15 = vunpack.i.h.bf16 %v4897_v48  ;;  %v4898_v38 = vunpack.i.l.bf16 %v4897_v48  ;;  %v4359_v46 = vpack.c.bf16 %v1453_v42, %v1452_v20  ;;  %v1457_v48 = vld [vmem:[%s6498_s3 + $0xb8] sm:$0xff]  ;;  %v1561_v20 = vlaneseq }
 0x278   :  { %4324 = vmatprep.subr.bf16.mxu0 %v4323_v32  ;;  %4339 = vmatpush1.bf16.msra.mxu1 %v4338_v36  ;;  %v5022_v42 = vmov 1966171168  }
 0x279   :  { %4326 = vmatpush1.bf16.msra.mxu0 %v4325_v1  ;;  %v1092_v57 = vsel %vm1058_vm6, %v4898_v38, %v4899_v15  ;;  %4340 = vmatprep.subr.bf16.mxu1 %v5021_v61  ;;  %v1456_v1 = vld [vmem:[%s6498_s3 + $0xb0] sm:$0xff]  ;;  %v1458_v15 = vld [vmem:[%s6498_s3 + $0xc0] sm:$0xff]  ;;  %vm1593_vm9 = vcmp.lt.s32.totalorder %v1561_v20, 98  ;;  %vm5980_vm13 = vcmp.ge.s32.totalorder %v1561_v20, 98  ;;  %vm5985_vm14 = vcmp.lt.s32.totalorder %v1561_v20, 147 }
 0x27a   :  { %v4907_v24 = vpop.permute.xlu0 %4906  ;;  %v4327_v4 = vpack.c.bf16 %v1094_v2, %v1092_v57  ;;  %v4365_v32 = vpack.c.bf16 %v1457_v48, %v1456_v1  ;;  %v1460_v2 = vld [vmem:[%s6498_s3 + $0xd0] sm:$0xff]  ;;  %vm5990_vm15 = vcmp.ge.s32.totalorder %v1561_v20, 19  ;;  %vm5995_vm3 = vcmp.lt.s32.totalorder %v1561_v20, 68 }
 0x27b   :  { %v4909_v44 = vunpack.i.h.bf16 %v4907_v24  ;;  %v4908_v35 = vunpack.i.l.bf16 %v4907_v24  ;;  %v1461_v24 = vld [vmem:[%s6498_s3 + $0xd8] sm:$0xff]  ;;  %vm6010_vm0 = vcmp.ge.s32.totalorder %v1561_v20, 117 }
 0x27c   :  { %4328 = vmatprep.subr.bf16.mxu0 %v4327_v4  ;;  %4342 = vmatpush1.bf16.msra.mxu1 %v4341_v7  ;;  %v4371_v4 = vpack.c.bf16 %v1461_v24, %v1460_v2 }
 0x27d   :  { %v1091_v52 = vsel %vm1058_vm6, %v4908_v35, %v4898_v38  ;;  %v1093_v62 = vsel %vm1058_vm6, %v4909_v44, %v4903_v10  ;;  %4343 = vmatprep.subr.bf16.mxu1 %v5021_v61  ;;  %v1455_v10 = vld [vmem:[%s6498_s3 + $0xa8] sm:$0xff]  ;;  %v1462_v44 = vld [vmem:[%s6498_s3 + $0xe0] sm:$0xff]  ;;  %vm1600_vm6 = vcmask 801792  }
 0x27e   :  { %v4329_v49 = vpack.c.bf16 %v1093_v62, %v1091_v52  ;;  %v4362_v55 = vpack.c.bf16 %v1455_v10, %v1454_v11  ;;  %v1459_v38 = vld [vmem:[%s6498_s3 + $0xc8] sm:$0xff]  ;;  %v5936_v10 = vshrl.u32 %v1561_v20, 7  ;;  %s5023_s3 = smov 98  }
 0x27f   :  { %v4368_v57 = vpack.c.bf16 %v1459_v38, %v1458_v15 }
 0x280   :  { %4330 = vmatpush1.bf16.msra.mxu0 %v4329_v49  ;;  %4345 = vmatpush1.bf16.msra.mxu1 %v4344_v39 }
 0x281   :  { %4346 = vmatprep.subr.bf16.mxu1 %v5021_v61 }
 0x283   :  { %1314 = vmatmul.mubr.f32.vlgmr.msra.gmra.mrb[0].mxu0 %v1133_v40 }
 0x284   :  { %4171 = vmatprep.mubr.msk.f32.mxu0 %vm1147_vm7, %v1138_v51  ;;  %4348 = vmatpush1.bf16.msra.mxu1 %v4347_v31 }
 0x285   :  { %4349 = vmatprep.subr.bf16.mxu1 %v5021_v61 }
 0x287   :  { %1320 = vmatmul.mubr.f32.gmra.mrb[2].mxu0 %v1137_v50 }
 0x288   :  { %4172 = vmatprep.mubr.msk.f32.mxu0 %vm1147_vm7, %v1142_v53  ;;  %4351 = vmatpush1.bf16.msra.mxu1 %v4350_v29 }
 0x289   :  { %4352 = vmatprep.subr.bf16.mxu1 %v5021_v61 }
 0x28b   :  { %1326 = vmatmul.mubr.f32.gmra.mrb[4].mxu0 %v1141_v60 }
 0x28c   :  { %4173 = vmatprep.mubr.msk.f32.mxu0 %vm1147_vm7, %v1146_v26  ;;  %4354 = vmatpush1.bf16.msra.mxu1 %v4353_v28  ;;  %vm1633_vm7 = vcmp.ge.s32.totalorder %v1561_v20, 68 }
 0x28d   :  { %4355 = vmatprep.subr.bf16.mxu1 %v5021_v61 }
 0x28f   :  { %1332 = vmatmul.mubr.f32.gmra.mrb[6].mxu0 %v1145_v58 }
 0x290   :  { %4357 = vmatpush1.bf16.msra.mxu1 %v4356_v37 }
 0x291   :  { %4358 = vmatprep.subr.bf16.mxu1 %v5021_v61 }
 0x294   :  { %4360 = vmatpush1.bf16.msra.mxu1 %v4359_v46  ;;  %v1568_v46 = vunpack.c.l.s4 %v5022_v42 }
 0x295   :  { %4361 = vmatprep.subr.bf16.mxu1 %v5021_v61 }
 0x296   :  { %v1569_v11 = vunpack.c.0.s8 %v1568_v46 }
 0x298   :  { %4363 = vmatpush1.bf16.msra.mxu1 %v4362_v55  ;;  %v5939_v55 = vsub.s32 %v1569_v11, %v5936_v10 }
 0x299   :  { %4364 = vmatprep.subr.bf16.mxu1 %v5021_v61 }
 0x29c   :  { %4366 = vmatpush1.bf16.msra.mxu1 %v4365_v32 }
 0x29d   :  { %4367 = vmatprep.subr.bf16.mxu1 %v5021_v61 }
 0x2a0   :  { %4369 = vmatpush1.bf16.msra.mxu1 %v4368_v57 }
 0x2a1   :  { %4370 = vmatprep.subr.bf16.mxu1 %v5021_v61 }
 0x2a4   :  { %4372 = vmatpush1.bf16.msra.mxu1 %v4371_v4 }
 0x2a5   :  { %1532 = vmatprep.subr.mxu1 %v4996_v0 }
 0x2a8   :  { %1533 = vmatpush1.msra.mxu1 %v1462_v44 }
 0x356   :  { %v5773_v23 = vpop.f32.mrb[0].mxu0 }
 0x357   :  { %1346 = vrot.lane.b32.xlu1 %v5773_v23, %s5005_s13  ;;  %v5777_v34 = vpop.f32.mrb[1].mxu0 }
 0x358   :  { %1348 = vrot.lane.b32.xlu0 %v5777_v34, %s5005_s13 }
 0x35a   :  { %v5781_v9 = vpop.f32.mrb[2].mxu0 }
 0x35b   :  { %1350 = vrot.lane.b32.xlu1 %v5781_v9, %s5005_s13  ;;  %v5794_v54 = vpop.f32.mrb[3].mxu0 }
 0x35c   :  { %1352 = vrot.lane.b32.xlu0 %v5794_v54, %s5005_s13 }
 0x35e   :  { %v5802_v6 = vpop.f32.mrb[4].mxu0 }
 0x35f   :  { %1354 = vrot.lane.b32.xlu1 %v5802_v6, %s5005_s13  ;;  %v5813_v8 = vpop.f32.mrb[5].mxu0 }
 0x360   :  { %1356 = vrot.lane.b32.xlu0 %v5813_v8, %s5005_s13 }
 0x362   :  { %v5817_v12 = vpop.f32.mrb[6].mxu0 }
 0x363   :  { %1358 = vrot.lane.b32.xlu1 %v5817_v12, %s5005_s13  ;;  %v5828_v5 = vpop.f32.mrb[7].mxu0 }
 0x364   :  { %1360 = vrot.lane.b32.xlu0 %v5828_v5, %s5005_s13  ;;  %s5035_s13 = smov 114  }
 0x3c9   :  { %v1347_v35 = vpop.permute.xlu1 %1346 }
 0x3ca   :  { %v1349_v52 = vpop.permute.xlu0 %1348 }
 0x3cb   :  { %v1362_v62 = vsel %vm630_vm1, %v1347_v35, %v1349_v52  ;;  %v1375_v49 = vmax.f32 %v5777_v34, %v1349_v52 }
 0x3cc   :  { %v1374_v40 = vmax.f32 %v5773_v23, %v1362_v62 }
 0x3cd   :  { %v1351_v51 = vpop.permute.xlu1 %1350  ;;  %1392 = vrot.lane.b32.xlu0 %v1375_v49, %s5006_s1 }
 0x3ce   :  { %v1353_v50 = vpop.permute.xlu0 %1352  ;;  %1390 = vrot.lane.b32.xlu1 %v1374_v40, %s5006_s1 }
 0x3cf   :  { %v1363_v0 = vsel %vm630_vm1, %v1351_v51, %v1353_v50  ;;  %v1377_v53 = vmax.f32 %v5794_v54, %v1353_v50 }
 0x3d0   :  { %v1376_v60 = vmax.f32 %v5781_v9, %v1363_v0 }
 0x3d1   :  { %v1355_v26 = vpop.permute.xlu1 %1354  ;;  %1396 = vrot.lane.b32.xlu0 %v1377_v53, %s5006_s1 }
 0x3d2   :  { %v1357_v58 = vpop.permute.xlu0 %1356  ;;  %1394 = vrot.lane.b32.xlu1 %v1376_v60, %s5006_s1 }
 0x3d3   :  { %v1364_v23 = vsel %vm630_vm1, %v1355_v26, %v1357_v58  ;;  %v1379_v34 = vmax.f32 %v5813_v8, %v1357_v58 }
 0x3d4   :  { %v1378_v33 = vmax.f32 %v5802_v6, %v1364_v23 }
 0x3d5   :  { %v1359_v18 = vpop.permute.xlu1 %1358  ;;  %1400 = vrot.lane.b32.xlu0 %v1379_v34, %s5006_s1 }
 0x3d6   :  { %1398 = vrot.lane.b32.xlu1 %v1378_v33, %s5006_s1  ;;  %v1361_v25 = vpop.permute.xlu0 %1360 }
 0x3d7   :  { %v1365_v9 = vsel %vm630_vm1, %v1359_v18, %v1361_v25  ;;  %v1381_v54 = vmax.f32 %v5828_v5, %v1361_v25  ;;  %vm1563_vm1 = vcmp.lt.s32.totalorder %v1561_v20, 49 }
 0x3d8   :  { %v1380_v61 = vmax.f32 %v5817_v12, %v1365_v9 }
 0x3d9   :  { %1404 = vrot.lane.b32.xlu0 %v1381_v54, %s5006_s1 }
 0x3da   :  { %1402 = vrot.lane.b32.xlu1 %v1380_v61, %s5006_s1  ;;  %s5024_s1 = smov 49  }
 0x43f   :  { %v1393_v59 = vpop.permute.xlu0 %1392 }
 0x440   :  { %v1419_v41 = vmax.f32 %v1375_v49, %v1393_v59  ;;  %v1391_v13 = vpop.permute.xlu1 %1390 }
 0x441   :  { %v1406_v6 = vsel %vm714_vm5, %v1391_v13, %v1393_v59 }
 0x442   :  { %v1427_v19 = vmax.f32 %v1419_v41, 0.0  ;;  %v1418_v30 = vmax.f32 %v1374_v40, %v1406_v6 }
 0x443   :  { %v1397_v8 = vpop.permute.xlu0 %1396 }
 0x444   :  { %v1426_v36 = vmax.f32 %v1418_v30, 0.0  ;;  %v1421_v22 = vmax.f32 %v1377_v53, %v1397_v8  ;;  %v1395_v63 = vpop.permute.xlu1 %1394  ;;  %4174 = vmatprep.mubr.msk.f32.mxu1 %vm1463_vm8, %v1427_v19 }
 0x445   :  { %v1407_v12 = vsel %vm714_vm5, %v1395_v63, %v1397_v8 }
 0x446   :  { %v1429_v5 = vmax.f32 %v1421_v22, 0.0  ;;  %v1420_v7 = vmax.f32 %v1376_v60, %v1407_v12  ;;  %1541 = vmatmul.mubr.f32.vlgmr.msra.gmra.mrb[24].mxu1 %v1426_v36 }
 0x447   :  { %v1401_v3 = vpop.permute.xlu0 %1400 }
 0x448   :  { %v1428_v17 = vmax.f32 %v1420_v7, 0.0  ;;  %v1423_v39 = vmax.f32 %v1379_v34, %v1401_v3  ;;  %v1399_v47 = vpop.permute.xlu1 %1398  ;;  %4175 = vmatprep.mubr.msk.f32.mxu1 %vm1463_vm8, %v1429_v5 }
 0x449   :  { %v1408_v21 = vsel %vm714_vm5, %v1399_v47, %v1401_v3 }
 0x44a   :  { %v1431_v31 = vmax.f32 %v1423_v39, 0.0  ;;  %v1422_v27 = vmax.f32 %v1378_v33, %v1408_v21  ;;  %1546 = vmatmul.mubr.f32.gmra.mrb[26].mxu1 %v1428_v17 }
 0x44b   :  { %v1405_v16 = vpop.permute.xlu0 %1404 }
 0x44c   :  { %v1430_v29 = vmax.f32 %v1422_v27, 0.0  ;;  %v1425_v14 = vmax.f32 %v1381_v54, %v1405_v16  ;;  %v1403_v43 = vpop.permute.xlu1 %1402  ;;  %4176 = vmatprep.mubr.msk.f32.mxu1 %vm1463_vm8, %v1431_v31 }
 0x44d   :  { %v1409_v28 = vsel %vm714_vm5, %v1403_v43, %v1405_v16  ;;  %vm1592_vm5 = vcmp.ge.s32.totalorder %v1561_v20, 49 }
 0x44e   :  { %v1433_v45 = vmax.f32 %v1425_v14, 0.0  ;;  %v1424_v56 = vmax.f32 %v1380_v61, %v1409_v28  ;;  %1551 = vmatmul.mubr.f32.gmra.mrb[28].mxu1 %v1430_v29  ;;  %vm1594_vm12 = vmand %vm1592_vm5, %vm1593_vm9 }
 0x44f   :  { %vm1613_vm5 = vmand %vm5990_vm15, %vm5995_vm3  ;;  %vm1648_vm15 = vcmask 957440   ;;  %vm6030_vm3 = vcmp.ge.s32.totalorder %v1561_v20, 87 }
 0x450   :  { %v1432_v37 = vmax.f32 %v1424_v56, 0.0  ;;  %4177 = vmatprep.mubr.msk.f32.mxu1 %vm1463_vm8, %v1433_v45  ;;  %vm1634_vm8 = vcmp.lt.s32.totalorder %v1561_v20, 117 }
 0x451   :  { %vm1635_vm9 = vmand %vm1633_vm7, %vm1634_vm8  ;;  %vm1667_vm8 = vcmask 711680  }
 0x452   :  { %1556 = vmatmul.mubr.f32.gmra.mrb[30].mxu1 %v1432_v37 }
 0x519   :  { %v1542_v1 = vpop.f32.mrb[24].mxu1 }
 0x51a   :  { %1565 = vst.msk [vmem:[#allocation3] sm:$0x1] %vm1563_vm1, %v1542_v1  ;;  %v1573_v48 = vrot.slane %v1542_v1, %v5939_v55  ;;  %v1615_v32 = vcombine.high %v1542_v1, %v1542_v1  ;;  %v1544_v15 = vpop.f32.mrb[25].mxu1  ;;  %vm1605_vm1 = vmand %vm5980_vm13, %vm5985_vm14  ;;  %vm6020_vm13 = vcmp.ge.s32.totalorder %v1561_v20, 38  ;;  %vm6025_vm14 = vcmp.lt.s32.totalorder %v1561_v20, 87 }
 0x51c   :  { %v1574_v38 = vcombine.high %v1573_v48, %v1573_v48  ;;  %v1622_v57 = vrot.slane %v1615_v32, %v5939_v55  ;;  %v1581_v2 = vrot.slane %v1573_v48, %v5939_v55 }
 0x51d   :  { %v1547_v24 = vpop.f32.mrb[26].mxu1 }
 0x51e   :  { %v1549_v4 = vpop.f32.mrb[27].mxu1  ;;  %v1596_v44 = vcombine.high %v1581_v2, %v1581_v2  ;;  %v1588_v35 = vrot.slane %v1574_v38, %v5939_v55  ;;  %v1637_v52 = vcombine.high %v1622_v57, %v1622_v57  ;;  %v1681_v49 = vrot.slane %v1547_v24, %v5939_v55 }
 0x51f   :  { %v1629_v51 = vrot.slane %v1622_v57, %v5939_v55  ;;  %v1729_v26 = vcombine.high %v1547_v24, %v1547_v24 }
 0x520   :  { %1597 = vrot.lane.b32.xlu1 %v1596_v44, %s5023_s3  ;;  %1589 = vrot.lane.b32.xlu0 %v1588_v35, %s5024_s1  ;;  %v1607_v50 = vcombine.high %v1588_v35, %v1588_v35  ;;  %v1644_v0 = vrot.slane %v1637_v52, %v5939_v55  ;;  %v1688_v60 = vrot.slane %v1681_v49, %v5939_v55 }
 0x521   :  { %v1552_v62 = vpop.f32.mrb[28].mxu1  ;;  %v1696_v34 = vcombine.high %v1681_v49, %v1681_v49  ;;  %v1736_v18 = vrot.slane %v1729_v26, %v5939_v55  ;;  %v1655_v25 = vcombine.high %v1629_v51, %v1629_v51 }
 0x522   :  { %v1554_v40 = vpop.f32.mrb[29].mxu1  ;;  %v1663_v23 = vcombine.high %v1644_v0, %v1644_v0  ;;  %v1711_v33 = vcombine.high %v1688_v60, %v1688_v60  ;;  %v1794_v59 = vrot.slane %v1552_v62, %v5939_v55  ;;  %v1843_v36 = vcombine.high %v1552_v62, %v1552_v62 }
 0x523   :  { %v1703_v9 = vrot.slane %v1696_v34, %v5939_v55  ;;  %v1751_v54 = vcombine.high %v1736_v18, %v1736_v18  ;;  %v1743_v61 = vrot.slane %v1736_v18, %v5939_v55 }
 0x524   :  { %1630 = vrot.lane.b32.xlu1 %v1629_v51, %s5025_s8  ;;  %1608 = vrot.lane.b32.xlu0 %v1607_v50, %s5026_s9  ;;  %v1801_v6 = vrot.slane %v1794_v59, %v5939_v55  ;;  %v1809_v30 = vcombine.high %v1794_v59, %v1794_v59  ;;  %v1850_v12 = vrot.slane %v1843_v36, %v5939_v55 }
 0x525   :  { %v5949_v53 = vpop.f32.mrb[30].mxu1  ;;  %v1721_v41 = vcombine.high %v1703_v9, %v1703_v9  ;;  %v1758_v13 = vrot.slane %v1751_v54, %v5939_v55  ;;  %v1768_v22 = vcombine.high %v1743_v61, %v1743_v61 }
 0x526   :  { %v1559_v58 = vpop.f32.mrb[31].mxu1  ;;  %v1824_v8 = vcombine.high %v1801_v6, %v1801_v6  ;;  %v1816_v63 = vrot.slane %v1809_v30, %v5939_v55  ;;  %v1857_v5 = vrot.slane %v1850_v12, %v5939_v55  ;;  %v1868_v7 = vcombine.high %v1850_v12, %v1850_v12 }
 0x527   :  { %v1776_v19 = vcombine.high %v1758_v13, %v1758_v13  ;;  %v1909_v3 = vrot.slane %v5949_v53, %v5939_v55  ;;  %v1958_v47 = vcombine.high %v5949_v53, %v5949_v53 }
 0x528   :  { %1645 = vrot.lane.b32.xlu1 %v1644_v0, %s5027_s10  ;;  %1664 = vrot.lane.b32.xlu0 %v1663_v23, %s5028_s11  ;;  %v1835_v17 = vcombine.high %v1816_v63, %v1816_v63  ;;  %v1883_v21 = vcombine.high %v1857_v5, %v1857_v5  ;;  %v1875_v31 = vrot.slane %v1868_v7, %v5939_v55 }
 0x529   :  { %v1916_v39 = vrot.slane %v1909_v3, %v5939_v55  ;;  %v1924_v27 = vcombine.high %v1909_v3, %v1909_v3  ;;  %v1965_v29 = vrot.slane %v1958_v47, %v5939_v55 }
 0x52a   :  { %v1891_v28 = vcombine.high %v1875_v31, %v1875_v31 }
 0x52b   :  { %v1939_v16 = vcombine.high %v1916_v39, %v1916_v39  ;;  %v1931_v14 = vrot.slane %v1924_v27, %v5939_v55  ;;  %v1982_v43 = vcombine.high %v1965_v29, %v1965_v29  ;;  %v1972_v45 = vrot.slane %v1965_v29, %v5939_v55 }
 0x52c   :  { %1656 = vrot.lane.b32.xlu1 %v1655_v25, %s5029_s12  ;;  %1712 = vrot.lane.b32.xlu0 %v1711_v33, %s5015_s22  ;;  %s5033_s22 = smov 95  }
 0x52d   :  { %v1989_v56 = vrot.slane %v1982_v43, %v5939_v55  ;;  %v1950_v37 = vcombine.high %v1931_v14, %v1931_v14  ;;  %v1997_v46 = vcombine.high %v1972_v45, %v1972_v45 }
 0x52f   :  { %v2005_v42 = vcombine.high %v1989_v56, %v1989_v56 }
 0x530   :  { %1689 = vrot.lane.b32.xlu1 %v1688_v60, %s4994_s29  ;;  %1704 = vrot.lane.b32.xlu0 %v1703_v9, %s5030_s14  ;;  %s5034_s29 = smov 46  }
 0x534   :  { %1744 = vrot.lane.b32.xlu1 %v1743_v61, %s5031_s15  ;;  %1722 = vrot.lane.b32.xlu0 %v1721_v41, %s5032_s16 }
 0x538   :  { %1759 = vrot.lane.b32.xlu1 %v1758_v13, %s5004_s0  ;;  %1777 = vrot.lane.b32.xlu0 %v1776_v19, %s5033_s22  ;;  %s5038_s0 = smov 84  }
 0x53c   :  { %1769 = vrot.lane.b32.xlu1 %v1768_v22, %s5034_s29  ;;  %1825 = vrot.lane.b32.xlu0 %v1824_v8, %s5035_s13 }
 0x540   :  { %1802 = vrot.lane.b32.xlu1 %v1801_v6, %s5036_s17  ;;  %1817 = vrot.lane.b32.xlu0 %v1816_v63, %s5037_s20 }
 0x544   :  { %1858 = vrot.lane.b32.xlu1 %v1857_v5, %s5038_s0  ;;  %1836 = vrot.lane.b32.xlu0 %v1835_v17, %s5039_s21 }
 0x548   :  { %1884 = vrot.lane.b32.xlu1 %v1883_v21, %s5040_s2  ;;  %1876 = vrot.lane.b32.xlu0 %v1875_v31, %s5041_s23 }
 0x54c   :  { %1917 = vrot.lane.b32.xlu1 %v1916_v39, %s5042_s24  ;;  %1940 = vrot.lane.b32.xlu0 %v1939_v16, %s5043_s25 }
 0x550   :  { %1892 = vrot.lane.b32.xlu1 %v1891_v28, %s5044_s26  ;;  %1932 = vrot.lane.b32.xlu0 %v1931_v14, %s5020_s27 }
 0x554   :  { %1973 = vrot.lane.b32.xlu1 %v1972_v45, %s5012_s19  ;;  %1951 = vrot.lane.b32.xlu0 %v1950_v37, %s5045_s28 }
 0x558   :  { %2006 = vrot.lane.b32.xlu1 %v2005_v42, %s5011_s18  ;;  %1990 = vrot.lane.b32.xlu0 %v1989_v56, %s5046_s30 }
 0x55c   :  { %1998 = vrot.lane.b32.xlu1 %v1997_v46, %s5047_s4 }
 0x592   :  { %v1598_v15 = vpop.permute.xlu1 %1597  ;;  %v1590_v38 = vpop.permute.xlu0 %1589 }
 0x593   :  { %v1599_v57 = vrot.slane %v1598_v15, 7  ;;  %1595 = vst.msk [vmem:[#allocation3] sm:$0x1] %vm1594_vm12, %v1590_v38  ;;  %vm6015_vm12 = vcmp.lt.s32.totalorder %v1561_v20, 166 }
 0x594   :  { %vm1653_vm7 = vmand %vm6010_vm0, %vm6015_vm12  ;;  %vm6057_vm0 = vcmp.lt.s32.totalorder %v1561_v20, 57  ;;  %vm6062_vm12 = vcmp.ge.s32.totalorder %v1561_v20, 57 }
 0x595   :  { %v1601_v2 = vsel %vm1600_vm6, %v1599_v57, %v1598_v15  ;;  %vm6035_vm6 = vcmp.lt.s32.totalorder %v1561_v20, 136 }
 0x596   :  { %v1631_v24 = vpop.permute.xlu1 %1630  ;;  %1606 = vst.msk [vmem:[#allocation3] sm:$0x3] %vm1605_vm1, %v1601_v2  ;;  %v1609_v4 = vpop.permute.xlu0 %1608  ;;  %vm1661_vm1 = vmand %vm6020_vm13, %vm6025_vm14  ;;  %vm6067_vm13 = vcmp.lt.s32.totalorder %v1561_v20, 106  ;;  %vm6072_vm14 = vcmp.ge.s32.totalorder %v1561_v20, 106 }
 0x597   :  { %1614 = vst.msk [vmem:[#allocation3 + $0x1] sm:$0x1] %vm1613_vm5, %v1609_v4  ;;  %vm1672_vm5 = vmand %vm6030_vm3, %vm6035_vm6 }
 0x598   :  { %1636 = vst.msk [vmem:[#allocation3 + $0x1] sm:$0x1] %vm1635_vm9, %v1631_v24  ;;  %vm6052_vm9 = vcmp.ge.s32.totalorder %v1561_v20, 8  ;;  %vm1709_vm6 = vmand %vm6062_vm12, %vm6067_vm13  ;;  %vm6105_vm13 = vcmp.ge.s32.totalorder %v1561_v20, 125 }
 0x599   :  { %vm1694_vm3 = vmand %vm6052_vm9, %vm6057_vm0  ;;  %vm1748_vm9 = vcmp.lt.s32.totalorder %v1561_v20, 125 }
 0x59a   :  { %v1646_v49 = vpop.permute.xlu1 %1645  ;;  %v1665_v40 = vpop.permute.xlu0 %1664 }
 0x59b   :  { %v1647_v0 = vrot.slane %v1646_v49, 7  ;;  %v1666_v53 = vrot.slane %v1665_v40, 7 }
 0x59d   :  { %v1649_v60 = vsel %vm1648_vm15, %v1647_v0, %v1646_v49  ;;  %v1668_v25 = vsel %vm1667_vm8, %v1666_v53, %v1665_v40  ;;  %vm6077_vm15 = vcmp.lt.s32.totalorder %v1561_v20, 155  ;;  %vm1726_vm8 = vcmp.lt.s32.totalorder %v1561_v20, 76 }
 0x59e   :  { %1654 = vst.msk [vmem:[#allocation3 + $0x1] sm:$0x3] %vm1653_vm7, %v1649_v60  ;;  %v1657_v23 = vpop.permute.xlu1 %1656  ;;  %v1713_v34 = vpop.permute.xlu0 %1712  ;;  %vm6090_vm7 = vcmp.ge.s32.totalorder %v1561_v20, 27 }
 0x59f   :  { %1662 = vst.msk [vmem:[#allocation3 + $0x2] sm:$0x1] %vm1661_vm1, %v1657_v23  ;;  %v1714_v61 = vrot.slane %v1713_v34, 7  ;;  %vm1719_vm1 = vmand %vm6072_vm14, %vm6077_vm15  ;;  %vm6110_vm14 = vcmp.lt.s32.totalorder %v1561_v20, 174  ;;  %vm6120_vm15 = vcmp.lt.s32.totalorder %v1561_v20, 95 }
 0x5a0   :  { %1673 = vst.msk [vmem:[#allocation3 + $0x2] sm:$0x3] %vm1672_vm5, %v1668_v25  ;;  %vm1747_vm5 = vcmp.ge.s32.totalorder %v1561_v20, 76  ;;  %vm1727_vm0 = vmand %vm6090_vm7, %vm1726_vm8  ;;  %vm1780_vm8 = vcmask 777216  }
 0x5a1   :  { %v1715_v6 = vsel %vm798_vm10, %v1714_v61, %v1713_v34  ;;  %vm1749_vm12 = vmand %vm1747_vm5, %vm1748_vm9  ;;  %vm6115_vm10 = vcmp.ge.s32.totalorder %v1561_v20, 46  ;;  %vm6148_vm9 = vcmp.ge.s32.totalorder %v1561_v20, 16 }
 0x5a2   :  { %v1690_v41 = vpop.permute.xlu1 %1689  ;;  %v1705_v13 = vpop.permute.xlu0 %1704  ;;  %vm1766_vm7 = vmand %vm6105_vm13, %vm6110_vm14  ;;  %vm6168_vm13 = vcmp.ge.s32.totalorder %v1561_v20, 114  ;;  %vm6173_vm14 = vcmp.lt.s32.totalorder %v1561_v20, 163 }
 0x5a3   :  { %1695 = vst.msk [vmem:[#allocation3 + $0x3] sm:$0x1] %vm1694_vm3, %v1690_v41  ;;  %vm6125_vm3 = vcmp.ge.s32.totalorder %v1561_v20, 95 }
 0x5a4   :  { %1710 = vst.msk [vmem:[#allocation3 + $0x3] sm:$0x1] %vm1709_vm6, %v1705_v13  ;;  %vm6130_vm6 = vcmp.lt.s32.totalorder %v1561_v20, 144 }
 0x5a5   :  { %1720 = vst.msk [vmem:[#allocation3 + $0x3] sm:$0x3] %vm1719_vm1, %v1715_v6  ;;  %vm1774_vm1 = vmand %vm6115_vm10, %vm6120_vm15  ;;  %vm1828_vm15 = vcmask 932864  }
 0x5a6   :  { %v1745_v19 = vpop.permute.xlu1 %1744  ;;  %v1723_v30 = vpop.permute.xlu0 %1722  ;;  %vm1785_vm5 = vmand %vm6125_vm3, %vm6130_vm6  ;;  %vm6186_vm6 = vcmp.ge.s32.totalorder %v1561_v20, 35 }
 0x5a7   :  { %1728 = vst.msk [vmem:[#allocation3 + $0x4] sm:$0x1] %vm1727_vm0, %v1723_v30  ;;  %vm6153_vm0 = vcmp.lt.s32.totalorder %v1561_v20, 65 }
 0x5a8   :  { %1750 = vst.msk [vmem:[#allocation3 + $0x4] sm:$0x1] %vm1749_vm12, %v1745_v19  ;;  %vm6163_vm12 = vcmp.lt.s32.totalorder %v1561_v20, 114  ;;  %vm1807_vm10 = vmand %vm6148_vm9, %vm6153_vm0  ;;  %vm6209_vm9 = vcmp.lt.s32.totalorder %v1561_v20, 133  ;;  %vm6214_vm0 = vcmp.ge.s32.totalorder %v1561_v20, 5 }
 0x5aa   :  { %v1760_v12 = vpop.permute.xlu1 %1759  ;;  %v1778_v5 = vpop.permute.xlu0 %1777 }
 0x5ab   :  { %v1761_v17 = vrot.slane %v1760_v12, 7  ;;  %v1779_v39 = vrot.slane %v1778_v5, 7 }
 0x5ad   :  { %v1762_v47 = vsel %vm672_vm2, %v1761_v17, %v1760_v12  ;;  %vm6158_vm2 = vcmp.ge.s32.totalorder %v1561_v20, 65  ;;  %v1781_v43 = vsel %vm1780_vm8, %v1779_v39, %v1778_v5  ;;  %vm1833_vm8 = vmand %vm6168_vm13, %vm6173_vm14  ;;  %vm1887_vm13 = vcmp.ge.s32.totalorder %v1561_v20, 54 }
 0x5ae   :  { %1767 = vst.msk [vmem:[#allocation3 + $0x4] sm:$0x3] %vm1766_vm7, %v1762_v47  ;;  %v1770_v27 = vpop.permute.xlu1 %1769  ;;  %v1826_v16 = vpop.permute.xlu0 %1825  ;;  %vm1822_vm3 = vmand %vm6158_vm2, %vm6163_vm12  ;;  %vm6191_vm7 = vcmp.lt.s32.totalorder %v1561_v20, 84  ;;  %vm6219_vm2 = vcmp.lt.s32.totalorder %v1561_v20, 54  ;;  %vm1861_vm12 = vcmask 687104   ;;  %vm1888_vm14 = vcmp.lt.s32.totalorder %v1561_v20, 103 }
 0x5af   :  { %1775 = vst.msk [vmem:[#allocation3 + $0x5] sm:$0x1] %vm1774_vm1, %v1770_v27  ;;  %v1827_v56 = vrot.slane %v1826_v16, 7  ;;  %vm1841_vm1 = vmand %vm6186_vm6, %vm6191_vm7  ;;  %vm6234_vm6 = vcmp.ge.s32.totalorder %v1561_v20, 103  ;;  %vm6239_vm7 = vcmp.lt.s32.totalorder %v1561_v20, 152 }
 0x5b0   :  { %1786 = vst.msk [vmem:[#allocation3 + $0x5] sm:$0x3] %vm1785_vm5, %v1781_v43  ;;  %vm6204_vm5 = vcmp.ge.s32.totalorder %v1561_v20, 84 }
 0x5b1   :  { %v1829_v1 = vsel %vm1828_vm15, %v1827_v56, %v1826_v16  ;;  %vm1881_vm15 = vmand %vm6214_vm0, %vm6219_vm2  ;;  %vm6259_vm0 = vcmp.lt.s32.totalorder %v1561_v20, 122 }
 0x5b2   :  { %v1803_v46 = vpop.permute.xlu1 %1802  ;;  %v1818_v11 = vpop.permute.xlu0 %1817  ;;  %vm1900_vm2 = vmand %vm6234_vm6, %vm6239_vm7  ;;  %vm6296_vm7 = vcmp.ge.s32.totalorder %v1561_v20, 92 }
 0x5b3   :  { %1808 = vst.msk [vmem:[#allocation3 + $0x6] sm:$0x1] %vm1807_vm10, %v1803_v46  ;;  %vm1866_vm10 = vmand %vm6204_vm5, %vm6209_vm9  ;;  %vm1895_vm5 = vcmask 842752   ;;  %vm6254_vm9 = vcmp.ge.s32.totalorder %v1561_v20, 73 }
 0x5b4   :  { %1823 = vst.msk [vmem:[#allocation3 + $0x6] sm:$0x1] %vm1822_vm3, %v1818_v11  ;;  %vm1889_vm3 = vmand %vm1887_vm13, %vm1888_vm14  ;;  %vm6273_vm13 = vcmp.lt.s32.totalorder %v1561_v20, 171 }
 0x5b5   :  { %1834 = vst.msk [vmem:[#allocation3 + $0x6] sm:$0x3] %vm1833_vm8, %v1829_v1  ;;  %vm6244_vm8 = vcmp.ge.s32.totalorder %v1561_v20, 24  ;;  %vm1937_vm6 = vmand %vm6254_vm9, %vm6259_vm0  ;;  %vm6315_vm9 = vcmp.lt.s32.totalorder %v1561_v20, 62 }
 0x5b6   :  { %v1859_v57 = vpop.permute.xlu1 %1858  ;;  %v1837_v2 = vpop.permute.xlu0 %1836 }
 0x5b7   :  { %v1860_v24 = vrot.slane %v1859_v57, 7  ;;  %1842 = vst.msk [vmem:[#allocation3 + $0x7] sm:$0x1] %vm1841_vm1, %v1837_v2  ;;  %vm6249_vm1 = vcmp.lt.s32.totalorder %v1561_v20, 73 }
 0x5b8   :  { %vm1922_vm14 = vmand %vm6244_vm8, %vm6249_vm1  ;;  %vm6301_vm8 = vcmp.lt.s32.totalorder %v1561_v20, 141 }
 0x5b9   :  { %v1862_v4 = vsel %vm1861_vm12, %v1860_v24, %v1859_v57  ;;  %vm6268_vm12 = vcmp.ge.s32.totalorder %v1561_v20, 122 }
 0x5ba   :  { %v1885_v44 = vpop.permute.xlu1 %1884  ;;  %1867 = vst.msk [vmem:[#allocation3 + $0x7] sm:$0x3] %vm1866_vm10, %v1862_v4  ;;  %v1877_v35 = vpop.permute.xlu0 %1876  ;;  %vm6282_vm10 = vcmp.ge.s32.totalorder %v1561_v20, 43  ;;  %vm1948_vm1 = vmand %vm6268_vm12, %vm6273_vm13  ;;  %vm2001_vm13 = vcmp.ge.s32.totalorder %v1561_v20, 62 }
 0x5bb   :  { %1882 = vst.msk [vmem:[#allocation3 + $0x8] sm:$0x1] %vm1881_vm15, %v1877_v35  ;;  %vm6287_vm15 = vcmp.lt.s32.totalorder %v1561_v20, 92 }
 0x5bc   :  { %1890 = vst.msk [vmem:[#allocation3 + $0x8] sm:$0x1] %vm1889_vm3, %v1885_v44  ;;  %vm1943_vm3 = vcmask 998400   ;;  %vm1956_vm0 = vmand %vm6282_vm10, %vm6287_vm15  ;;  %vm2011_vm10 = vcmp.ge.s32.totalorder %v1561_v20, 111  ;;  %vm2012_vm15 = vcmp.lt.s32.totalorder %v1561_v20, 160 }
 0x5be   :  { %v1918_v52 = vpop.permute.xlu1 %1917  ;;  %v1941_v62 = vpop.permute.xlu0 %1940 }
 0x5bf   :  { %v1942_v33 = vrot.slane %v1941_v62, 7 }
 0x5c1   :  { %v1944_v30 = vsel %vm1943_vm3, %v1942_v33, %v1941_v62  ;;  %vm2013_vm3 = vmand %vm2011_vm10, %vm2012_vm15 }
 0x5c2   :  { %v1893_v0 = vpop.permute.xlu1 %1892  ;;  %v1933_v26 = vpop.permute.xlu0 %1932 }
 0x5c3   :  { %v1894_v58 = vrot.slane %v1893_v0, 7 }
 0x5c5   :  { %v1896_v9 = vsel %vm1895_vm5, %v1894_v58, %v1893_v0  ;;  %vm6310_vm5 = vcmp.ge.s32.totalorder %v1561_v20, 13 }
 0x5c6   :  { %1901 = vst.msk [vmem:[#allocation3 + $0x8] sm:$0x3] %vm1900_vm2, %v1896_v9  ;;  %v1974_v59 = vpop.permute.xlu1 %1973  ;;  %v1952_v41 = vpop.permute.xlu0 %1951  ;;  %vm1980_vm2 = vmand %vm6296_vm7, %vm6301_vm8 }
 0x5c7   :  { %1923 = vst.msk [vmem:[#allocation3 + $0x9] sm:$0x1] %vm1922_vm14, %v1918_v52  ;;  %v1975_v19 = vrot.slane %v1974_v59, 7  ;;  %vm1995_vm12 = vmand %vm6310_vm5, %vm6315_vm9  ;;  %vm2002_vm14 = vcmp.lt.s32.totalorder %v1561_v20, 111 }
 0x5c8   :  { %1938 = vst.msk [vmem:[#allocation3 + $0x9] sm:$0x1] %vm1937_vm6, %v1933_v26 }
 0x5c9   :  { %v1976_v8 = vsel %vm819_vm11, %v1975_v19, %v1974_v59  ;;  %1949 = vst.msk [vmem:[#allocation3 + $0x9] sm:$0x3] %vm1948_vm1, %v1944_v30  ;;  %vm2003_vm11 = vmand %vm2001_vm13, %vm2002_vm14 }
 0x5ca   :  { %1957 = vst.msk [vmem:[#allocation3 + $0xa] sm:$0x1] %vm1956_vm0, %v1952_v41  ;;  %v2007_v36 = vpop.permute.xlu1 %2006  ;;  %v1991_v22 = vpop.permute.xlu0 %1990 }
 0x5cb   :  { %v2008_v63 = vrot.slane %v2007_v36, 7  ;;  %1981 = vst.msk [vmem:[#allocation3 + $0xa] sm:$0x3] %vm1980_vm2, %v1976_v8 }
 0x5cc   :  { %1996 = vst.msk [vmem:[#allocation3 + $0xb] sm:$0x1] %vm1995_vm12, %v1991_v22 }
 0x5cd   :  { %v2009_v5 = vsel %vm945_vm4, %v2008_v63, %v2007_v36 }
 0x5ce   :  { %v1999_v12 = vpop.permute.xlu1 %1998 }
 0x5cf   :  { %2004 = vst.msk [vmem:[#allocation3 + $0xb] sm:$0x1] %vm2003_vm11, %v1999_v12 }
 0x5d0   :  { %2014 = vst.msk [vmem:[#allocation3 + $0xb] sm:$0x3] %vm2013_vm3, %v2009_v5 }
 0x5d1   :  { %4988 = dma.done.wait [#allocation4], 100352 }
 0x5d2   :  { %4989 = vsyncadd [#allocation4], 4294866944  ;;  %v2102_v7 = vld [vmem:[#allocation2 + $0x8] sm:$0xff]  ;;  %v2104_v3 = vld [vmem:[#allocation2 + $0x18] sm:$0xff]  ;;  %v2029_v32 = vsub.s32 1, %v5936_v10  ;;  %vm6600_vm4 = vcmask 261120  }
 0x5d3   :  { %v2101_v17 = vld [vmem:[#allocation2] sm:$0xff]  ;;  %2888 = vmatprep.subr.bf16.mxu1 %v2102_v7  ;;  %3175 = vmatprep.subr.bf16.mxu0 %v2104_v3  ;;  %v2103_v39 = vld [vmem:[#allocation2 + $0x10] sm:$0xff]  ;;  %v2110_v47 = vld [vmem:[#allocation2 + $0x48] sm:$0xff]  ;;  %v2025_v7 = vsub.s32 0, %v5936_v10  ;;  %s5049_s18 = smov [#allocation8]  }
 0x5d4   :  { %v2112_v20 = vld [vmem:[#allocation2 + $0x58] sm:$0xff]  ;;  %2889 = vmatpush1.bf16.msra.mxu1 %v2101_v17  ;;  %3176 = vmatpush1.bf16.msra.mxu0 %v2103_v39  ;;  %v2109_v21 = vld [vmem:[#allocation2 + $0x40] sm:$0xff]  ;;  %v2111_v31 = vld [vmem:[#allocation2 + $0x50] sm:$0xff]  ;;  %s4141_s19 = sshll.u32 %s5049_s18, 4  ;;  %s4142_s19 = int_to_ptr.vmem [resolvable:$true] %s4141_s19 }
 0x5d5   :  { %2890 = vmatprep.subr.bf16.mxu1 %v2110_v47  ;;  %3177 = vmatprep.subr.bf16.mxu0 %v2112_v20  ;;  %v2118_v27 = vld [vmem:[#allocation2 + $0x88] sm:$0xff]  ;;  %v2120_v16 = vld [vmem:[#allocation2 + $0x98] sm:$0xff]  ;;  %v2117_v29 = vld [vmem:[#allocation2 + $0x80] sm:$0xff]  ;;  %v2037_v20 = vsub.s32 3, %v5936_v10  ;;  %s4964_s27 = scalar_lea.vmem %s4142_s19, 128  ;;  %p4969_p9 = scmp.lt.s32.totalorder %s4142_s19, %s4142_s19 }
 0x5d6   :  { %v2119_v14 = vld [vmem:[#allocation2 + $0x90] sm:$0xff]  ;;  %v2126_v43 = vld [vmem:[#allocation2 + $0xc8] sm:$0xff]  ;;  %v2128_v28 = vld [vmem:[#allocation2 + $0xd8] sm:$0xff]  ;;  %p4965_p8 = scmp.ne.s32.totalorder %s4142_s19, %s4964_s27  ;;  %p4970_p10 = scmp.lt.s32.totalorder %s4964_s27, %s4964_s27 }
 0x5d7   :  { %v2125_v45 = vld [vmem:[#allocation2 + $0xc0] sm:$0xff]  ;;  %v2127_v56 = vld [vmem:[#allocation2 + $0xd0] sm:$0xff]  ;;  %v2134_v37 = vld [vmem:[#allocation2 + $0x108] sm:$0xff] }
 0x5d8   :  { %2891 = vmatpush1.bf16.msra.mxu1 %v2109_v21  ;;  %3178 = vmatpush1.bf16.msra.mxu0 %v2111_v31  ;;  %v2136_v42 = vld [vmem:[#allocation2 + $0x118] sm:$0xff]  ;;  %v2133_v46 = vld [vmem:[#allocation2 + $0x100] sm:$0xff]  ;;  %v2135_v11 = vld [vmem:[#allocation2 + $0x110] sm:$0xff]  ;;  %p4971_p11 = por %p4970_p10, %p4969_p9 }
 0x5d9   :  { %2892 = vmatprep.subr.bf16.mxu1 %v2118_v27  ;;  %3179 = vmatprep.subr.bf16.mxu0 %v2120_v16  ;;  %v2142_v1 = vld [vmem:[#allocation2 + $0x148] sm:$0xff]  ;;  %v2144_v48 = vld [vmem:[#allocation2 + $0x158] sm:$0xff]  ;;  %v2141_v15 = vld [vmem:[#allocation2 + $0x140] sm:$0xff] }
 0x5da   :  { %v2143_v38 = vld [vmem:[#allocation2 + $0x150] sm:$0xff]  ;;  %v2150_v57 = vld [vmem:[#allocation2 + $0x188] sm:$0xff]  ;;  %v2152_v2 = vld [vmem:[#allocation2 + $0x198] sm:$0xff]  ;;  %p4972_p12 = pnand %p4971_p11, %p4965_p8 }
 0x5db   :  { %v6338_v24 = vld [vmem:[#allocation3] sm:$0xff]  ;;  %v2151_v35 = vld [vmem:[#allocation2 + $0x190] sm:$0xff]  ;;  %v2158_v52 = vld [vmem:[#allocation2 + $0x1c8] sm:$0xff] }
 0x5dc   :  { %2893 = vmatpush1.bf16.msra.mxu1 %v2117_v29  ;;  %3180 = vmatpush1.bf16.msra.mxu0 %v2119_v14  ;;  %v2030_v4 = vrot.slane %v6338_v24, %v2029_v32  ;;  %v2149_v44 = vld [vmem:[#allocation2 + $0x180] sm:$0xff]  ;;  %v2160_v62 = vld [vmem:[#allocation2 + $0x1d8] sm:$0xff]  ;;  %v2159_v51 = vld [vmem:[#allocation2 + $0x1d0] sm:$0xff]  ;;  %v2026_v21 = vrot.slane %v6338_v24, %v2025_v7  ;;  %v2038_v14 = vrot.slane %v6338_v24, %v2037_v20 }
 0x5dd   :  { %2894 = vmatprep.subr.bf16.mxu1 %v2126_v43  ;;  %3181 = vmatprep.subr.bf16.mxu0 %v2128_v28  ;;  %v2157_v40 = vld [vmem:[#allocation2 + $0x1c0] sm:$0xff]  ;;  %v2166_v50 = vld [vmem:[#allocation2 + $0x208] sm:$0xff]  ;;  %v2168_v0 = vld [vmem:[#allocation2 + $0x218] sm:$0xff] }
 0x5de   :  { %v6343_v49 = vpack.c.bf16 %v2030_v4, %v2030_v4  ;;  %v2165_v53 = vld [vmem:[#allocation2 + $0x200] sm:$0xff]  ;;  %v2167_v60 = vld [vmem:[#allocation2 + $0x210] sm:$0xff]  ;;  %v2174_v26 = vld [vmem:[#allocation2 + $0x248] sm:$0xff]  ;;  %v6355_v43 = vpack.c.bf16 %v2026_v21, %v2026_v21 }
 0x5df   :  { %v2176_v58 = vld [vmem:[#allocation2 + $0x258] sm:$0xff]  ;;  %v2173_v23 = vld [vmem:[#allocation2 + $0x240] sm:$0xff]  ;;  %v2175_v34 = vld [vmem:[#allocation2 + $0x250] sm:$0xff] }
 0x5e0   :  { %2895 = vmatpush1.bf16.msra.mxu1 %v2125_v45  ;;  %3182 = vmatpush1.bf16.msra.mxu0 %v2127_v56  ;;  %v2182_v33 = vld [vmem:[#allocation2 + $0x288] sm:$0xff]  ;;  %v2184_v18 = vld [vmem:[#allocation2 + $0x298] sm:$0xff]  ;;  %v2181_v25 = vld [vmem:[#allocation2 + $0x280] sm:$0xff] }
 0x5e1   :  { %2896 = vmatprep.subr.bf16.mxu1 %v2134_v37  ;;  %3183 = vmatprep.subr.bf16.mxu0 %v2136_v42  ;;  %v2183_v9 = vld [vmem:[#allocation2 + $0x290] sm:$0xff]  ;;  %v2190_v54 = vld [vmem:[#allocation2 + $0x2c8] sm:$0xff]  ;;  %v2192_v61 = vld [vmem:[#allocation2 + $0x2d8] sm:$0xff]  ;;  %v6357_v42 = vpack.c.bf16 %v2038_v14, %v2038_v14 }
 0x5e2   :  { %2920 = vmatprep.mubr.bf16.mxu1 %v6343_v49  ;;  %3207 = vmatprep.mubr.bf16.mxu0 %v6343_v49  ;;  %v2189_v59 = vld [vmem:[#allocation2 + $0x2c0] sm:$0xff]  ;;  %v2191_v41 = vld [vmem:[#allocation2 + $0x2d0] sm:$0xff]  ;;  %v2198_v13 = vld [vmem:[#allocation2 + $0x308] sm:$0xff] }
 0x5e3   :  { %v2200_v6 = vld [vmem:[#allocation2 + $0x318] sm:$0xff]  ;;  %v2197_v19 = vld [vmem:[#allocation2 + $0x300] sm:$0xff]  ;;  %v2199_v30 = vld [vmem:[#allocation2 + $0x310] sm:$0xff] }
 0x5e4   :  { %2897 = vmatpush1.bf16.msra.mxu1 %v2133_v46  ;;  %3184 = vmatpush1.bf16.msra.mxu0 %v2135_v11  ;;  %v2206_v8 = vld [vmem:[#allocation2 + $0x348] sm:$0xff]  ;;  %v2208_v36 = vld [vmem:[#allocation2 + $0x358] sm:$0xff]  ;;  %v2205_v22 = vld [vmem:[#allocation2 + $0x340] sm:$0xff] }
 0x5e5   :  { %2898 = vmatprep.subr.bf16.mxu1 %v2142_v1  ;;  %3185 = vmatprep.subr.bf16.mxu0 %v2144_v48  ;;  %v2207_v63 = vld [vmem:[#allocation2 + $0x350] sm:$0xff]  ;;  %v2214_v12 = vld [vmem:[#allocation2 + $0x388] sm:$0xff]  ;;  %v2216_v5 = vld [vmem:[#allocation2 + $0x398] sm:$0xff] }
 0x5e6   :  { %v2213_v3 = vld [vmem:[#allocation2 + $0x380] sm:$0xff]  ;;  %v2215_v17 = vld [vmem:[#allocation2 + $0x390] sm:$0xff]  ;;  %v2222_v39 = vld [vmem:[#allocation2 + $0x3c8] sm:$0xff] }
 0x5e7   :  { %v2224_v47 = vld [vmem:[#allocation2 + $0x3d8] sm:$0xff]  ;;  %v2221_v31 = vld [vmem:[#allocation2 + $0x3c0] sm:$0xff]  ;;  %v2223_v27 = vld [vmem:[#allocation2 + $0x3d0] sm:$0xff] }
 0x5e8   :  { %2899 = vmatpush1.bf16.msra.mxu1 %v2141_v15  ;;  %3186 = vmatpush1.bf16.msra.mxu0 %v2143_v38  ;;  %v2230_v16 = vld [vmem:[#allocation2 + $0x408] sm:$0xff]  ;;  %v2232_v29 = vld [vmem:[#allocation2 + $0x418] sm:$0xff]  ;;  %v2229_v28 = vld [vmem:[#allocation2 + $0x400] sm:$0xff] }
 0x5e9   :  { %2900 = vmatprep.subr.bf16.mxu1 %v2150_v57  ;;  %3187 = vmatprep.subr.bf16.mxu0 %v2152_v2  ;;  %v2231_v45 = vld [vmem:[#allocation2 + $0x410] sm:$0xff]  ;;  %v2238_v56 = vld [vmem:[#allocation2 + $0x448] sm:$0xff]  ;;  %v2240_v37 = vld [vmem:[#allocation2 + $0x458] sm:$0xff] }
 0x5ea   :  { %v2237_v46 = vld [vmem:[#allocation2 + $0x440] sm:$0xff]  ;;  %v2239_v11 = vld [vmem:[#allocation2 + $0x450] sm:$0xff]  ;;  %v2246_v1 = vld [vmem:[#allocation2 + $0x488] sm:$0xff] }
 0x5eb   :  { %v2248_v48 = vld [vmem:[#allocation2 + $0x498] sm:$0xff]  ;;  %v2245_v15 = vld [vmem:[#allocation2 + $0x480] sm:$0xff]  ;;  %v2247_v38 = vld [vmem:[#allocation2 + $0x490] sm:$0xff] }
 0x5ec   :  { %2901 = vmatpush1.bf16.msra.mxu1 %v2149_v44  ;;  %3188 = vmatpush1.bf16.msra.mxu0 %v2151_v35  ;;  %v2254_v57 = vld [vmem:[#allocation2 + $0x4c8] sm:$0xff]  ;;  %v2256_v2 = vld [vmem:[#allocation2 + $0x4d8] sm:$0xff]  ;;  %v2253_v4 = vld [vmem:[#allocation2 + $0x4c0] sm:$0xff] }
 0x5ed   :  { %2902 = vmatprep.subr.bf16.mxu1 %v2158_v52  ;;  %3189 = vmatprep.subr.bf16.mxu0 %v2160_v62  ;;  %v2255_v44 = vld [vmem:[#allocation2 + $0x4d0] sm:$0xff]  ;;  %v2262_v35 = vld [vmem:[#allocation2 + $0x508] sm:$0xff]  ;;  %v2264_v52 = vld [vmem:[#allocation2 + $0x518] sm:$0xff] }
 0x5ee   :  { %v2261_v62 = vld [vmem:[#allocation2 + $0x500] sm:$0xff]  ;;  %v2327_v21 = vld [vmem:[#allocation2 + $0x710] sm:$0xff]  ;;  %v2342_v14 = vld [vmem:[#allocation2 + $0x788] sm:$0xff] }
 0x5ef   :  { %vm6601_vm6 = vmmov %vm6600_vm4 }
 0x5f0   :  { %2903 = vmatpush1.bf16.msra.mxu1 %v2157_v40  ;;  %3190 = vmatpush1.bf16.msra.mxu0 %v2159_v51  ;;  %v2263_v40 = vld [vmem:[#allocation2 + $0x510] sm:$0xff]  ;;  %v2270_v51 = vld [vmem:[#allocation2 + $0x548] sm:$0xff]  ;;  %vm6602_vm7 = vmmov %vm6600_vm4 }
 0x5f1   :  { %2904 = vmatprep.subr.bf16.mxu1 %v2166_v50  ;;  %3191 = vmatprep.subr.bf16.mxu0 %v2168_v0  ;;  %v2272_v50 = vld [vmem:[#allocation2 + $0x558] sm:$0xff]  ;;  %v2269_v0 = vld [vmem:[#allocation2 + $0x540] sm:$0xff]  ;;  %vm6603_vm8 = vmmov %vm6600_vm4 }
 0x5f4   :  { %2905 = vmatpush1.bf16.msra.mxu1 %v2165_v53  ;;  %3192 = vmatpush1.bf16.msra.mxu0 %v2167_v60  ;;  %v2271_v53 = vld [vmem:[#allocation2 + $0x550] sm:$0xff]  ;;  %v2278_v60 = vld [vmem:[#allocation2 + $0x588] sm:$0xff] }
 0x5f5   :  { %2906 = vmatprep.subr.bf16.mxu1 %v2174_v26  ;;  %3193 = vmatprep.subr.bf16.mxu0 %v2176_v58  ;;  %v2280_v26 = vld [vmem:[#allocation2 + $0x598] sm:$0xff]  ;;  %v2277_v58 = vld [vmem:[#allocation2 + $0x580] sm:$0xff] }
 0x5f8   :  { %2907 = vmatpush1.bf16.msra.mxu1 %v2173_v23  ;;  %3194 = vmatpush1.bf16.msra.mxu0 %v2175_v34  ;;  %v2279_v23 = vld [vmem:[#allocation2 + $0x590] sm:$0xff]  ;;  %v2286_v34 = vld [vmem:[#allocation2 + $0x5c8] sm:$0xff] }
 0x5f9   :  { %2908 = vmatprep.subr.bf16.mxu1 %v2182_v33  ;;  %3195 = vmatprep.subr.bf16.mxu0 %v2184_v18  ;;  %v2288_v33 = vld [vmem:[#allocation2 + $0x5d8] sm:$0xff]  ;;  %v2285_v18 = vld [vmem:[#allocation2 + $0x5c0] sm:$0xff] }
 0x5fc   :  { %2909 = vmatpush1.bf16.msra.mxu1 %v2181_v25  ;;  %3196 = vmatpush1.bf16.msra.mxu0 %v2183_v9  ;;  %v2287_v25 = vld [vmem:[#allocation2 + $0x5d0] sm:$0xff]  ;;  %v2294_v9 = vld [vmem:[#allocation2 + $0x608] sm:$0xff] }
 0x5fd   :  { %2910 = vmatprep.subr.bf16.mxu1 %v2190_v54  ;;  %3197 = vmatprep.subr.bf16.mxu0 %v2192_v61  ;;  %v2296_v54 = vld [vmem:[#allocation2 + $0x618] sm:$0xff]  ;;  %v2293_v61 = vld [vmem:[#allocation2 + $0x600] sm:$0xff] }
 0x600   :  { %2911 = vmatpush1.bf16.msra.mxu1 %v2189_v59  ;;  %3198 = vmatpush1.bf16.msra.mxu0 %v2191_v41  ;;  %v2295_v59 = vld [vmem:[#allocation2 + $0x610] sm:$0xff]  ;;  %v2302_v41 = vld [vmem:[#allocation2 + $0x648] sm:$0xff] }
 0x601   :  { %2912 = vmatprep.subr.bf16.mxu1 %v2198_v13  ;;  %3199 = vmatprep.subr.bf16.mxu0 %v2200_v6  ;;  %v2304_v13 = vld [vmem:[#allocation2 + $0x658] sm:$0xff]  ;;  %v2301_v6 = vld [vmem:[#allocation2 + $0x640] sm:$0xff] }
 0x604   :  { %2913 = vmatpush1.bf16.msra.mxu1 %v2197_v19  ;;  %3200 = vmatpush1.bf16.msra.mxu0 %v2199_v30  ;;  %v2303_v19 = vld [vmem:[#allocation2 + $0x650] sm:$0xff]  ;;  %v2310_v30 = vld [vmem:[#allocation2 + $0x688] sm:$0xff] }
 0x605   :  { %2914 = vmatprep.subr.bf16.mxu1 %v2206_v8  ;;  %3201 = vmatprep.subr.bf16.mxu0 %v2208_v36  ;;  %v2312_v8 = vld [vmem:[#allocation2 + $0x698] sm:$0xff]  ;;  %v2309_v36 = vld [vmem:[#allocation2 + $0x680] sm:$0xff] }
 0x608   :  { %2915 = vmatpush1.bf16.msra.mxu1 %v2205_v22  ;;  %3202 = vmatpush1.bf16.msra.mxu0 %v2207_v63  ;;  %v2311_v22 = vld [vmem:[#allocation2 + $0x690] sm:$0xff]  ;;  %v2318_v63 = vld [vmem:[#allocation2 + $0x6c8] sm:$0xff] }
 0x609   :  { %2916 = vmatprep.subr.bf16.mxu1 %v2214_v12  ;;  %3203 = vmatprep.subr.bf16.mxu0 %v2216_v5  ;;  %v2320_v12 = vld [vmem:[#allocation2 + $0x6d8] sm:$0xff]  ;;  %v2317_v5 = vld [vmem:[#allocation2 + $0x6c0] sm:$0xff] }
 0x60c   :  { %2917 = vmatpush1.bf16.msra.mxu1 %v2213_v3  ;;  %3204 = vmatpush1.bf16.msra.mxu0 %v2215_v17  ;;  %v2319_v3 = vld [vmem:[#allocation2 + $0x6d0] sm:$0xff]  ;;  %v2326_v17 = vld [vmem:[#allocation2 + $0x708] sm:$0xff] }
 0x60d   :  { %2918 = vmatprep.subr.bf16.mxu1 %v2222_v39  ;;  %3205 = vmatprep.subr.bf16.mxu0 %v2224_v47  ;;  %v2328_v39 = vld [vmem:[#allocation2 + $0x718] sm:$0xff]  ;;  %v2325_v47 = vld [vmem:[#allocation2 + $0x700] sm:$0xff] }
 0x610   :  { %2919 = vmatpush1.bf16.msra.mxu1 %v2221_v31  ;;  %3206 = vmatpush1.bf16.msra.mxu0 %v2223_v27  ;;  %v2334_v31 = vld [vmem:[#allocation2 + $0x748] sm:$0xff]  ;;  %v2336_v27 = vld [vmem:[#allocation2 + $0x758] sm:$0xff] }
 0x611   :  { %2929 = vmatprep.subr.bf16.mxu1 %v2230_v16  ;;  %3216 = vmatprep.subr.bf16.mxu0 %v2232_v29  ;;  %v2333_v16 = vld [vmem:[#allocation2 + $0x740] sm:$0xff]  ;;  %v2335_v29 = vld [vmem:[#allocation2 + $0x750] sm:$0xff] }
 0x613   :  { %2921 = vmatmul.mubr.bf16.vlgmr.msra.gmra.mrb[32].mxu1 %v6355_v43  ;;  %3208 = vmatmul.mubr.bf16.vlgmr.msra.gmra.mrb[8].mxu0 %v6355_v43 }
 0x614   :  { %2930 = vmatpush1.bf16.msra.mxu1 %v2229_v28  ;;  %3217 = vmatpush1.bf16.msra.mxu0 %v2231_v45  ;;  %v2344_v28 = vld [vmem:[#allocation2 + $0x798] sm:$0xff]  ;;  %v2033_v45 = vsub.s32 2, %v5936_v10 }
 0x615   :  { %2931 = vmatprep.subr.bf16.mxu1 %v2238_v56  ;;  %3218 = vmatprep.subr.bf16.mxu0 %v2240_v37  ;;  %v2341_v56 = vld [vmem:[#allocation2 + $0x780] sm:$0xff]  ;;  %v2343_v37 = vld [vmem:[#allocation2 + $0x790] sm:$0xff] }
 0x616   :  { %2961 = vmatprep.mubr.bf16.mxu1 %v6357_v42  ;;  %3248 = vmatprep.mubr.bf16.mxu0 %v6357_v42 }
 0x618   :  { %2932 = vmatpush1.bf16.msra.mxu1 %v2237_v46  ;;  %3219 = vmatpush1.bf16.msra.mxu0 %v2239_v11  ;;  %v2350_v46 = vld [vmem:[#allocation2 + $0x7c8] sm:$0xff]  ;;  %v2352_v11 = vld [vmem:[#allocation2 + $0x7d8] sm:$0xff] }
 0x619   :  { %2933 = vmatprep.subr.bf16.mxu1 %v2246_v1  ;;  %3220 = vmatprep.subr.bf16.mxu0 %v2248_v48  ;;  %v2045_v1 = vsub.s32 5, %v5936_v10  ;;  %v2034_v48 = vrot.slane %v6338_v24, %v2033_v45 }
 0x61c   :  { %2934 = vmatpush1.bf16.msra.mxu1 %v2245_v15  ;;  %3221 = vmatpush1.bf16.msra.mxu0 %v2247_v38  ;;  %v2349_v15 = vld [vmem:[#allocation2 + $0x7c0] sm:$0xff]  ;;  %v2351_v38 = vld [vmem:[#allocation2 + $0x7d0] sm:$0xff] }
 0x61d   :  { %2935 = vmatprep.subr.bf16.mxu1 %v2254_v57  ;;  %3222 = vmatprep.subr.bf16.mxu0 %v2256_v2  ;;  %v2358_v57 = vld [vmem:[#allocation2 + $0x808] sm:$0xff]  ;;  %v2360_v2 = vld [vmem:[#allocation2 + $0x818] sm:$0xff] }
 0x620   :  { %2936 = vmatpush1.bf16.msra.mxu1 %v2253_v4  ;;  %3223 = vmatpush1.bf16.msra.mxu0 %v2255_v44  ;;  %v2046_v4 = vrot.slane %v6338_v24, %v2045_v1  ;;  %v6369_v44 = vpack.c.bf16 %v2034_v48, %v2034_v48  ;;  %v2447_v1 = vld [vmem:[#allocation2 + $0xad0] sm:$0xff]  ;;  %v2454_v48 = vld [vmem:[#allocation2 + $0xb08] sm:$0xff] }
 0x621   :  { %2937 = vmatprep.subr.bf16.mxu1 %v2262_v35  ;;  %3224 = vmatprep.subr.bf16.mxu0 %v2264_v52  ;;  %v2357_v35 = vld [vmem:[#allocation2 + $0x800] sm:$0xff]  ;;  %v2359_v52 = vld [vmem:[#allocation2 + $0x810] sm:$0xff] }
 0x624   :  { %2938 = vmatpush1.bf16.msra.mxu1 %v2261_v62  ;;  %3225 = vmatpush1.bf16.msra.mxu0 %v2263_v40  ;;  %v2366_v62 = vld [vmem:[#allocation2 + $0x848] sm:$0xff]  ;;  %v2368_v40 = vld [vmem:[#allocation2 + $0x858] sm:$0xff] }
 0x625   :  { %2939 = vmatprep.subr.bf16.mxu1 %v2270_v51  ;;  %3226 = vmatprep.subr.bf16.mxu0 %v2272_v50  ;;  %v6371_v51 = vpack.c.bf16 %v2046_v4, %v2046_v4  ;;  %v2365_v50 = vld [vmem:[#allocation2 + $0x840] sm:$0xff]  ;;  %v2464_v4 = vld [vmem:[#allocation2 + $0xb58] sm:$0xff] }
 0x628   :  { %2940 = vmatpush1.bf16.msra.mxu1 %v2269_v0  ;;  %3227 = vmatpush1.bf16.msra.mxu0 %v2271_v53  ;;  %v2367_v0 = vld [vmem:[#allocation2 + $0x850] sm:$0xff]  ;;  %v2374_v53 = vld [vmem:[#allocation2 + $0x888] sm:$0xff] }
 0x629   :  { %2941 = vmatprep.subr.bf16.mxu1 %v2278_v60  ;;  %3228 = vmatprep.subr.bf16.mxu0 %v2280_v26  ;;  %v2376_v60 = vld [vmem:[#allocation2 + $0x898] sm:$0xff]  ;;  %v2373_v26 = vld [vmem:[#allocation2 + $0x880] sm:$0xff] }
 0x62c   :  { %2942 = vmatpush1.bf16.msra.mxu1 %v2277_v58  ;;  %3229 = vmatpush1.bf16.msra.mxu0 %v2279_v23  ;;  %v2375_v58 = vld [vmem:[#allocation2 + $0x890] sm:$0xff]  ;;  %v2382_v23 = vld [vmem:[#allocation2 + $0x8c8] sm:$0xff] }
 0x62d   :  { %2943 = vmatprep.subr.bf16.mxu1 %v2286_v34  ;;  %3230 = vmatprep.subr.bf16.mxu0 %v2288_v33  ;;  %v2384_v34 = vld [vmem:[#allocation2 + $0x8d8] sm:$0xff]  ;;  %v2381_v33 = vld [vmem:[#allocation2 + $0x8c0] sm:$0xff] }
 0x630   :  { %2944 = vmatpush1.bf16.msra.mxu1 %v2285_v18  ;;  %3231 = vmatpush1.bf16.msra.mxu0 %v2287_v25  ;;  %v2383_v18 = vld [vmem:[#allocation2 + $0x8d0] sm:$0xff]  ;;  %v2390_v25 = vld [vmem:[#allocation2 + $0x908] sm:$0xff] }
 0x631   :  { %2945 = vmatprep.subr.bf16.mxu1 %v2294_v9  ;;  %3232 = vmatprep.subr.bf16.mxu0 %v2296_v54  ;;  %v2392_v9 = vld [vmem:[#allocation2 + $0x918] sm:$0xff]  ;;  %v2389_v54 = vld [vmem:[#allocation2 + $0x900] sm:$0xff] }
 0x634   :  { %2946 = vmatpush1.bf16.msra.mxu1 %v2293_v61  ;;  %3233 = vmatpush1.bf16.msra.mxu0 %v2295_v59  ;;  %v2391_v61 = vld [vmem:[#allocation2 + $0x910] sm:$0xff]  ;;  %v2398_v59 = vld [vmem:[#allocation2 + $0x948] sm:$0xff] }
 0x635   :  { %2947 = vmatprep.subr.bf16.mxu1 %v2302_v41  ;;  %3234 = vmatprep.subr.bf16.mxu0 %v2304_v13  ;;  %v2400_v41 = vld [vmem:[#allocation2 + $0x958] sm:$0xff]  ;;  %v2397_v13 = vld [vmem:[#allocation2 + $0x940] sm:$0xff] }
 0x638   :  { %2948 = vmatpush1.bf16.msra.mxu1 %v2301_v6  ;;  %3235 = vmatpush1.bf16.msra.mxu0 %v2303_v19  ;;  %v2399_v6 = vld [vmem:[#allocation2 + $0x950] sm:$0xff]  ;;  %v2406_v19 = vld [vmem:[#allocation2 + $0x988] sm:$0xff] }
 0x639   :  { %2949 = vmatprep.subr.bf16.mxu1 %v2310_v30  ;;  %3236 = vmatprep.subr.bf16.mxu0 %v2312_v8  ;;  %v2408_v30 = vld [vmem:[#allocation2 + $0x998] sm:$0xff]  ;;  %v2405_v8 = vld [vmem:[#allocation2 + $0x980] sm:$0xff] }
 0x63c   :  { %2950 = vmatpush1.bf16.msra.mxu1 %v2309_v36  ;;  %3237 = vmatpush1.bf16.msra.mxu0 %v2311_v22  ;;  %v2407_v36 = vld [vmem:[#allocation2 + $0x990] sm:$0xff]  ;;  %v2414_v22 = vld [vmem:[#allocation2 + $0x9c8] sm:$0xff] }
 0x63d   :  { %2951 = vmatprep.subr.bf16.mxu1 %v2318_v63  ;;  %3238 = vmatprep.subr.bf16.mxu0 %v2320_v12  ;;  %v2416_v63 = vld [vmem:[#allocation2 + $0x9d8] sm:$0xff]  ;;  %v2413_v12 = vld [vmem:[#allocation2 + $0x9c0] sm:$0xff] }
 0x640   :  { %2952 = vmatpush1.bf16.msra.mxu1 %v2317_v5  ;;  %3239 = vmatpush1.bf16.msra.mxu0 %v2319_v3  ;;  %v2415_v5 = vld [vmem:[#allocation2 + $0x9d0] sm:$0xff]  ;;  %v2422_v3 = vld [vmem:[#allocation2 + $0xa08] sm:$0xff] }
 0x641   :  { %2953 = vmatprep.subr.bf16.mxu1 %v2326_v17  ;;  %3240 = vmatprep.subr.bf16.mxu0 %v2328_v39  ;;  %v2424_v17 = vld [vmem:[#allocation2 + $0xa18] sm:$0xff]  ;;  %v2421_v39 = vld [vmem:[#allocation2 + $0xa00] sm:$0xff] }
 0x644   :  { %2954 = vmatpush1.bf16.msra.mxu1 %v2325_v47  ;;  %3241 = vmatpush1.bf16.msra.mxu0 %v2327_v21  ;;  %v2423_v47 = vld [vmem:[#allocation2 + $0xa10] sm:$0xff]  ;;  %v2430_v21 = vld [vmem:[#allocation2 + $0xa48] sm:$0xff] }
 0x645   :  { %2955 = vmatprep.subr.bf16.mxu1 %v2334_v31  ;;  %3242 = vmatprep.subr.bf16.mxu0 %v2336_v27  ;;  %v2432_v31 = vld [vmem:[#allocation2 + $0xa58] sm:$0xff]  ;;  %v2429_v27 = vld [vmem:[#allocation2 + $0xa40] sm:$0xff] }
 0x648   :  { %2956 = vmatpush1.bf16.msra.mxu1 %v2333_v16  ;;  %3243 = vmatpush1.bf16.msra.mxu0 %v2335_v29  ;;  %v2431_v16 = vld [vmem:[#allocation2 + $0xa50] sm:$0xff]  ;;  %v2438_v29 = vld [vmem:[#allocation2 + $0xa88] sm:$0xff] }
 0x649   :  { %2957 = vmatprep.subr.bf16.mxu1 %v2342_v14  ;;  %3244 = vmatprep.subr.bf16.mxu0 %v2344_v28  ;;  %v2440_v14 = vld [vmem:[#allocation2 + $0xa98] sm:$0xff]  ;;  %v2437_v28 = vld [vmem:[#allocation2 + $0xa80] sm:$0xff] }
 0x64c   :  { %2958 = vmatpush1.bf16.msra.mxu1 %v2341_v56  ;;  %3245 = vmatpush1.bf16.msra.mxu0 %v2343_v37  ;;  %v2439_v56 = vld [vmem:[#allocation2 + $0xa90] sm:$0xff]  ;;  %v2446_v37 = vld [vmem:[#allocation2 + $0xac8] sm:$0xff] }
 0x64d   :  { %2959 = vmatprep.subr.bf16.mxu1 %v2350_v46  ;;  %3246 = vmatprep.subr.bf16.mxu0 %v2352_v11  ;;  %v2448_v46 = vld [vmem:[#allocation2 + $0xad8] sm:$0xff]  ;;  %v2445_v11 = vld [vmem:[#allocation2 + $0xac0] sm:$0xff] }
 0x650   :  { %2960 = vmatpush1.bf16.msra.mxu1 %v2349_v15  ;;  %3247 = vmatpush1.bf16.msra.mxu0 %v2351_v38  ;;  %v2456_v15 = vld [vmem:[#allocation2 + $0xb18] sm:$0xff]  ;;  %v2453_v38 = vld [vmem:[#allocation2 + $0xb00] sm:$0xff] }
 0x651   :  { %2970 = vmatprep.subr.bf16.mxu1 %v2358_v57  ;;  %3257 = vmatprep.subr.bf16.mxu0 %v2360_v2  ;;  %v2455_v57 = vld [vmem:[#allocation2 + $0xb10] sm:$0xff]  ;;  %v2462_v2 = vld [vmem:[#allocation2 + $0xb48] sm:$0xff] }
 0x653   :  { %2962 = vmatmul.mubr.bf16.vlgmr.msra.gmra.mrb[32].mxu1 %v6369_v44  ;;  %3249 = vmatmul.mubr.bf16.vlgmr.msra.gmra.mrb[8].mxu0 %v6369_v44 }
 0x654   :  { %2971 = vmatpush1.bf16.msra.mxu1 %v2357_v35  ;;  %3258 = vmatpush1.bf16.msra.mxu0 %v2359_v52  ;;  %v2461_v35 = vld [vmem:[#allocation2 + $0xb40] sm:$0xff]  ;;  %v2463_v52 = vld [vmem:[#allocation2 + $0xb50] sm:$0xff] }
 0x655   :  { %2972 = vmatprep.subr.bf16.mxu1 %v2366_v62  ;;  %3259 = vmatprep.subr.bf16.mxu0 %v2368_v40  ;;  %v2470_v62 = vld [vmem:[#allocation2 + $0xb88] sm:$0xff]  ;;  %v2472_v40 = vld [vmem:[#allocation2 + $0xb98] sm:$0xff] }
 0x656   :  { %3002 = vmatprep.mubr.bf16.mxu1 %v6371_v51  ;;  %3289 = vmatprep.mubr.bf16.mxu0 %v6371_v51 }
 0x658   :  { %2973 = vmatpush1.bf16.msra.mxu1 %v2365_v50  ;;  %3260 = vmatpush1.bf16.msra.mxu0 %v2367_v0  ;;  %v2041_v50 = vsub.s32 4, %v5936_v10  ;;  %v2469_v0 = vld [vmem:[#allocation2 + $0xb80] sm:$0xff] }
 0x659   :  { %2974 = vmatprep.subr.bf16.mxu1 %v2374_v53  ;;  %3261 = vmatprep.subr.bf16.mxu0 %v2376_v60  ;;  %v2471_v53 = vld [vmem:[#allocation2 + $0xb90] sm:$0xff]  ;;  %v2478_v60 = vld [vmem:[#allocation2 + $0xbc8] sm:$0xff] }
 0x65c   :  { %2975 = vmatpush1.bf16.msra.mxu1 %v2373_v26  ;;  %3262 = vmatpush1.bf16.msra.mxu0 %v2375_v58  ;;  %v2480_v26 = vld [vmem:[#allocation2 + $0xbd8] sm:$0xff]  ;;  %v2053_v58 = vsub.s32 7, %v5936_v10 }
 0x65d   :  { %2976 = vmatprep.subr.bf16.mxu1 %v2382_v23  ;;  %3263 = vmatprep.subr.bf16.mxu0 %v2384_v34  ;;  %v2042_v23 = vrot.slane %v6338_v24, %v2041_v50  ;;  %v2477_v34 = vld [vmem:[#allocation2 + $0xbc0] sm:$0xff] }
 0x660   :  { %2977 = vmatpush1.bf16.msra.mxu1 %v2381_v33  ;;  %3264 = vmatpush1.bf16.msra.mxu0 %v2383_v18  ;;  %v2479_v33 = vld [vmem:[#allocation2 + $0xbd0] sm:$0xff]  ;;  %v2486_v18 = vld [vmem:[#allocation2 + $0xc08] sm:$0xff] }
 0x661   :  { %2978 = vmatprep.subr.bf16.mxu1 %v2390_v25  ;;  %3265 = vmatprep.subr.bf16.mxu0 %v2392_v9  ;;  %v2488_v25 = vld [vmem:[#allocation2 + $0xc18] sm:$0xff]  ;;  %v2054_v9 = vrot.slane %v6338_v24, %v2053_v58  ;;  %v2574_v58 = vld [vmem:[#allocation2 + $0xec8] sm:$0xff] }
 0x664   :  { %2979 = vmatpush1.bf16.msra.mxu1 %v2389_v54  ;;  %3266 = vmatpush1.bf16.msra.mxu0 %v2391_v61  ;;  %v6383_v54 = vpack.c.bf16 %v2042_v23, %v2042_v23  ;;  %v2485_v61 = vld [vmem:[#allocation2 + $0xc00] sm:$0xff]  ;;  %v2576_v23 = vld [vmem:[#allocation2 + $0xed8] sm:$0xff] }
 0x665   :  { %2980 = vmatprep.subr.bf16.mxu1 %v2398_v59  ;;  %3267 = vmatprep.subr.bf16.mxu0 %v2400_v41  ;;  %v2487_v59 = vld [vmem:[#allocation2 + $0xc10] sm:$0xff]  ;;  %v2494_v41 = vld [vmem:[#allocation2 + $0xc48] sm:$0xff] }
 0x668   :  { %2981 = vmatpush1.bf16.msra.mxu1 %v2397_v13  ;;  %3268 = vmatpush1.bf16.msra.mxu0 %v2399_v6  ;;  %v2496_v13 = vld [vmem:[#allocation2 + $0xc58] sm:$0xff]  ;;  %v6385_v6 = vpack.c.bf16 %v2054_v9, %v2054_v9  ;;  %v2581_v9 = vld [vmem:[#allocation2 + $0xf00] sm:$0xff] }
 0x669   :  { %2982 = vmatprep.subr.bf16.mxu1 %v2406_v19  ;;  %3269 = vmatprep.subr.bf16.mxu0 %v2408_v30  ;;  %v2493_v19 = vld [vmem:[#allocation2 + $0xc40] sm:$0xff]  ;;  %v2495_v30 = vld [vmem:[#allocation2 + $0xc50] sm:$0xff] }
 0x66c   :  { %2983 = vmatpush1.bf16.msra.mxu1 %v2405_v8  ;;  %3270 = vmatpush1.bf16.msra.mxu0 %v2407_v36  ;;  %v2502_v8 = vld [vmem:[#allocation2 + $0xc88] sm:$0xff]  ;;  %v2504_v36 = vld [vmem:[#allocation2 + $0xc98] sm:$0xff] }
 0x66d   :  { %2984 = vmatprep.subr.bf16.mxu1 %v2414_v22  ;;  %3271 = vmatprep.subr.bf16.mxu0 %v2416_v63  ;;  %v2501_v22 = vld [vmem:[#allocation2 + $0xc80] sm:$0xff]  ;;  %v2503_v63 = vld [vmem:[#allocation2 + $0xc90] sm:$0xff] }
 0x670   :  { %2985 = vmatpush1.bf16.msra.mxu1 %v2413_v12  ;;  %3272 = vmatpush1.bf16.msra.mxu0 %v2415_v5  ;;  %v2510_v12 = vld [vmem:[#allocation2 + $0xcc8] sm:$0xff]  ;;  %v2512_v5 = vld [vmem:[#allocation2 + $0xcd8] sm:$0xff] }
 0x671   :  { %2986 = vmatprep.subr.bf16.mxu1 %v2422_v3  ;;  %3273 = vmatprep.subr.bf16.mxu0 %v2424_v17  ;;  %v2509_v3 = vld [vmem:[#allocation2 + $0xcc0] sm:$0xff]  ;;  %v2511_v17 = vld [vmem:[#allocation2 + $0xcd0] sm:$0xff] }
 0x674   :  { %2987 = vmatpush1.bf16.msra.mxu1 %v2421_v39  ;;  %3274 = vmatpush1.bf16.msra.mxu0 %v2423_v47  ;;  %v2518_v39 = vld [vmem:[#allocation2 + $0xd08] sm:$0xff]  ;;  %v2520_v47 = vld [vmem:[#allocation2 + $0xd18] sm:$0xff] }
 0x675   :  { %2988 = vmatprep.subr.bf16.mxu1 %v2430_v21  ;;  %3275 = vmatprep.subr.bf16.mxu0 %v2432_v31  ;;  %v2517_v21 = vld [vmem:[#allocation2 + $0xd00] sm:$0xff]  ;;  %v2519_v31 = vld [vmem:[#allocation2 + $0xd10] sm:$0xff] }
 0x678   :  { %2989 = vmatpush1.bf16.msra.mxu1 %v2429_v27  ;;  %3276 = vmatpush1.bf16.msra.mxu0 %v2431_v16  ;;  %v2526_v27 = vld [vmem:[#allocation2 + $0xd48] sm:$0xff]  ;;  %v2528_v16 = vld [vmem:[#allocation2 + $0xd58] sm:$0xff] }
 0x679   :  { %2990 = vmatprep.subr.bf16.mxu1 %v2438_v29  ;;  %3277 = vmatprep.subr.bf16.mxu0 %v2440_v14  ;;  %v2525_v29 = vld [vmem:[#allocation2 + $0xd40] sm:$0xff]  ;;  %v2527_v14 = vld [vmem:[#allocation2 + $0xd50] sm:$0xff] }
 0x67c   :  { %2991 = vmatpush1.bf16.msra.mxu1 %v2437_v28  ;;  %3278 = vmatpush1.bf16.msra.mxu0 %v2439_v56  ;;  %v2534_v28 = vld [vmem:[#allocation2 + $0xd88] sm:$0xff]  ;;  %v2536_v56 = vld [vmem:[#allocation2 + $0xd98] sm:$0xff] }
 0x67d   :  { %2992 = vmatprep.subr.bf16.mxu1 %v2446_v37  ;;  %3279 = vmatprep.subr.bf16.mxu0 %v2448_v46  ;;  %v2533_v37 = vld [vmem:[#allocation2 + $0xd80] sm:$0xff]  ;;  %v2535_v46 = vld [vmem:[#allocation2 + $0xd90] sm:$0xff] }
 0x680   :  { %2993 = vmatpush1.bf16.msra.mxu1 %v2445_v11  ;;  %3280 = vmatpush1.bf16.msra.mxu0 %v2447_v1  ;;  %v2542_v11 = vld [vmem:[#allocation2 + $0xdc8] sm:$0xff]  ;;  %v2544_v1 = vld [vmem:[#allocation2 + $0xdd8] sm:$0xff] }
 0x681   :  { %2994 = vmatprep.subr.bf16.mxu1 %v2454_v48  ;;  %3281 = vmatprep.subr.bf16.mxu0 %v2456_v15  ;;  %v2541_v48 = vld [vmem:[#allocation2 + $0xdc0] sm:$0xff]  ;;  %v2543_v15 = vld [vmem:[#allocation2 + $0xdd0] sm:$0xff] }
 0x684   :  { %2995 = vmatpush1.bf16.msra.mxu1 %v2453_v38  ;;  %3282 = vmatpush1.bf16.msra.mxu0 %v2455_v57  ;;  %v2550_v38 = vld [vmem:[#allocation2 + $0xe08] sm:$0xff]  ;;  %v2552_v57 = vld [vmem:[#allocation2 + $0xe18] sm:$0xff] }
 0x685   :  { %2996 = vmatprep.subr.bf16.mxu1 %v2462_v2  ;;  %3283 = vmatprep.subr.bf16.mxu0 %v2464_v4  ;;  %v2549_v2 = vld [vmem:[#allocation2 + $0xe00] sm:$0xff]  ;;  %v2551_v4 = vld [vmem:[#allocation2 + $0xe10] sm:$0xff] }
 0x688   :  { %2997 = vmatpush1.bf16.msra.mxu1 %v2461_v35  ;;  %3284 = vmatpush1.bf16.msra.mxu0 %v2463_v52  ;;  %v2558_v35 = vld [vmem:[#allocation2 + $0xe48] sm:$0xff]  ;;  %v2560_v52 = vld [vmem:[#allocation2 + $0xe58] sm:$0xff] }
 0x689   :  { %2998 = vmatprep.subr.bf16.mxu1 %v2470_v62  ;;  %3285 = vmatprep.subr.bf16.mxu0 %v2472_v40  ;;  %v2557_v62 = vld [vmem:[#allocation2 + $0xe40] sm:$0xff]  ;;  %v2559_v40 = vld [vmem:[#allocation2 + $0xe50] sm:$0xff] }
 0x68c   :  { %2999 = vmatpush1.bf16.msra.mxu1 %v2469_v0  ;;  %3286 = vmatpush1.bf16.msra.mxu0 %v2471_v53  ;;  %v2566_v0 = vld [vmem:[#allocation2 + $0xe88] sm:$0xff]  ;;  %v2568_v53 = vld [vmem:[#allocation2 + $0xe98] sm:$0xff] }
 0x68d   :  { %3000 = vmatprep.subr.bf16.mxu1 %v2478_v60  ;;  %3287 = vmatprep.subr.bf16.mxu0 %v2480_v26  ;;  %v2565_v60 = vld [vmem:[#allocation2 + $0xe80] sm:$0xff]  ;;  %v2567_v26 = vld [vmem:[#allocation2 + $0xe90] sm:$0xff] }
 0x690   :  { %3001 = vmatpush1.bf16.msra.mxu1 %v2477_v34  ;;  %3288 = vmatpush1.bf16.msra.mxu0 %v2479_v33  ;;  %v2573_v34 = vld [vmem:[#allocation2 + $0xec0] sm:$0xff]  ;;  %v2575_v33 = vld [vmem:[#allocation2 + $0xed0] sm:$0xff] }
 0x691   :  { %3011 = vmatprep.subr.bf16.mxu1 %v2486_v18  ;;  %3298 = vmatprep.subr.bf16.mxu0 %v2488_v25  ;;  %v2582_v18 = vld [vmem:[#allocation2 + $0xf08] sm:$0xff]  ;;  %v2584_v25 = vld [vmem:[#allocation2 + $0xf18] sm:$0xff] }
 0x693   :  { %3003 = vmatmul.mubr.bf16.vlgmr.msra.gmra.mrb[32].mxu1 %v6383_v54  ;;  %3290 = vmatmul.mubr.bf16.vlgmr.msra.gmra.mrb[8].mxu0 %v6383_v54 }
 0x694   :  { %3012 = vmatpush1.bf16.msra.mxu1 %v2485_v61  ;;  %3299 = vmatpush1.bf16.msra.mxu0 %v2487_v59  ;;  %v2583_v61 = vld [vmem:[#allocation2 + $0xf10] sm:$0xff]  ;;  %v2590_v59 = vld [vmem:[#allocation2 + $0xf48] sm:$0xff] }
 0x695   :  { %3013 = vmatprep.subr.bf16.mxu1 %v2494_v41  ;;  %3300 = vmatprep.subr.bf16.mxu0 %v2496_v13  ;;  %v2592_v41 = vld [vmem:[#allocation2 + $0xf58] sm:$0xff]  ;;  %v2589_v13 = vld [vmem:[#allocation2 + $0xf40] sm:$0xff] }
 0x696   :  { %3043 = vmatprep.mubr.bf16.mxu1 %v6385_v6  ;;  %3330 = vmatprep.mubr.bf16.mxu0 %v6385_v6 }
 0x698   :  { %3014 = vmatpush1.bf16.msra.mxu1 %v2493_v19  ;;  %3301 = vmatpush1.bf16.msra.mxu0 %v2495_v30  ;;  %v2591_v19 = vld [vmem:[#allocation2 + $0xf50] sm:$0xff]  ;;  %v2598_v30 = vld [vmem:[#allocation2 + $0xf88] sm:$0xff] }
 0x699   :  { %3015 = vmatprep.subr.bf16.mxu1 %v2502_v8  ;;  %3302 = vmatprep.subr.bf16.mxu0 %v2504_v36  ;;  %v2600_v8 = vld [vmem:[#allocation2 + $0xf98] sm:$0xff]  ;;  %v2049_v36 = vsub.s32 6, %v5936_v10  ;;  %v2113_v10 = vld [vmem:[#allocation2 + $0x60] sm:$0xff] }
 0x69c   :  { %3016 = vmatpush1.bf16.msra.mxu1 %v2501_v22  ;;  %3303 = vmatpush1.bf16.msra.mxu0 %v2503_v63  ;;  %v2597_v22 = vld [vmem:[#allocation2 + $0xf80] sm:$0xff]  ;;  %v2599_v63 = vld [vmem:[#allocation2 + $0xf90] sm:$0xff] }
 0x69d   :  { %3017 = vmatprep.subr.bf16.mxu1 %v2510_v12  ;;  %3304 = vmatprep.subr.bf16.mxu0 %v2512_v5  ;;  %v2606_v12 = vld [vmem:[#allocation2 + $0xfc8] sm:$0xff]  ;;  %v2608_v5 = vld [vmem:[#allocation2 + $0xfd8] sm:$0xff] }
 0x6a0   :  { %3018 = vmatpush1.bf16.msra.mxu1 %v2509_v3  ;;  %3305 = vmatpush1.bf16.msra.mxu0 %v2511_v17  ;;  %v2050_v3 = vrot.slane %v6338_v24, %v2049_v36  ;;  %v6393_v17 = vld [vmem:[#allocation3 + $0x8] sm:$0x1f]  ;;  %v2613_v24 = vld [vmem:[#allocation2 + $0x1000] sm:$0xff]  ;;  %v2687_v36 = vld [vmem:[#allocation2 + $0x1250] sm:$0xff] }
 0x6a1   :  { %3019 = vmatprep.subr.bf16.mxu1 %v2518_v39  ;;  %3306 = vmatprep.subr.bf16.mxu0 %v2520_v47  ;;  %v2605_v39 = vld [vmem:[#allocation2 + $0xfc0] sm:$0xff]  ;;  %v2607_v47 = vld [vmem:[#allocation2 + $0xfd0] sm:$0xff] }
 0x6a4   :  { %3020 = vmatpush1.bf16.msra.mxu1 %v2517_v21  ;;  %3307 = vmatpush1.bf16.msra.mxu0 %v2519_v31  ;;  %v2614_v21 = vld [vmem:[#allocation2 + $0x1008] sm:$0xff]  ;;  %v2616_v31 = vld [vmem:[#allocation2 + $0x1018] sm:$0xff] }
 0x6a5   :  { %3021 = vmatprep.subr.bf16.mxu1 %v2526_v27  ;;  %3308 = vmatprep.subr.bf16.mxu0 %v2528_v16  ;;  %v2062_v27 = vrot.slane %v6393_v17, %v2029_v32  ;;  %v6398_v16 = vpack.c.bf16 %v2050_v3, %v2050_v3  ;;  %v2621_v32 = vld [vmem:[#allocation2 + $0x1040] sm:$0xff]  ;;  %v2702_v3 = vld [vmem:[#allocation2 + $0x12c8] sm:$0xff] }
 0x6a8   :  { %3022 = vmatpush1.bf16.msra.mxu1 %v2525_v29  ;;  %3309 = vmatpush1.bf16.msra.mxu0 %v2527_v14  ;;  %v2615_v29 = vld [vmem:[#allocation2 + $0x1010] sm:$0xff]  ;;  %v2622_v14 = vld [vmem:[#allocation2 + $0x1048] sm:$0xff] }
 0x6a9   :  { %3023 = vmatprep.subr.bf16.mxu1 %v2534_v28  ;;  %3310 = vmatprep.subr.bf16.mxu0 %v2536_v56  ;;  %v2624_v28 = vld [vmem:[#allocation2 + $0x1058] sm:$0xff]  ;;  %v6400_v56 = vpack.c.bf16 %v2062_v27, %v2062_v27 }
 0x6aa   :  { %v2712_v27 = vld [vmem:[#allocation2 + $0x1318] sm:$0xff] }
 0x6ac   :  { %3024 = vmatpush1.bf16.msra.mxu1 %v2533_v37  ;;  %3311 = vmatpush1.bf16.msra.mxu0 %v2535_v46  ;;  %v2623_v37 = vld [vmem:[#allocation2 + $0x1050] sm:$0xff]  ;;  %v2630_v46 = vld [vmem:[#allocation2 + $0x1088] sm:$0xff] }
 0x6ad   :  { %3025 = vmatprep.subr.bf16.mxu1 %v2542_v11  ;;  %3312 = vmatprep.subr.bf16.mxu0 %v2544_v1  ;;  %v2632_v11 = vld [vmem:[#allocation2 + $0x1098] sm:$0xff]  ;;  %v2629_v1 = vld [vmem:[#allocation2 + $0x1080] sm:$0xff] }
 0x6b0   :  { %3026 = vmatpush1.bf16.msra.mxu1 %v2541_v48  ;;  %3313 = vmatpush1.bf16.msra.mxu0 %v2543_v15  ;;  %v2631_v48 = vld [vmem:[#allocation2 + $0x1090] sm:$0xff]  ;;  %v2638_v15 = vld [vmem:[#allocation2 + $0x10c8] sm:$0xff] }
 0x6b1   :  { %3027 = vmatprep.subr.bf16.mxu1 %v2550_v38  ;;  %3314 = vmatprep.subr.bf16.mxu0 %v2552_v57  ;;  %v2640_v38 = vld [vmem:[#allocation2 + $0x10d8] sm:$0xff]  ;;  %v2637_v57 = vld [vmem:[#allocation2 + $0x10c0] sm:$0xff] }
 0x6b4   :  { %3028 = vmatpush1.bf16.msra.mxu1 %v2549_v2  ;;  %3315 = vmatpush1.bf16.msra.mxu0 %v2551_v4  ;;  %v2639_v2 = vld [vmem:[#allocation2 + $0x10d0] sm:$0xff]  ;;  %v2646_v4 = vld [vmem:[#allocation2 + $0x1108] sm:$0xff] }
 0x6b5   :  { %3029 = vmatprep.subr.bf16.mxu1 %v2558_v35  ;;  %3316 = vmatprep.subr.bf16.mxu0 %v2560_v52  ;;  %v2648_v35 = vld [vmem:[#allocation2 + $0x1118] sm:$0xff]  ;;  %v2645_v52 = vld [vmem:[#allocation2 + $0x1100] sm:$0xff] }
 0x6b8   :  { %3030 = vmatpush1.bf16.msra.mxu1 %v2557_v62  ;;  %3317 = vmatpush1.bf16.msra.mxu0 %v2559_v40  ;;  %v2647_v62 = vld [vmem:[#allocation2 + $0x1110] sm:$0xff]  ;;  %v2654_v40 = vld [vmem:[#allocation2 + $0x1148] sm:$0xff] }
 0x6b9   :  { %3031 = vmatprep.subr.bf16.mxu1 %v2566_v0  ;;  %3318 = vmatprep.subr.bf16.mxu0 %v2568_v53  ;;  %v2656_v0 = vld [vmem:[#allocation2 + $0x1158] sm:$0xff]  ;;  %v2653_v53 = vld [vmem:[#allocation2 + $0x1140] sm:$0xff] }
 0x6bc   :  { %3032 = vmatpush1.bf16.msra.mxu1 %v2565_v60  ;;  %3319 = vmatpush1.bf16.msra.mxu0 %v2567_v26  ;;  %v2655_v60 = vld [vmem:[#allocation2 + $0x1150] sm:$0xff]  ;;  %v2662_v26 = vld [vmem:[#allocation2 + $0x1188] sm:$0xff] }
 0x6bd   :  { %3033 = vmatprep.subr.bf16.mxu1 %v2574_v58  ;;  %3320 = vmatprep.subr.bf16.mxu0 %v2576_v23  ;;  %v2664_v58 = vld [vmem:[#allocation2 + $0x1198] sm:$0xff]  ;;  %v2661_v23 = vld [vmem:[#allocation2 + $0x1180] sm:$0xff] }
 0x6c0   :  { %3034 = vmatpush1.bf16.msra.mxu1 %v2573_v34  ;;  %3321 = vmatpush1.bf16.msra.mxu0 %v2575_v33  ;;  %v2663_v34 = vld [vmem:[#allocation2 + $0x1190] sm:$0xff]  ;;  %v2670_v33 = vld [vmem:[#allocation2 + $0x11c8] sm:$0xff] }
 0x6c1   :  { %3035 = vmatprep.subr.bf16.mxu1 %v2582_v18  ;;  %3322 = vmatprep.subr.bf16.mxu0 %v2584_v25  ;;  %v2672_v18 = vld [vmem:[#allocation2 + $0x11d8] sm:$0xff]  ;;  %v2669_v25 = vld [vmem:[#allocation2 + $0x11c0] sm:$0xff] }
 0x6c4   :  { %3036 = vmatpush1.bf16.msra.mxu1 %v2581_v9  ;;  %3323 = vmatpush1.bf16.msra.mxu0 %v2583_v61  ;;  %v2671_v9 = vld [vmem:[#allocation2 + $0x11d0] sm:$0xff]  ;;  %v2678_v61 = vld [vmem:[#allocation2 + $0x1208] sm:$0xff] }
 0x6c5   :  { %3037 = vmatprep.subr.bf16.mxu1 %v2590_v59  ;;  %3324 = vmatprep.subr.bf16.mxu0 %v2592_v41  ;;  %v2680_v59 = vld [vmem:[#allocation2 + $0x1218] sm:$0xff]  ;;  %v2677_v41 = vld [vmem:[#allocation2 + $0x1200] sm:$0xff] }
 0x6c8   :  { %3038 = vmatpush1.bf16.msra.mxu1 %v2589_v13  ;;  %3325 = vmatpush1.bf16.msra.mxu0 %v2591_v19  ;;  %v2679_v13 = vld [vmem:[#allocation2 + $0x1210] sm:$0xff]  ;;  %v2686_v19 = vld [vmem:[#allocation2 + $0x1248] sm:$0xff] }
 0x6c9   :  { %3039 = vmatprep.subr.bf16.mxu1 %v2598_v30  ;;  %3326 = vmatprep.subr.bf16.mxu0 %v2600_v8  ;;  %v2688_v30 = vld [vmem:[#allocation2 + $0x1258] sm:$0xff]  ;;  %v2685_v8 = vld [vmem:[#allocation2 + $0x1240] sm:$0xff] }
 0x6cc   :  { %3040 = vmatpush1.bf16.msra.mxu1 %v2597_v22  ;;  %3327 = vmatpush1.bf16.msra.mxu0 %v2599_v63  ;;  %v2694_v22 = vld [vmem:[#allocation2 + $0x1288] sm:$0xff]  ;;  %v2696_v63 = vld [vmem:[#allocation2 + $0x1298] sm:$0xff] }
 0x6cd   :  { %3041 = vmatprep.subr.bf16.mxu1 %v2606_v12  ;;  %3328 = vmatprep.subr.bf16.mxu0 %v2608_v5  ;;  %v2693_v12 = vld [vmem:[#allocation2 + $0x1280] sm:$0xff]  ;;  %v2695_v5 = vld [vmem:[#allocation2 + $0x1290] sm:$0xff] }
 0x6d0   :  { %3042 = vmatpush1.bf16.msra.mxu1 %v2605_v39  ;;  %3329 = vmatpush1.bf16.msra.mxu0 %v2607_v47  ;;  %v2704_v39 = vld [vmem:[#allocation2 + $0x12d8] sm:$0xff]  ;;  %v2701_v47 = vld [vmem:[#allocation2 + $0x12c0] sm:$0xff] }
 0x6d1   :  { %3052 = vmatprep.subr.bf16.mxu1 %v2614_v21  ;;  %3339 = vmatprep.subr.bf16.mxu0 %v2616_v31  ;;  %v2703_v21 = vld [vmem:[#allocation2 + $0x12d0] sm:$0xff]  ;;  %v2710_v31 = vld [vmem:[#allocation2 + $0x1308] sm:$0xff] }
 0x6d3   :  { %3044 = vmatmul.mubr.bf16.vlgmr.msra.gmra.mrb[32].mxu1 %v6398_v16  ;;  %3331 = vmatmul.mubr.bf16.vlgmr.msra.gmra.mrb[8].mxu0 %v6398_v16 }
 0x6d4   :  { %3053 = vmatpush1.bf16.msra.mxu1 %v2613_v24  ;;  %3340 = vmatpush1.bf16.msra.mxu0 %v2615_v29  ;;  %v2709_v24 = vld [vmem:[#allocation2 + $0x1300] sm:$0xff]  ;;  %v2711_v29 = vld [vmem:[#allocation2 + $0x1310] sm:$0xff] }
 0x6d5   :  { %3054 = vmatprep.subr.bf16.mxu1 %v2622_v14  ;;  %3341 = vmatprep.subr.bf16.mxu0 %v2624_v28  ;;  %v2718_v14 = vld [vmem:[#allocation2 + $0x1348] sm:$0xff]  ;;  %v2720_v28 = vld [vmem:[#allocation2 + $0x1358] sm:$0xff] }
 0x6d6   :  { %3084 = vmatprep.mubr.bf16.mxu1 %v6400_v56  ;;  %3371 = vmatprep.mubr.bf16.mxu0 %v6400_v56 }
 0x6d8   :  { %3055 = vmatpush1.bf16.msra.mxu1 %v2621_v32  ;;  %3342 = vmatpush1.bf16.msra.mxu0 %v2623_v37  ;;  %v2717_v32 = vld [vmem:[#allocation2 + $0x1340] sm:$0xff]  ;;  %v2719_v37 = vld [vmem:[#allocation2 + $0x1350] sm:$0xff] }
 0x6d9   :  { %3056 = vmatprep.subr.bf16.mxu1 %v2630_v46  ;;  %3343 = vmatprep.subr.bf16.mxu0 %v2632_v11  ;;  %v2726_v46 = vld [vmem:[#allocation2 + $0x1388] sm:$0xff]  ;;  %v2728_v11 = vld [vmem:[#allocation2 + $0x1398] sm:$0xff] }
 0x6dc   :  { %3057 = vmatpush1.bf16.msra.mxu1 %v2629_v1  ;;  %3344 = vmatpush1.bf16.msra.mxu0 %v2631_v48  ;;  %v2725_v1 = vld [vmem:[#allocation2 + $0x1380] sm:$0xff]  ;;  %v2727_v48 = vld [vmem:[#allocation2 + $0x1390] sm:$0xff] }
 0x6dd   :  { %3058 = vmatprep.subr.bf16.mxu1 %v2638_v15  ;;  %3345 = vmatprep.subr.bf16.mxu0 %v2640_v38  ;;  %v2734_v15 = vld [vmem:[#allocation2 + $0x13c8] sm:$0xff]  ;;  %v2736_v38 = vld [vmem:[#allocation2 + $0x13d8] sm:$0xff] }
 0x6e0   :  { %3059 = vmatpush1.bf16.msra.mxu1 %v2637_v57  ;;  %3346 = vmatpush1.bf16.msra.mxu0 %v2639_v2  ;;  %v2058_v57 = vrot.slane %v6393_v17, %v2025_v7  ;;  %v2733_v2 = vld [vmem:[#allocation2 + $0x13c0] sm:$0xff]  ;;  %v2743_v7 = vld [vmem:[#allocation2 + $0x1410] sm:$0xff] }
 0x6e1   :  { %3060 = vmatprep.subr.bf16.mxu1 %v2646_v4  ;;  %3347 = vmatprep.subr.bf16.mxu0 %v2648_v35  ;;  %v2735_v4 = vld [vmem:[#allocation2 + $0x13d0] sm:$0xff]  ;;  %v2742_v35 = vld [vmem:[#allocation2 + $0x1408] sm:$0xff] }
 0x6e4   :  { %3061 = vmatpush1.bf16.msra.mxu1 %v2645_v52  ;;  %3348 = vmatpush1.bf16.msra.mxu0 %v2647_v62  ;;  %v2744_v52 = vld [vmem:[#allocation2 + $0x1418] sm:$0xff]  ;;  %v2070_v62 = vrot.slane %v6393_v17, %v2037_v20  ;;  %v2749_v20 = vld [vmem:[#allocation2 + $0x1440] sm:$0xff] }
 0x6e5   :  { %3062 = vmatprep.subr.bf16.mxu1 %v2654_v40  ;;  %3349 = vmatprep.subr.bf16.mxu0 %v2656_v0  ;;  %v6412_v40 = vpack.c.bf16 %v2058_v57, %v2058_v57  ;;  %v2741_v0 = vld [vmem:[#allocation2 + $0x1400] sm:$0xff]  ;;  %v2830_v57 = vld [vmem:[#allocation2 + $0x16c8] sm:$0xff] }
 0x6e8   :  { %3063 = vmatpush1.bf16.msra.mxu1 %v2653_v53  ;;  %3350 = vmatpush1.bf16.msra.mxu0 %v2655_v60  ;;  %v2750_v53 = vld [vmem:[#allocation2 + $0x1448] sm:$0xff]  ;;  %v2752_v60 = vld [vmem:[#allocation2 + $0x1458] sm:$0xff] }
 0x6e9   :  { %3064 = vmatprep.subr.bf16.mxu1 %v2662_v26  ;;  %3351 = vmatprep.subr.bf16.mxu0 %v2664_v58  ;;  %v6414_v26 = vpack.c.bf16 %v2070_v62, %v2070_v62  ;;  %v2751_v58 = vld [vmem:[#allocation2 + $0x1450] sm:$0xff]  ;;  %v2840_v62 = vld [vmem:[#allocation2 + $0x1718] sm:$0xff] }
 0x6ec   :  { %3065 = vmatpush1.bf16.msra.mxu1 %v2661_v23  ;;  %3352 = vmatpush1.bf16.msra.mxu0 %v2663_v34  ;;  %v2758_v23 = vld [vmem:[#allocation2 + $0x1488] sm:$0xff]  ;;  %v2760_v34 = vld [vmem:[#allocation2 + $0x1498] sm:$0xff] }
 0x6ed   :  { %3066 = vmatprep.subr.bf16.mxu1 %v2670_v33  ;;  %3353 = vmatprep.subr.bf16.mxu0 %v2672_v18  ;;  %v2757_v33 = vld [vmem:[#allocation2 + $0x1480] sm:$0xff]  ;;  %v2759_v18 = vld [vmem:[#allocation2 + $0x1490] sm:$0xff] }
 0x6f0   :  { %3067 = vmatpush1.bf16.msra.mxu1 %v2669_v25  ;;  %3354 = vmatpush1.bf16.msra.mxu0 %v2671_v9  ;;  %v2766_v25 = vld [vmem:[#allocation2 + $0x14c8] sm:$0xff]  ;;  %v2768_v9 = vld [vmem:[#allocation2 + $0x14d8] sm:$0xff] }
 0x6f1   :  { %3068 = vmatprep.subr.bf16.mxu1 %v2678_v61  ;;  %3355 = vmatprep.subr.bf16.mxu0 %v2680_v59  ;;  %v2765_v61 = vld [vmem:[#allocation2 + $0x14c0] sm:$0xff]  ;;  %v2767_v59 = vld [vmem:[#allocation2 + $0x14d0] sm:$0xff] }
 0x6f4   :  { %3069 = vmatpush1.bf16.msra.mxu1 %v2677_v41  ;;  %3356 = vmatpush1.bf16.msra.mxu0 %v2679_v13  ;;  %v2774_v41 = vld [vmem:[#allocation2 + $0x1508] sm:$0xff]  ;;  %v2776_v13 = vld [vmem:[#allocation2 + $0x1518] sm:$0xff] }
 0x6f5   :  { %3070 = vmatprep.subr.bf16.mxu1 %v2686_v19  ;;  %3357 = vmatprep.subr.bf16.mxu0 %v2688_v30  ;;  %v2773_v19 = vld [vmem:[#allocation2 + $0x1500] sm:$0xff]  ;;  %v2775_v30 = vld [vmem:[#allocation2 + $0x1510] sm:$0xff] }
 0x6f8   :  { %3071 = vmatpush1.bf16.msra.mxu1 %v2685_v8  ;;  %3358 = vmatpush1.bf16.msra.mxu0 %v2687_v36  ;;  %v2782_v8 = vld [vmem:[#allocation2 + $0x1548] sm:$0xff]  ;;  %v2784_v36 = vld [vmem:[#allocation2 + $0x1558] sm:$0xff] }
 0x6f9   :  { %3072 = vmatprep.subr.bf16.mxu1 %v2694_v22  ;;  %3359 = vmatprep.subr.bf16.mxu0 %v2696_v63  ;;  %v2781_v22 = vld [vmem:[#allocation2 + $0x1540] sm:$0xff]  ;;  %v2783_v63 = vld [vmem:[#allocation2 + $0x1550] sm:$0xff] }
 0x6fc   :  { %3073 = vmatpush1.bf16.msra.mxu1 %v2693_v12  ;;  %3360 = vmatpush1.bf16.msra.mxu0 %v2695_v5  ;;  %v2790_v12 = vld [vmem:[#allocation2 + $0x1588] sm:$0xff]  ;;  %v2792_v5 = vld [vmem:[#allocation2 + $0x1598] sm:$0xff] }
 0x6fd   :  { %3074 = vmatprep.subr.bf16.mxu1 %v2702_v3  ;;  %3361 = vmatprep.subr.bf16.mxu0 %v2704_v39  ;;  %v2789_v3 = vld [vmem:[#allocation2 + $0x1580] sm:$0xff]  ;;  %v2791_v39 = vld [vmem:[#allocation2 + $0x1590] sm:$0xff] }
 0x700   :  { %3075 = vmatpush1.bf16.msra.mxu1 %v2701_v47  ;;  %3362 = vmatpush1.bf16.msra.mxu0 %v2703_v21  ;;  %v2798_v47 = vld [vmem:[#allocation2 + $0x15c8] sm:$0xff]  ;;  %v2800_v21 = vld [vmem:[#allocation2 + $0x15d8] sm:$0xff] }
 0x701   :  { %3076 = vmatprep.subr.bf16.mxu1 %v2710_v31  ;;  %3363 = vmatprep.subr.bf16.mxu0 %v2712_v27  ;;  %v2797_v31 = vld [vmem:[#allocation2 + $0x15c0] sm:$0xff]  ;;  %v2799_v27 = vld [vmem:[#allocation2 + $0x15d0] sm:$0xff] }
 0x704   :  { %3077 = vmatpush1.bf16.msra.mxu1 %v2709_v24  ;;  %3364 = vmatpush1.bf16.msra.mxu0 %v2711_v29  ;;  %v2806_v24 = vld [vmem:[#allocation2 + $0x1608] sm:$0xff]  ;;  %v2808_v29 = vld [vmem:[#allocation2 + $0x1618] sm:$0xff] }
 0x705   :  { %3078 = vmatprep.subr.bf16.mxu1 %v2718_v14  ;;  %3365 = vmatprep.subr.bf16.mxu0 %v2720_v28  ;;  %v2805_v14 = vld [vmem:[#allocation2 + $0x1600] sm:$0xff]  ;;  %v2807_v28 = vld [vmem:[#allocation2 + $0x1610] sm:$0xff] }
 0x708   :  { %3079 = vmatpush1.bf16.msra.mxu1 %v2717_v32  ;;  %3366 = vmatpush1.bf16.msra.mxu0 %v2719_v37  ;;  %v2814_v32 = vld [vmem:[#allocation2 + $0x1648] sm:$0xff]  ;;  %v2816_v37 = vld [vmem:[#allocation2 + $0x1658] sm:$0xff] }
 0x709   :  { %3080 = vmatprep.subr.bf16.mxu1 %v2726_v46  ;;  %3367 = vmatprep.subr.bf16.mxu0 %v2728_v11  ;;  %v2813_v46 = vld [vmem:[#allocation2 + $0x1640] sm:$0xff]  ;;  %v2815_v11 = vld [vmem:[#allocation2 + $0x1650] sm:$0xff] }
 0x70c   :  { %3081 = vmatpush1.bf16.msra.mxu1 %v2725_v1  ;;  %3368 = vmatpush1.bf16.msra.mxu0 %v2727_v48  ;;  %v2822_v1 = vld [vmem:[#allocation2 + $0x1688] sm:$0xff]  ;;  %v2824_v48 = vld [vmem:[#allocation2 + $0x1698] sm:$0xff] }
 0x70d   :  { %3082 = vmatprep.subr.bf16.mxu1 %v2734_v15  ;;  %3369 = vmatprep.subr.bf16.mxu0 %v2736_v38  ;;  %v2821_v15 = vld [vmem:[#allocation2 + $0x1680] sm:$0xff]  ;;  %v2823_v38 = vld [vmem:[#allocation2 + $0x1690] sm:$0xff] }
 0x710   :  { %3083 = vmatpush1.bf16.msra.mxu1 %v2733_v2  ;;  %3370 = vmatpush1.bf16.msra.mxu0 %v2735_v4  ;;  %v2832_v2 = vld [vmem:[#allocation2 + $0x16d8] sm:$0xff]  ;;  %v2829_v4 = vld [vmem:[#allocation2 + $0x16c0] sm:$0xff] }
 0x711   :  { %3093 = vmatprep.subr.bf16.mxu1 %v2742_v35  ;;  %3380 = vmatprep.subr.bf16.mxu0 %v2744_v52  ;;  %v2831_v35 = vld [vmem:[#allocation2 + $0x16d0] sm:$0xff]  ;;  %v2838_v52 = vld [vmem:[#allocation2 + $0x1708] sm:$0xff] }
 0x713   :  { %3085 = vmatmul.mubr.bf16.vlgmr.msra.gmra.mrb[32].mxu1 %v6412_v40  ;;  %3372 = vmatmul.mubr.bf16.vlgmr.msra.gmra.mrb[8].mxu0 %v6412_v40 }
 0x714   :  { %3094 = vmatpush1.bf16.msra.mxu1 %v2741_v0  ;;  %3381 = vmatpush1.bf16.msra.mxu0 %v2743_v7  ;;  %v2837_v0 = vld [vmem:[#allocation2 + $0x1700] sm:$0xff]  ;;  %v2839_v7 = vld [vmem:[#allocation2 + $0x1710] sm:$0xff] }
 0x715   :  { %3095 = vmatprep.subr.bf16.mxu1 %v2750_v53  ;;  %3382 = vmatprep.subr.bf16.mxu0 %v2752_v60  ;;  %v2846_v53 = vld [vmem:[#allocation2 + $0x1748] sm:$0xff]  ;;  %v2848_v60 = vld [vmem:[#allocation2 + $0x1758] sm:$0xff] }
 0x716   :  { %3125 = vmatprep.mubr.bf16.mxu1 %v6414_v26  ;;  %3412 = vmatprep.mubr.bf16.mxu0 %v6414_v26 }
 0x718   :  { %3096 = vmatpush1.bf16.msra.mxu1 %v2749_v20  ;;  %3383 = vmatpush1.bf16.msra.mxu0 %v2751_v58  ;;  %v2845_v20 = vld [vmem:[#allocation2 + $0x1740] sm:$0xff]  ;;  %v2847_v58 = vld [vmem:[#allocation2 + $0x1750] sm:$0xff] }
 0x719   :  { %3097 = vmatprep.subr.bf16.mxu1 %v2758_v23  ;;  %3384 = vmatprep.subr.bf16.mxu0 %v2760_v34  ;;  %v2854_v23 = vld [vmem:[#allocation2 + $0x1788] sm:$0xff]  ;;  %v2856_v34 = vld [vmem:[#allocation2 + $0x1798] sm:$0xff] }
 0x71c   :  { %3098 = vmatpush1.bf16.msra.mxu1 %v2757_v33  ;;  %3385 = vmatpush1.bf16.msra.mxu0 %v2759_v18  ;;  %v2853_v33 = vld [vmem:[#allocation2 + $0x1780] sm:$0xff]  ;;  %v2855_v18 = vld [vmem:[#allocation2 + $0x1790] sm:$0xff] }
 0x71d   :  { %3099 = vmatprep.subr.bf16.mxu1 %v2766_v25  ;;  %3386 = vmatprep.subr.bf16.mxu0 %v2768_v9  ;;  %v2862_v25 = vld [vmem:[#allocation2 + $0x17c8] sm:$0xff]  ;;  %v2864_v9 = vld [vmem:[#allocation2 + $0x17d8] sm:$0xff] }
 0x720   :  { %3100 = vmatpush1.bf16.msra.mxu1 %v2765_v61  ;;  %3387 = vmatpush1.bf16.msra.mxu0 %v2767_v59  ;;  %v2066_v61 = vrot.slane %v6393_v17, %v2033_v45  ;;  %v2861_v59 = vld [vmem:[#allocation2 + $0x17c0] sm:$0xff] }
 0x721   :  { %3101 = vmatprep.subr.bf16.mxu1 %v2774_v41  ;;  %3388 = vmatprep.subr.bf16.mxu0 %v2776_v13  ;;  %v2863_v41 = vld [vmem:[#allocation2 + $0x17d0] sm:$0xff]  ;;  %v2870_v13 = vld [vmem:[#allocation2 + $0x1808] sm:$0xff]  ;;  %v2877_v45 = vld [vmem:[#allocation2 + $0x1840] sm:$0xff] }
 0x724   :  { %3102 = vmatpush1.bf16.msra.mxu1 %v2773_v19  ;;  %3389 = vmatpush1.bf16.msra.mxu0 %v2775_v30  ;;  %v2872_v19 = vld [vmem:[#allocation2 + $0x1818] sm:$0xff]  ;;  %v6423_v30 = vpack.c.bf16 %v2066_v61, %v2066_v61  ;;  %v2177_v61 = vld [vmem:[#allocation2 + $0x260] sm:$0xff] }
 0x725   :  { %3103 = vmatprep.subr.bf16.mxu1 %v2782_v8  ;;  %3390 = vmatprep.subr.bf16.mxu0 %v2784_v36  ;;  %v2869_v8 = vld [vmem:[#allocation2 + $0x1800] sm:$0xff]  ;;  %v2871_v36 = vld [vmem:[#allocation2 + $0x1810] sm:$0xff] }
 0x728   :  { %3104 = vmatpush1.bf16.msra.mxu1 %v2781_v22  ;;  %3391 = vmatpush1.bf16.msra.mxu0 %v2783_v63  ;;  %v2878_v22 = vld [vmem:[#allocation2 + $0x1848] sm:$0xff]  ;;  %v2880_v63 = vld [vmem:[#allocation2 + $0x1858] sm:$0xff] }
 0x729   :  { %3105 = vmatprep.subr.bf16.mxu1 %v2790_v12  ;;  %3392 = vmatprep.subr.bf16.mxu0 %v2792_v5  ;;  %v2879_v12 = vld [vmem:[#allocation2 + $0x1850] sm:$0xff]  ;;  %v5048_v5 = vmov 0  }
 0x72c   :  { %3106 = vmatpush1.bf16.msra.mxu1 %v2789_v3  ;;  %3393 = vmatpush1.bf16.msra.mxu0 %v2791_v39  ;;  %v2106_v3 = vld [vmem:[#allocation2 + $0x28] sm:$0xff]  ;;  %v2108_v39 = vld [vmem:[#allocation2 + $0x38] sm:$0xff] }
 0x72d   :  { %3107 = vmatprep.subr.bf16.mxu1 %v2798_v47  ;;  %3394 = vmatprep.subr.bf16.mxu0 %v2800_v21  ;;  %v2074_v47 = vrot.slane %v6393_v17, %v2041_v50  ;;  %v2115_v50 = vld [vmem:[#allocation2 + $0x70] sm:$0xff]  ;;  %v2122_v17 = vld [vmem:[#allocation2 + $0xa8] sm:$0xff] }
 0x72f   :  { %v6432_v21 = vpack.c.bf16 %v2074_v47, %v2074_v47  ;;  %v2203_v47 = vld [vmem:[#allocation2 + $0x330] sm:$0xff] }
 0x730   :  { %3108 = vmatpush1.bf16.msra.mxu1 %v2797_v31  ;;  %3395 = vmatpush1.bf16.msra.mxu0 %v2799_v27  ;;  %v2105_v31 = vld [vmem:[#allocation2 + $0x20] sm:$0xff]  ;;  %v2107_v27 = vld [vmem:[#allocation2 + $0x30] sm:$0xff] }
 0x731   :  { %3109 = vmatprep.subr.bf16.mxu1 %v2806_v24  ;;  %3396 = vmatprep.subr.bf16.mxu0 %v2808_v29  ;;  %v2114_v24 = vld [vmem:[#allocation2 + $0x68] sm:$0xff]  ;;  %v2116_v29 = vld [vmem:[#allocation2 + $0x78] sm:$0xff] }
 0x734   :  { %3110 = vmatpush1.bf16.msra.mxu1 %v2805_v14  ;;  %3397 = vmatpush1.bf16.msra.mxu0 %v2807_v28  ;;  %v2124_v14 = vld [vmem:[#allocation2 + $0xb8] sm:$0xff]  ;;  %v2121_v28 = vld [vmem:[#allocation2 + $0xa0] sm:$0xff] }
 0x735   :  { %3111 = vmatprep.subr.bf16.mxu1 %v2814_v32  ;;  %3398 = vmatprep.subr.bf16.mxu0 %v2816_v37  ;;  %v2123_v32 = vld [vmem:[#allocation2 + $0xb0] sm:$0xff]  ;;  %v2130_v37 = vld [vmem:[#allocation2 + $0xe8] sm:$0xff] }
 0x738   :  { %3112 = vmatpush1.bf16.msra.mxu1 %v2813_v46  ;;  %3399 = vmatpush1.bf16.msra.mxu0 %v2815_v11  ;;  %v2132_v46 = vld [vmem:[#allocation2 + $0xf8] sm:$0xff]  ;;  %v2129_v11 = vld [vmem:[#allocation2 + $0xe0] sm:$0xff] }
 0x739   :  { %3113 = vmatprep.subr.bf16.mxu1 %v2822_v1  ;;  %3400 = vmatprep.subr.bf16.mxu0 %v2824_v48  ;;  %v2131_v1 = vld [vmem:[#allocation2 + $0xf0] sm:$0xff]  ;;  %v2138_v48 = vld [vmem:[#allocation2 + $0x128] sm:$0xff] }
 0x73c   :  { %3114 = vmatpush1.bf16.msra.mxu1 %v2821_v15  ;;  %3401 = vmatpush1.bf16.msra.mxu0 %v2823_v38  ;;  %v2140_v15 = vld [vmem:[#allocation2 + $0x138] sm:$0xff]  ;;  %v2139_v38 = vld [vmem:[#allocation2 + $0x130] sm:$0xff] }
 0x73d   :  { %3115 = vmatprep.subr.bf16.mxu1 %v2830_v57  ;;  %3402 = vmatprep.subr.bf16.mxu0 %v2832_v2  ;;  %v2146_v57 = vld [vmem:[#allocation2 + $0x168] sm:$0xff]  ;;  %v2148_v2 = vld [vmem:[#allocation2 + $0x178] sm:$0xff] }
 0x740   :  { %3116 = vmatpush1.bf16.msra.mxu1 %v2829_v4  ;;  %3403 = vmatpush1.bf16.msra.mxu0 %v2831_v35  ;;  %v2145_v4 = vld [vmem:[#allocation2 + $0x160] sm:$0xff]  ;;  %v2147_v35 = vld [vmem:[#allocation2 + $0x170] sm:$0xff] }
 0x741   :  { %3117 = vmatprep.subr.bf16.mxu1 %v2838_v52  ;;  %3404 = vmatprep.subr.bf16.mxu0 %v2840_v62  ;;  %v2154_v52 = vld [vmem:[#allocation2 + $0x1a8] sm:$0xff]  ;;  %v2156_v62 = vld [vmem:[#allocation2 + $0x1b8] sm:$0xff] }
 0x744   :  { %3118 = vmatpush1.bf16.msra.mxu1 %v2837_v0  ;;  %3405 = vmatpush1.bf16.msra.mxu0 %v2839_v7  ;;  %v2153_v0 = vld [vmem:[#allocation2 + $0x1a0] sm:$0xff]  ;;  %v2155_v7 = vld [vmem:[#allocation2 + $0x1b0] sm:$0xff] }
 0x745   :  { %3119 = vmatprep.subr.bf16.mxu1 %v2846_v53  ;;  %3406 = vmatprep.subr.bf16.mxu0 %v2848_v60  ;;  %v2162_v53 = vld [vmem:[#allocation2 + $0x1e8] sm:$0xff]  ;;  %v2164_v60 = vld [vmem:[#allocation2 + $0x1f8] sm:$0xff] }
 0x748   :  { %3120 = vmatpush1.bf16.msra.mxu1 %v2845_v20  ;;  %3407 = vmatpush1.bf16.msra.mxu0 %v2847_v58  ;;  %v2161_v20 = vld [vmem:[#allocation2 + $0x1e0] sm:$0xff]  ;;  %v2163_v58 = vld [vmem:[#allocation2 + $0x1f0] sm:$0xff] }
 0x749   :  { %3121 = vmatprep.subr.bf16.mxu1 %v2854_v23  ;;  %3408 = vmatprep.subr.bf16.mxu0 %v2856_v34  ;;  %v2170_v23 = vld [vmem:[#allocation2 + $0x228] sm:$0xff]  ;;  %v2172_v34 = vld [vmem:[#allocation2 + $0x238] sm:$0xff] }
 0x74c   :  { %3122 = vmatpush1.bf16.msra.mxu1 %v2853_v33  ;;  %3409 = vmatpush1.bf16.msra.mxu0 %v2855_v18  ;;  %v2169_v33 = vld [vmem:[#allocation2 + $0x220] sm:$0xff]  ;;  %v2171_v18 = vld [vmem:[#allocation2 + $0x230] sm:$0xff] }
 0x74d   :  { %3123 = vmatprep.subr.bf16.mxu1 %v2862_v25  ;;  %3410 = vmatprep.subr.bf16.mxu0 %v2864_v9  ;;  %v2178_v25 = vld [vmem:[#allocation2 + $0x268] sm:$0xff]  ;;  %v2180_v9 = vld [vmem:[#allocation2 + $0x278] sm:$0xff] }
 0x750   :  { %3124 = vmatpush1.bf16.msra.mxu1 %v2861_v59  ;;  %3411 = vmatpush1.bf16.msra.mxu0 %v2863_v41  ;;  %v2179_v59 = vld [vmem:[#allocation2 + $0x270] sm:$0xff]  ;;  %v2186_v41 = vld [vmem:[#allocation2 + $0x2a8] sm:$0xff] }
 0x751   :  { %3134 = vmatprep.subr.bf16.mxu1 %v2870_v13  ;;  %3421 = vmatprep.subr.bf16.mxu0 %v2872_v19  ;;  %v2188_v13 = vld [vmem:[#allocation2 + $0x2b8] sm:$0xff]  ;;  %v2185_v19 = vld [vmem:[#allocation2 + $0x2a0] sm:$0xff] }
 0x753   :  { %3126 = vmatmul.mubr.bf16.vlgmr.msra.gmra.mrb[32].mxu1 %v6423_v30  ;;  %3413 = vmatmul.mubr.bf16.vlgmr.msra.gmra.mrb[8].mxu0 %v6423_v30 }
 0x754   :  { %3135 = vmatpush1.bf16.msra.mxu1 %v2869_v8  ;;  %3422 = vmatpush1.bf16.msra.mxu0 %v2871_v36  ;;  %v2187_v8 = vld [vmem:[#allocation2 + $0x2b0] sm:$0xff]  ;;  %v2194_v36 = vld [vmem:[#allocation2 + $0x2e8] sm:$0xff] }
 0x755   :  { %3136 = vmatprep.subr.bf16.mxu1 %v2878_v22  ;;  %3423 = vmatprep.subr.bf16.mxu0 %v2880_v63  ;;  %v2196_v22 = vld [vmem:[#allocation2 + $0x2f8] sm:$0xff]  ;;  %v2193_v63 = vld [vmem:[#allocation2 + $0x2e0] sm:$0xff] }
 0x756   :  { %3166 = vmatprep.mubr.bf16.mxu1 %v5048_v5  ;;  %3453 = vmatprep.mubr.bf16.mxu0 %v5048_v5 }
 0x758   :  { %3137 = vmatpush1.bf16.msra.mxu1 %v2877_v45  ;;  %3424 = vmatpush1.bf16.msra.mxu0 %v2879_v12  ;;  %v2195_v45 = vld [vmem:[#allocation2 + $0x2f0] sm:$0xff]  ;;  %v2202_v12 = vld [vmem:[#allocation2 + $0x328] sm:$0xff] }
 0x759   :  { %3462 = vmatprep.subr.bf16.mxu1 %v2106_v3  ;;  %3749 = vmatprep.subr.bf16.mxu0 %v2108_v39  ;;  %v2204_v3 = vld [vmem:[#allocation2 + $0x338] sm:$0xff]  ;;  %v2201_v39 = vld [vmem:[#allocation2 + $0x320] sm:$0xff] }
 0x75f   :  { %4178 = vmatmul.mubr.msk.bf16.vlgmr.msra.gmra.mrb[32].mxu1 %vm6600_vm4, %v6432_v21  ;;  %4179 = vmatmul.mubr.msk.bf16.vlgmr.msra.gmra.mrb[8].mxu0 %vm6601_vm6, %v6432_v21 }
 0x760   :  { %3463 = vmatpush1.bf16.msra.mxu1 %v2105_v31  ;;  %3750 = vmatpush1.bf16.msra.mxu0 %v2107_v27  ;;  %v2210_v31 = vld [vmem:[#allocation2 + $0x368] sm:$0xff]  ;;  %v2212_v27 = vld [vmem:[#allocation2 + $0x378] sm:$0xff] }
 0x761   :  { %3464 = vmatprep.subr.bf16.mxu1 %v2114_v24  ;;  %3751 = vmatprep.subr.bf16.mxu0 %v2116_v29  ;;  %v2209_v24 = vld [vmem:[#allocation2 + $0x360] sm:$0xff]  ;;  %v2211_v29 = vld [vmem:[#allocation2 + $0x370] sm:$0xff] }
 0x762   :  { %3494 = vmatprep.mubr.bf16.mxu1 %v6343_v49  ;;  %3781 = vmatprep.mubr.bf16.mxu0 %v6343_v49  ;;  %v2137_v49 = vld [vmem:[#allocation2 + $0x120] sm:$0xff] }
 0x764   :  { %3465 = vmatpush1.bf16.msra.mxu1 %v2113_v10  ;;  %3752 = vmatpush1.bf16.msra.mxu0 %v2115_v50  ;;  %v2218_v10 = vld [vmem:[#allocation2 + $0x3a8] sm:$0xff]  ;;  %v2220_v50 = vld [vmem:[#allocation2 + $0x3b8] sm:$0xff] }
 0x765   :  { %3466 = vmatprep.subr.bf16.mxu1 %v2122_v17  ;;  %3753 = vmatprep.subr.bf16.mxu0 %v2124_v14  ;;  %v2217_v17 = vld [vmem:[#allocation2 + $0x3a0] sm:$0xff]  ;;  %v2219_v14 = vld [vmem:[#allocation2 + $0x3b0] sm:$0xff] }
 0x768   :  { %3467 = vmatpush1.bf16.msra.mxu1 %v2121_v28  ;;  %3754 = vmatpush1.bf16.msra.mxu0 %v2123_v32  ;;  %v2226_v28 = vld [vmem:[#allocation2 + $0x3e8] sm:$0xff]  ;;  %v2228_v32 = vld [vmem:[#allocation2 + $0x3f8] sm:$0xff] }
 0x769   :  { %3468 = vmatprep.subr.bf16.mxu1 %v2130_v37  ;;  %3755 = vmatprep.subr.bf16.mxu0 %v2132_v46  ;;  %v2225_v37 = vld [vmem:[#allocation2 + $0x3e0] sm:$0xff]  ;;  %v2227_v46 = vld [vmem:[#allocation2 + $0x3f0] sm:$0xff] }
 0x76c   :  { %3469 = vmatpush1.bf16.msra.mxu1 %v2129_v11  ;;  %3756 = vmatpush1.bf16.msra.mxu0 %v2131_v1  ;;  %v2234_v11 = vld [vmem:[#allocation2 + $0x428] sm:$0xff]  ;;  %v2236_v1 = vld [vmem:[#allocation2 + $0x438] sm:$0xff] }
 0x76d   :  { %3470 = vmatprep.subr.bf16.mxu1 %v2138_v48  ;;  %3757 = vmatprep.subr.bf16.mxu0 %v2140_v15  ;;  %v2233_v48 = vld [vmem:[#allocation2 + $0x420] sm:$0xff]  ;;  %v2235_v15 = vld [vmem:[#allocation2 + $0x430] sm:$0xff] }
 0x770   :  { %3471 = vmatpush1.bf16.msra.mxu1 %v2137_v49  ;;  %3758 = vmatpush1.bf16.msra.mxu0 %v2139_v38  ;;  %v2242_v49 = vld [vmem:[#allocation2 + $0x468] sm:$0xff]  ;;  %v2244_v38 = vld [vmem:[#allocation2 + $0x478] sm:$0xff] }
 0x771   :  { %3472 = vmatprep.subr.bf16.mxu1 %v2146_v57  ;;  %3759 = vmatprep.subr.bf16.mxu0 %v2148_v2  ;;  %v2241_v57 = vld [vmem:[#allocation2 + $0x460] sm:$0xff]  ;;  %v2243_v2 = vld [vmem:[#allocation2 + $0x470] sm:$0xff] }
 0x774   :  { %3473 = vmatpush1.bf16.msra.mxu1 %v2145_v4  ;;  %3760 = vmatpush1.bf16.msra.mxu0 %v2147_v35  ;;  %v2250_v4 = vld [vmem:[#allocation2 + $0x4a8] sm:$0xff]  ;;  %v2252_v35 = vld [vmem:[#allocation2 + $0x4b8] sm:$0xff] }
 0x775   :  { %3474 = vmatprep.subr.bf16.mxu1 %v2154_v52  ;;  %3761 = vmatprep.subr.bf16.mxu0 %v2156_v62  ;;  %v2249_v52 = vld [vmem:[#allocation2 + $0x4a0] sm:$0xff]  ;;  %v2251_v62 = vld [vmem:[#allocation2 + $0x4b0] sm:$0xff] }
 0x778   :  { %3475 = vmatpush1.bf16.msra.mxu1 %v2153_v0  ;;  %3762 = vmatpush1.bf16.msra.mxu0 %v2155_v7  ;;  %v2258_v0 = vld [vmem:[#allocation2 + $0x4e8] sm:$0xff]  ;;  %v2257_v7 = vld [vmem:[#allocation2 + $0x4e0] sm:$0xff] }
 0x779   :  { %3476 = vmatprep.subr.bf16.mxu1 %v2162_v53  ;;  %3763 = vmatprep.subr.bf16.mxu0 %v2164_v60  ;;  %v2259_v53 = vld [vmem:[#allocation2 + $0x4f0] sm:$0xff]  ;;  %v2266_v60 = vld [vmem:[#allocation2 + $0x528] sm:$0xff] }
 0x77c   :  { %3477 = vmatpush1.bf16.msra.mxu1 %v2161_v20  ;;  %3764 = vmatpush1.bf16.msra.mxu0 %v2163_v58  ;;  %v2268_v20 = vld [vmem:[#allocation2 + $0x538] sm:$0xff]  ;;  %v2267_v58 = vld [vmem:[#allocation2 + $0x530] sm:$0xff] }
 0x77d   :  { %3478 = vmatprep.subr.bf16.mxu1 %v2170_v23  ;;  %3765 = vmatprep.subr.bf16.mxu0 %v2172_v34  ;;  %v2274_v23 = vld [vmem:[#allocation2 + $0x568] sm:$0xff]  ;;  %v2276_v34 = vld [vmem:[#allocation2 + $0x578] sm:$0xff] }
 0x780   :  { %3479 = vmatpush1.bf16.msra.mxu1 %v2169_v33  ;;  %3766 = vmatpush1.bf16.msra.mxu0 %v2171_v18  ;;  %v2273_v33 = vld [vmem:[#allocation2 + $0x560] sm:$0xff]  ;;  %v2275_v18 = vld [vmem:[#allocation2 + $0x570] sm:$0xff] }
 0x781   :  { %3480 = vmatprep.subr.bf16.mxu1 %v2178_v25  ;;  %3767 = vmatprep.subr.bf16.mxu0 %v2180_v9  ;;  %v2282_v25 = vld [vmem:[#allocation2 + $0x5a8] sm:$0xff]  ;;  %v2284_v9 = vld [vmem:[#allocation2 + $0x5b8] sm:$0xff] }
 0x784   :  { %3481 = vmatpush1.bf16.msra.mxu1 %v2177_v61  ;;  %3768 = vmatpush1.bf16.msra.mxu0 %v2179_v59  ;;  %v2281_v61 = vld [vmem:[#allocation2 + $0x5a0] sm:$0xff]  ;;  %v2283_v59 = vld [vmem:[#allocation2 + $0x5b0] sm:$0xff] }
 0x785   :  { %3482 = vmatprep.subr.bf16.mxu1 %v2186_v41  ;;  %3769 = vmatprep.subr.bf16.mxu0 %v2188_v13  ;;  %v2290_v41 = vld [vmem:[#allocation2 + $0x5e8] sm:$0xff]  ;;  %v2292_v13 = vld [vmem:[#allocation2 + $0x5f8] sm:$0xff] }
 0x788   :  { %3483 = vmatpush1.bf16.msra.mxu1 %v2185_v19  ;;  %3770 = vmatpush1.bf16.msra.mxu0 %v2187_v8  ;;  %v2289_v19 = vld [vmem:[#allocation2 + $0x5e0] sm:$0xff]  ;;  %v2291_v8 = vld [vmem:[#allocation2 + $0x5f0] sm:$0xff] }
 0x789   :  { %3484 = vmatprep.subr.bf16.mxu1 %v2194_v36  ;;  %3771 = vmatprep.subr.bf16.mxu0 %v2196_v22  ;;  %v2298_v36 = vld [vmem:[#allocation2 + $0x628] sm:$0xff]  ;;  %v2300_v22 = vld [vmem:[#allocation2 + $0x638] sm:$0xff] }
 0x78c   :  { %3485 = vmatpush1.bf16.msra.mxu1 %v2193_v63  ;;  %3772 = vmatpush1.bf16.msra.mxu0 %v2195_v45  ;;  %v2297_v63 = vld [vmem:[#allocation2 + $0x620] sm:$0xff]  ;;  %v2299_v45 = vld [vmem:[#allocation2 + $0x630] sm:$0xff] }
 0x78d   :  { %3486 = vmatprep.subr.bf16.mxu1 %v2202_v12  ;;  %3773 = vmatprep.subr.bf16.mxu0 %v2204_v3  ;;  %v2306_v12 = vld [vmem:[#allocation2 + $0x668] sm:$0xff]  ;;  %v2308_v3 = vld [vmem:[#allocation2 + $0x678] sm:$0xff] }
 0x790   :  { %3487 = vmatpush1.bf16.msra.mxu1 %v2201_v39  ;;  %3774 = vmatpush1.bf16.msra.mxu0 %v2203_v47  ;;  %v2305_v39 = vld [vmem:[#allocation2 + $0x660] sm:$0xff]  ;;  %v2307_v47 = vld [vmem:[#allocation2 + $0x670] sm:$0xff] }
 0x791   :  { %3488 = vmatprep.subr.bf16.mxu1 %v2210_v31  ;;  %3775 = vmatprep.subr.bf16.mxu0 %v2212_v27  ;;  %v2314_v31 = vld [vmem:[#allocation2 + $0x6a8] sm:$0xff]  ;;  %v2316_v27 = vld [vmem:[#allocation2 + $0x6b8] sm:$0xff] }
 0x794   :  { %3489 = vmatpush1.bf16.msra.mxu1 %v2209_v24  ;;  %3776 = vmatpush1.bf16.msra.mxu0 %v2211_v29  ;;  %v2313_v24 = vld [vmem:[#allocation2 + $0x6a0] sm:$0xff]  ;;  %v2315_v29 = vld [vmem:[#allocation2 + $0x6b0] sm:$0xff] }
 0x795   :  { %3490 = vmatprep.subr.bf16.mxu1 %v2218_v10  ;;  %3777 = vmatprep.subr.bf16.mxu0 %v2220_v50  ;;  %v2322_v10 = vld [vmem:[#allocation2 + $0x6e8] sm:$0xff]  ;;  %v2324_v50 = vld [vmem:[#allocation2 + $0x6f8] sm:$0xff] }
 0x798   :  { %3491 = vmatpush1.bf16.msra.mxu1 %v2217_v17  ;;  %3778 = vmatpush1.bf16.msra.mxu0 %v2219_v14  ;;  %v2321_v17 = vld [vmem:[#allocation2 + $0x6e0] sm:$0xff]  ;;  %v2323_v14 = vld [vmem:[#allocation2 + $0x6f0] sm:$0xff] }
 0x799   :  { %3492 = vmatprep.subr.bf16.mxu1 %v2226_v28  ;;  %3779 = vmatprep.subr.bf16.mxu0 %v2228_v32  ;;  %v2330_v28 = vld [vmem:[#allocation2 + $0x728] sm:$0xff]  ;;  %v2332_v32 = vld [vmem:[#allocation2 + $0x738] sm:$0xff] }
 0x79c   :  { %3493 = vmatpush1.bf16.msra.mxu1 %v2225_v37  ;;  %3780 = vmatpush1.bf16.msra.mxu0 %v2227_v46  ;;  %v2329_v37 = vld [vmem:[#allocation2 + $0x720] sm:$0xff]  ;;  %v2331_v46 = vld [vmem:[#allocation2 + $0x730] sm:$0xff] }
 0x79d   :  { %3503 = vmatprep.subr.bf16.mxu1 %v2234_v11  ;;  %3790 = vmatprep.subr.bf16.mxu0 %v2236_v1  ;;  %v2338_v11 = vld [vmem:[#allocation2 + $0x768] sm:$0xff]  ;;  %v2340_v1 = vld [vmem:[#allocation2 + $0x778] sm:$0xff] }
 0x79f   :  { %3495 = vmatmul.mubr.bf16.vlgmr.msra.gmra.mrb[36].mxu1 %v6355_v43  ;;  %3782 = vmatmul.mubr.bf16.vlgmr.msra.gmra.mrb[12].mxu0 %v6355_v43  ;;  %v2260_v43 = vld [vmem:[#allocation2 + $0x4f8] sm:$0xff] }
 0x7a0   :  { %3504 = vmatpush1.bf16.msra.mxu1 %v2233_v48  ;;  %3791 = vmatpush1.bf16.msra.mxu0 %v2235_v15  ;;  %v2337_v48 = vld [vmem:[#allocation2 + $0x760] sm:$0xff]  ;;  %v2339_v15 = vld [vmem:[#allocation2 + $0x770] sm:$0xff] }
 0x7a1   :  { %3505 = vmatprep.subr.bf16.mxu1 %v2242_v49  ;;  %3792 = vmatprep.subr.bf16.mxu0 %v2244_v38  ;;  %v2346_v49 = vld [vmem:[#allocation2 + $0x7a8] sm:$0xff]  ;;  %v2348_v38 = vld [vmem:[#allocation2 + $0x7b8] sm:$0xff] }
 0x7a2   :  { %3535 = vmatprep.mubr.bf16.mxu1 %v6357_v42  ;;  %3822 = vmatprep.mubr.bf16.mxu0 %v6357_v42  ;;  %v2265_v42 = vld [vmem:[#allocation2 + $0x520] sm:$0xff] }
 0x7a4   :  { %3506 = vmatpush1.bf16.msra.mxu1 %v2241_v57  ;;  %3793 = vmatpush1.bf16.msra.mxu0 %v2243_v2  ;;  %v2345_v57 = vld [vmem:[#allocation2 + $0x7a0] sm:$0xff]  ;;  %v2347_v2 = vld [vmem:[#allocation2 + $0x7b0] sm:$0xff] }
 0x7a5   :  { %3507 = vmatprep.subr.bf16.mxu1 %v2250_v4  ;;  %3794 = vmatprep.subr.bf16.mxu0 %v2252_v35  ;;  %v2354_v4 = vld [vmem:[#allocation2 + $0x7e8] sm:$0xff]  ;;  %v2356_v35 = vld [vmem:[#allocation2 + $0x7f8] sm:$0xff] }
 0x7a8   :  { %3508 = vmatpush1.bf16.msra.mxu1 %v2249_v52  ;;  %3795 = vmatpush1.bf16.msra.mxu0 %v2251_v62  ;;  %v2353_v52 = vld [vmem:[#allocation2 + $0x7e0] sm:$0xff]  ;;  %v2355_v62 = vld [vmem:[#allocation2 + $0x7f0] sm:$0xff] }
 0x7a9   :  { %3509 = vmatprep.subr.bf16.mxu1 %v2258_v0  ;;  %3796 = vmatprep.subr.bf16.mxu0 %v2260_v43  ;;  %v2362_v0 = vld [vmem:[#allocation2 + $0x828] sm:$0xff]  ;;  %v2364_v43 = vld [vmem:[#allocation2 + $0x838] sm:$0xff] }
 0x7ac   :  { %3510 = vmatpush1.bf16.msra.mxu1 %v2257_v7  ;;  %3797 = vmatpush1.bf16.msra.mxu0 %v2259_v53  ;;  %v2361_v7 = vld [vmem:[#allocation2 + $0x820] sm:$0xff]  ;;  %v2363_v53 = vld [vmem:[#allocation2 + $0x830] sm:$0xff] }
 0x7ad   :  { %3511 = vmatprep.subr.bf16.mxu1 %v2266_v60  ;;  %3798 = vmatprep.subr.bf16.mxu0 %v2268_v20  ;;  %v2370_v60 = vld [vmem:[#allocation2 + $0x868] sm:$0xff]  ;;  %v2372_v20 = vld [vmem:[#allocation2 + $0x878] sm:$0xff] }
 0x7b0   :  { %3512 = vmatpush1.bf16.msra.mxu1 %v2265_v42  ;;  %3799 = vmatpush1.bf16.msra.mxu0 %v2267_v58  ;;  %v2369_v42 = vld [vmem:[#allocation2 + $0x860] sm:$0xff]  ;;  %v2371_v58 = vld [vmem:[#allocation2 + $0x870] sm:$0xff] }
 0x7b1   :  { %3513 = vmatprep.subr.bf16.mxu1 %v2274_v23  ;;  %3800 = vmatprep.subr.bf16.mxu0 %v2276_v34  ;;  %v2378_v23 = vld [vmem:[#allocation2 + $0x8a8] sm:$0xff]  ;;  %v2380_v34 = vld [vmem:[#allocation2 + $0x8b8] sm:$0xff] }
 0x7b4   :  { %3514 = vmatpush1.bf16.msra.mxu1 %v2273_v33  ;;  %3801 = vmatpush1.bf16.msra.mxu0 %v2275_v18  ;;  %v2377_v33 = vld [vmem:[#allocation2 + $0x8a0] sm:$0xff]  ;;  %v2379_v18 = vld [vmem:[#allocation2 + $0x8b0] sm:$0xff] }
 0x7b5   :  { %3515 = vmatprep.subr.bf16.mxu1 %v2282_v25  ;;  %3802 = vmatprep.subr.bf16.mxu0 %v2284_v9  ;;  %v2386_v25 = vld [vmem:[#allocation2 + $0x8e8] sm:$0xff]  ;;  %v2385_v9 = vld [vmem:[#allocation2 + $0x8e0] sm:$0xff] }
 0x7b8   :  { %3516 = vmatpush1.bf16.msra.mxu1 %v2281_v61  ;;  %3803 = vmatpush1.bf16.msra.mxu0 %v2283_v59  ;;  %v2387_v61 = vld [vmem:[#allocation2 + $0x8f0] sm:$0xff]  ;;  %v2394_v59 = vld [vmem:[#allocation2 + $0x928] sm:$0xff] }
 0x7b9   :  { %3517 = vmatprep.subr.bf16.mxu1 %v2290_v41  ;;  %3804 = vmatprep.subr.bf16.mxu0 %v2292_v13  ;;  %v2396_v41 = vld [vmem:[#allocation2 + $0x938] sm:$0xff]  ;;  %v2395_v13 = vld [vmem:[#allocation2 + $0x930] sm:$0xff] }
 0x7bc   :  { %3518 = vmatpush1.bf16.msra.mxu1 %v2289_v19  ;;  %3805 = vmatpush1.bf16.msra.mxu0 %v2291_v8  ;;  %v2402_v19 = vld [vmem:[#allocation2 + $0x968] sm:$0xff]  ;;  %v2404_v8 = vld [vmem:[#allocation2 + $0x978] sm:$0xff] }
 0x7bd   :  { %3519 = vmatprep.subr.bf16.mxu1 %v2298_v36  ;;  %3806 = vmatprep.subr.bf16.mxu0 %v2300_v22  ;;  %v2401_v36 = vld [vmem:[#allocation2 + $0x960] sm:$0xff]  ;;  %v2403_v22 = vld [vmem:[#allocation2 + $0x970] sm:$0xff] }
 0x7c0   :  { %3520 = vmatpush1.bf16.msra.mxu1 %v2297_v63  ;;  %3807 = vmatpush1.bf16.msra.mxu0 %v2299_v45  ;;  %v2410_v63 = vld [vmem:[#allocation2 + $0x9a8] sm:$0xff]  ;;  %v2412_v45 = vld [vmem:[#allocation2 + $0x9b8] sm:$0xff] }
 0x7c1   :  { %3521 = vmatprep.subr.bf16.mxu1 %v2306_v12  ;;  %3808 = vmatprep.subr.bf16.mxu0 %v2308_v3  ;;  %v2409_v12 = vld [vmem:[#allocation2 + $0x9a0] sm:$0xff]  ;;  %v2411_v3 = vld [vmem:[#allocation2 + $0x9b0] sm:$0xff] }
 0x7c4   :  { %3522 = vmatpush1.bf16.msra.mxu1 %v2305_v39  ;;  %3809 = vmatpush1.bf16.msra.mxu0 %v2307_v47  ;;  %v2418_v39 = vld [vmem:[#allocation2 + $0x9e8] sm:$0xff]  ;;  %v2420_v47 = vld [vmem:[#allocation2 + $0x9f8] sm:$0xff] }
 0x7c5   :  { %3523 = vmatprep.subr.bf16.mxu1 %v2314_v31  ;;  %3810 = vmatprep.subr.bf16.mxu0 %v2316_v27  ;;  %v2417_v31 = vld [vmem:[#allocation2 + $0x9e0] sm:$0xff]  ;;  %v2419_v27 = vld [vmem:[#allocation2 + $0x9f0] sm:$0xff] }
 0x7c8   :  { %3524 = vmatpush1.bf16.msra.mxu1 %v2313_v24  ;;  %3811 = vmatpush1.bf16.msra.mxu0 %v2315_v29  ;;  %v2426_v24 = vld [vmem:[#allocation2 + $0xa28] sm:$0xff]  ;;  %v2428_v29 = vld [vmem:[#allocation2 + $0xa38] sm:$0xff] }
 0x7c9   :  { %3525 = vmatprep.subr.bf16.mxu1 %v2322_v10  ;;  %3812 = vmatprep.subr.bf16.mxu0 %v2324_v50  ;;  %v2425_v10 = vld [vmem:[#allocation2 + $0xa20] sm:$0xff]  ;;  %v2427_v50 = vld [vmem:[#allocation2 + $0xa30] sm:$0xff] }
 0x7cc   :  { %3526 = vmatpush1.bf16.msra.mxu1 %v2321_v17  ;;  %3813 = vmatpush1.bf16.msra.mxu0 %v2323_v14  ;;  %v2434_v17 = vld [vmem:[#allocation2 + $0xa68] sm:$0xff]  ;;  %v2436_v14 = vld [vmem:[#allocation2 + $0xa78] sm:$0xff] }
 0x7cd   :  { %3527 = vmatprep.subr.bf16.mxu1 %v2330_v28  ;;  %3814 = vmatprep.subr.bf16.mxu0 %v2332_v32  ;;  %v2433_v28 = vld [vmem:[#allocation2 + $0xa60] sm:$0xff]  ;;  %v2435_v32 = vld [vmem:[#allocation2 + $0xa70] sm:$0xff] }
 0x7d0   :  { %3528 = vmatpush1.bf16.msra.mxu1 %v2329_v37  ;;  %3815 = vmatpush1.bf16.msra.mxu0 %v2331_v46  ;;  %v2442_v37 = vld [vmem:[#allocation2 + $0xaa8] sm:$0xff]  ;;  %v2444_v46 = vld [vmem:[#allocation2 + $0xab8] sm:$0xff] }
 0x7d1   :  { %3529 = vmatprep.subr.bf16.mxu1 %v2338_v11  ;;  %3816 = vmatprep.subr.bf16.mxu0 %v2340_v1  ;;  %v2441_v11 = vld [vmem:[#allocation2 + $0xaa0] sm:$0xff]  ;;  %v2443_v1 = vld [vmem:[#allocation2 + $0xab0] sm:$0xff] }
 0x7d4   :  { %3530 = vmatpush1.bf16.msra.mxu1 %v2337_v48  ;;  %3817 = vmatpush1.bf16.msra.mxu0 %v2339_v15  ;;  %v2450_v48 = vld [vmem:[#allocation2 + $0xae8] sm:$0xff]  ;;  %v2452_v15 = vld [vmem:[#allocation2 + $0xaf8] sm:$0xff] }
 0x7d5   :  { %3531 = vmatprep.subr.bf16.mxu1 %v2346_v49  ;;  %3818 = vmatprep.subr.bf16.mxu0 %v2348_v38  ;;  %v2449_v49 = vld [vmem:[#allocation2 + $0xae0] sm:$0xff]  ;;  %v2451_v38 = vld [vmem:[#allocation2 + $0xaf0] sm:$0xff] }
 0x7d8   :  { %3532 = vmatpush1.bf16.msra.mxu1 %v2345_v57  ;;  %3819 = vmatpush1.bf16.msra.mxu0 %v2347_v2  ;;  %v2458_v57 = vld [vmem:[#allocation2 + $0xb28] sm:$0xff]  ;;  %v2460_v2 = vld [vmem:[#allocation2 + $0xb38] sm:$0xff] }
 0x7d9   :  { %3533 = vmatprep.subr.bf16.mxu1 %v2354_v4  ;;  %3820 = vmatprep.subr.bf16.mxu0 %v2356_v35  ;;  %v2457_v4 = vld [vmem:[#allocation2 + $0xb20] sm:$0xff]  ;;  %v2459_v35 = vld [vmem:[#allocation2 + $0xb30] sm:$0xff] }
 0x7dc   :  { %3534 = vmatpush1.bf16.msra.mxu1 %v2353_v52  ;;  %3821 = vmatpush1.bf16.msra.mxu0 %v2355_v62  ;;  %v2466_v52 = vld [vmem:[#allocation2 + $0xb68] sm:$0xff]  ;;  %v2468_v62 = vld [vmem:[#allocation2 + $0xb78] sm:$0xff] }
 0x7dd   :  { %3544 = vmatprep.subr.bf16.mxu1 %v2362_v0  ;;  %3831 = vmatprep.subr.bf16.mxu0 %v2364_v43  ;;  %v2465_v0 = vld [vmem:[#allocation2 + $0xb60] sm:$0xff]  ;;  %v2467_v43 = vld [vmem:[#allocation2 + $0xb70] sm:$0xff] }
 0x7df   :  { %3536 = vmatmul.mubr.bf16.vlgmr.msra.gmra.mrb[36].mxu1 %v6369_v44  ;;  %3823 = vmatmul.mubr.bf16.vlgmr.msra.gmra.mrb[12].mxu0 %v6369_v44  ;;  %v2388_v44 = vld [vmem:[#allocation2 + $0x8f8] sm:$0xff] }
 0x7e0   :  { %3545 = vmatpush1.bf16.msra.mxu1 %v2361_v7  ;;  %3832 = vmatpush1.bf16.msra.mxu0 %v2363_v53  ;;  %v2474_v7 = vld [vmem:[#allocation2 + $0xba8] sm:$0xff]  ;;  %v2476_v53 = vld [vmem:[#allocation2 + $0xbb8] sm:$0xff] }
 0x7e1   :  { %3546 = vmatprep.subr.bf16.mxu1 %v2370_v60  ;;  %3833 = vmatprep.subr.bf16.mxu0 %v2372_v20  ;;  %v2473_v60 = vld [vmem:[#allocation2 + $0xba0] sm:$0xff]  ;;  %v2475_v20 = vld [vmem:[#allocation2 + $0xbb0] sm:$0xff] }
 0x7e2   :  { %3576 = vmatprep.mubr.bf16.mxu1 %v6371_v51  ;;  %3863 = vmatprep.mubr.bf16.mxu0 %v6371_v51  ;;  %v2393_v51 = vld [vmem:[#allocation2 + $0x920] sm:$0xff] }
 0x7e4   :  { %3547 = vmatpush1.bf16.msra.mxu1 %v2369_v42  ;;  %3834 = vmatpush1.bf16.msra.mxu0 %v2371_v58  ;;  %v2482_v42 = vld [vmem:[#allocation2 + $0xbe8] sm:$0xff]  ;;  %v2484_v58 = vld [vmem:[#allocation2 + $0xbf8] sm:$0xff] }
 0x7e5   :  { %3548 = vmatprep.subr.bf16.mxu1 %v2378_v23  ;;  %3835 = vmatprep.subr.bf16.mxu0 %v2380_v34  ;;  %v2481_v23 = vld [vmem:[#allocation2 + $0xbe0] sm:$0xff]  ;;  %v2483_v34 = vld [vmem:[#allocation2 + $0xbf0] sm:$0xff] }
 0x7e8   :  { %3549 = vmatpush1.bf16.msra.mxu1 %v2377_v33  ;;  %3836 = vmatpush1.bf16.msra.mxu0 %v2379_v18  ;;  %v2490_v33 = vld [vmem:[#allocation2 + $0xc28] sm:$0xff]  ;;  %v2492_v18 = vld [vmem:[#allocation2 + $0xc38] sm:$0xff] }
 0x7e9   :  { %3550 = vmatprep.subr.bf16.mxu1 %v2386_v25  ;;  %3837 = vmatprep.subr.bf16.mxu0 %v2388_v44  ;;  %v2489_v25 = vld [vmem:[#allocation2 + $0xc20] sm:$0xff]  ;;  %v2491_v44 = vld [vmem:[#allocation2 + $0xc30] sm:$0xff] }
 0x7ec   :  { %3551 = vmatpush1.bf16.msra.mxu1 %v2385_v9  ;;  %3838 = vmatpush1.bf16.msra.mxu0 %v2387_v61  ;;  %v2498_v9 = vld [vmem:[#allocation2 + $0xc68] sm:$0xff]  ;;  %v2500_v61 = vld [vmem:[#allocation2 + $0xc78] sm:$0xff] }
 0x7ed   :  { %3552 = vmatprep.subr.bf16.mxu1 %v2394_v59  ;;  %3839 = vmatprep.subr.bf16.mxu0 %v2396_v41  ;;  %v2497_v59 = vld [vmem:[#allocation2 + $0xc60] sm:$0xff]  ;;  %v2499_v41 = vld [vmem:[#allocation2 + $0xc70] sm:$0xff] }
 0x7f0   :  { %3553 = vmatpush1.bf16.msra.mxu1 %v2393_v51  ;;  %3840 = vmatpush1.bf16.msra.mxu0 %v2395_v13  ;;  %v2506_v51 = vld [vmem:[#allocation2 + $0xca8] sm:$0xff]  ;;  %v2508_v13 = vld [vmem:[#allocation2 + $0xcb8] sm:$0xff] }
 0x7f1   :  { %3554 = vmatprep.subr.bf16.mxu1 %v2402_v19  ;;  %3841 = vmatprep.subr.bf16.mxu0 %v2404_v8  ;;  %v2505_v19 = vld [vmem:[#allocation2 + $0xca0] sm:$0xff]  ;;  %v2507_v8 = vld [vmem:[#allocation2 + $0xcb0] sm:$0xff] }
 0x7f4   :  { %3555 = vmatpush1.bf16.msra.mxu1 %v2401_v36  ;;  %3842 = vmatpush1.bf16.msra.mxu0 %v2403_v22  ;;  %v2514_v36 = vld [vmem:[#allocation2 + $0xce8] sm:$0xff]  ;;  %v2513_v22 = vld [vmem:[#allocation2 + $0xce0] sm:$0xff] }
 0x7f5   :  { %3556 = vmatprep.subr.bf16.mxu1 %v2410_v63  ;;  %3843 = vmatprep.subr.bf16.mxu0 %v2412_v45  ;;  %v2515_v63 = vld [vmem:[#allocation2 + $0xcf0] sm:$0xff]  ;;  %v2522_v45 = vld [vmem:[#allocation2 + $0xd28] sm:$0xff] }
 0x7f8   :  { %3557 = vmatpush1.bf16.msra.mxu1 %v2409_v12  ;;  %3844 = vmatpush1.bf16.msra.mxu0 %v2411_v3  ;;  %v2524_v12 = vld [vmem:[#allocation2 + $0xd38] sm:$0xff]  ;;  %v2523_v3 = vld [vmem:[#allocation2 + $0xd30] sm:$0xff] }
 0x7f9   :  { %3558 = vmatprep.subr.bf16.mxu1 %v2418_v39  ;;  %3845 = vmatprep.subr.bf16.mxu0 %v2420_v47  ;;  %v2530_v39 = vld [vmem:[#allocation2 + $0xd68] sm:$0xff]  ;;  %v2532_v47 = vld [vmem:[#allocation2 + $0xd78] sm:$0xff] }
 0x7fc   :  { %3559 = vmatpush1.bf16.msra.mxu1 %v2417_v31  ;;  %3846 = vmatpush1.bf16.msra.mxu0 %v2419_v27  ;;  %v2529_v31 = vld [vmem:[#allocation2 + $0xd60] sm:$0xff]  ;;  %v2531_v27 = vld [vmem:[#allocation2 + $0xd70] sm:$0xff] }
 0x7fd   :  { %3560 = vmatprep.subr.bf16.mxu1 %v2426_v24  ;;  %3847 = vmatprep.subr.bf16.mxu0 %v2428_v29 }
 0x800   :  { %3561 = vmatpush1.bf16.msra.mxu1 %v2425_v10  ;;  %3848 = vmatpush1.bf16.msra.mxu0 %v2427_v50  ;;  %v2538_v10 = vld [vmem:[#allocation2 + $0xda8] sm:$0xff]  ;;  %v2540_v50 = vld [vmem:[#allocation2 + $0xdb8] sm:$0xff] }
 0x801   :  { %3562 = vmatprep.subr.bf16.mxu1 %v2434_v17  ;;  %3849 = vmatprep.subr.bf16.mxu0 %v2436_v14 }
 0x804   :  { %3563 = vmatpush1.bf16.msra.mxu1 %v2433_v28  ;;  %3850 = vmatpush1.bf16.msra.mxu0 %v2435_v32 }
 0x805   :  { %3564 = vmatprep.subr.bf16.mxu1 %v2442_v37  ;;  %3851 = vmatprep.subr.bf16.mxu0 %v2444_v46 }
 0x808   :  { %3565 = vmatpush1.bf16.msra.mxu1 %v2441_v11  ;;  %3852 = vmatpush1.bf16.msra.mxu0 %v2443_v1 }
 0x809   :  { %3566 = vmatprep.subr.bf16.mxu1 %v2450_v48  ;;  %3853 = vmatprep.subr.bf16.mxu0 %v2452_v15  ;;  %v2537_v48 = vld [vmem:[#allocation2 + $0xda0] sm:$0xff]  ;;  %v2539_v15 = vld [vmem:[#allocation2 + $0xdb0] sm:$0xff] }
 0x80c   :  { %3567 = vmatpush1.bf16.msra.mxu1 %v2449_v49  ;;  %3854 = vmatpush1.bf16.msra.mxu0 %v2451_v38 }
 0x80d   :  { %3568 = vmatprep.subr.bf16.mxu1 %v2458_v57  ;;  %3855 = vmatprep.subr.bf16.mxu0 %v2460_v2 }
 0x810   :  { %3569 = vmatpush1.bf16.msra.mxu1 %v2457_v4  ;;  %3856 = vmatpush1.bf16.msra.mxu0 %v2459_v35 }
 0x811   :  { %3570 = vmatprep.subr.bf16.mxu1 %v2466_v52  ;;  %3857 = vmatprep.subr.bf16.mxu0 %v2468_v62  ;;  %v2546_v52 = vld [vmem:[#allocation2 + $0xde8] sm:$0xff]  ;;  %v2548_v62 = vld [vmem:[#allocation2 + $0xdf8] sm:$0xff] }
 0x814   :  { %3571 = vmatpush1.bf16.msra.mxu1 %v2465_v0  ;;  %3858 = vmatpush1.bf16.msra.mxu0 %v2467_v43  ;;  %v2545_v0 = vld [vmem:[#allocation2 + $0xde0] sm:$0xff]  ;;  %v2547_v43 = vld [vmem:[#allocation2 + $0xdf0] sm:$0xff] }
 0x815   :  { %3572 = vmatprep.subr.bf16.mxu1 %v2474_v7  ;;  %3859 = vmatprep.subr.bf16.mxu0 %v2476_v53  ;;  %v2554_v7 = vld [vmem:[#allocation2 + $0xe28] sm:$0xff]  ;;  %v2556_v53 = vld [vmem:[#allocation2 + $0xe38] sm:$0xff] }
 0x818   :  { %3573 = vmatpush1.bf16.msra.mxu1 %v2473_v60  ;;  %3860 = vmatpush1.bf16.msra.mxu0 %v2475_v20  ;;  %v2553_v60 = vld [vmem:[#allocation2 + $0xe20] sm:$0xff]  ;;  %v2555_v20 = vld [vmem:[#allocation2 + $0xe30] sm:$0xff] }
 0x819   :  { %3574 = vmatprep.subr.bf16.mxu1 %v2482_v42  ;;  %3861 = vmatprep.subr.bf16.mxu0 %v2484_v58  ;;  %v2562_v42 = vld [vmem:[#allocation2 + $0xe68] sm:$0xff]  ;;  %v2564_v58 = vld [vmem:[#allocation2 + $0xe78] sm:$0xff] }
 0x81c   :  { %3575 = vmatpush1.bf16.msra.mxu1 %v2481_v23  ;;  %3862 = vmatpush1.bf16.msra.mxu0 %v2483_v34  ;;  %v2561_v34 = vld [vmem:[#allocation2 + $0xe60] sm:$0xff] }
 0x81d   :  { %3585 = vmatprep.subr.bf16.mxu1 %v2490_v33  ;;  %3872 = vmatprep.subr.bf16.mxu0 %v2492_v18  ;;  %v2563_v33 = vld [vmem:[#allocation2 + $0xe70] sm:$0xff] }
 0x81f   :  { %3577 = vmatmul.mubr.bf16.vlgmr.msra.gmra.mrb[36].mxu1 %v6383_v54  ;;  %3864 = vmatmul.mubr.bf16.vlgmr.msra.gmra.mrb[12].mxu0 %v6383_v54  ;;  %v2516_v54 = vld [vmem:[#allocation2 + $0xcf8] sm:$0xff] }
 0x820   :  { %3586 = vmatpush1.bf16.msra.mxu1 %v2489_v25  ;;  %3873 = vmatpush1.bf16.msra.mxu0 %v2491_v44  ;;  %v2570_v44 = vld [vmem:[#allocation2 + $0xea8] sm:$0xff] }
 0x821   :  { %3587 = vmatprep.subr.bf16.mxu1 %v2498_v9  ;;  %3874 = vmatprep.subr.bf16.mxu0 %v2500_v61  ;;  %v2572_v9 = vld [vmem:[#allocation2 + $0xeb8] sm:$0xff] }
 0x822   :  { %3617 = vmatprep.mubr.bf16.mxu1 %v6385_v6  ;;  %3904 = vmatprep.mubr.bf16.mxu0 %v6385_v6  ;;  %v2521_v6 = vld [vmem:[#allocation2 + $0xd20] sm:$0xff] }
 0x824   :  { %3588 = vmatpush1.bf16.msra.mxu1 %v2497_v59  ;;  %3875 = vmatpush1.bf16.msra.mxu0 %v2499_v41 }
 0x825   :  { %3589 = vmatprep.subr.bf16.mxu1 %v2506_v51  ;;  %3876 = vmatprep.subr.bf16.mxu0 %v2508_v13 }
 0x828   :  { %3590 = vmatpush1.bf16.msra.mxu1 %v2505_v19  ;;  %3877 = vmatpush1.bf16.msra.mxu0 %v2507_v8  ;;  %v2569_v19 = vld [vmem:[#allocation2 + $0xea0] sm:$0xff]  ;;  %v2571_v8 = vld [vmem:[#allocation2 + $0xeb0] sm:$0xff] }
 0x829   :  { %3591 = vmatprep.subr.bf16.mxu1 %v2514_v36  ;;  %3878 = vmatprep.subr.bf16.mxu0 %v2516_v54  ;;  %v2578_v36 = vld [vmem:[#allocation2 + $0xee8] sm:$0xff]  ;;  %v2580_v54 = vld [vmem:[#allocation2 + $0xef8] sm:$0xff] }
 0x82c   :  { %3592 = vmatpush1.bf16.msra.mxu1 %v2513_v22  ;;  %3879 = vmatpush1.bf16.msra.mxu0 %v2515_v63  ;;  %v2577_v22 = vld [vmem:[#allocation2 + $0xee0] sm:$0xff]  ;;  %v2579_v63 = vld [vmem:[#allocation2 + $0xef0] sm:$0xff] }
 0x82d   :  { %3593 = vmatprep.subr.bf16.mxu1 %v2522_v45  ;;  %3880 = vmatprep.subr.bf16.mxu0 %v2524_v12  ;;  %v2586_v45 = vld [vmem:[#allocation2 + $0xf28] sm:$0xff]  ;;  %v2588_v12 = vld [vmem:[#allocation2 + $0xf38] sm:$0xff] }
 0x830   :  { %3594 = vmatpush1.bf16.msra.mxu1 %v2521_v6  ;;  %3881 = vmatpush1.bf16.msra.mxu0 %v2523_v3  ;;  %v2585_v6 = vld [vmem:[#allocation2 + $0xf20] sm:$0xff]  ;;  %v2587_v3 = vld [vmem:[#allocation2 + $0xf30] sm:$0xff] }
 0x831   :  { %3595 = vmatprep.subr.bf16.mxu1 %v2530_v39  ;;  %3882 = vmatprep.subr.bf16.mxu0 %v2532_v47  ;;  %v2594_v47 = vld [vmem:[#allocation2 + $0xf68] sm:$0xff] }
 0x832   :  { %v3168_v24 = vpop.f32.mrb[32].mxu1  ;;  %v3455_v29 = vpop.f32.mrb[8].mxu0 }
 0x833   :  { %v4036_v17 = vsub.f32 0.0, %v3168_v24  ;;  %v4038_v14 = vsub.f32 0.0, %v3455_v29  ;;  %v3170_v28 = vpop.f32.mrb[33].mxu1  ;;  %v3457_v32 = vpop.f32.mrb[9].mxu0 }
 0x834   :  { %v4037_v37 = vsub.f32 0.0, %v3170_v28  ;;  %v4039_v46 = vsub.f32 0.0, %v3457_v32  ;;  %3596 = vmatpush1.bf16.msra.mxu1 %v2529_v31  ;;  %3883 = vmatpush1.bf16.msra.mxu0 %v2531_v27  ;;  %v3172_v11 = vpop.f32.mrb[34].mxu1  ;;  %v3459_v1 = vpop.f32.mrb[10].mxu0  ;;  %v2596_v31 = vld [vmem:[#allocation2 + $0xf78] sm:$0xff] }
 0x835   :  { %v4044_v49 = vmul.f32 1.442695, %v4036_v17  ;;  %v4048_v38 = vmul.f32 1.442695, %v4038_v14  ;;  %v3173_v57 = vpop.f32.mrb[35].mxu1  ;;  %v3460_v2 = vpop.f32.mrb[11].mxu0  ;;  %3597 = vmatprep.subr.bf16.mxu1 %v2538_v10  ;;  %3884 = vmatprep.subr.bf16.mxu0 %v2540_v50 }
 0x836   :  { %v4046_v4 = vmul.f32 1.442695, %v4037_v37  ;;  %v4050_v35 = vmul.f32 1.442695, %v4039_v46  ;;  %v2593_v10 = vld [vmem:[#allocation2 + $0xf60] sm:$0xff]  ;;  %v2595_v50 = vld [vmem:[#allocation2 + $0xf70] sm:$0xff] }
 0x837   :  { %4910 = vpow2.f32 %v4044_v49  ;;  %v2602_v14 = vld [vmem:[#allocation2 + $0xfa8] sm:$0xff]  ;;  %v2604_v28 = vld [vmem:[#allocation2 + $0xfb8] sm:$0xff]  ;;  %v2601_v11 = vld [vmem:[#allocation2 + $0xfa0] sm:$0xff] }
 0x838   :  { %4912 = vpow2.f32 %v4048_v38  ;;  %3598 = vmatpush1.bf16.msra.mxu1 %v2537_v48  ;;  %3885 = vmatpush1.bf16.msra.mxu0 %v2539_v15  ;;  %v2603_v1 = vld [vmem:[#allocation2 + $0xfb0] sm:$0xff]  ;;  %v2610_v48 = vld [vmem:[#allocation2 + $0xfe8] sm:$0xff]  ;;  %v2612_v15 = vld [vmem:[#allocation2 + $0xff8] sm:$0xff] }
 0x839   :  { %4914 = vpow2.f32 %v4046_v4  ;;  %3599 = vmatprep.subr.bf16.mxu1 %v2546_v52  ;;  %3886 = vmatprep.subr.bf16.mxu0 %v2548_v62  ;;  %v2609_v38 = vld [vmem:[#allocation2 + $0xfe0] sm:$0xff]  ;;  %v2611_v57 = vld [vmem:[#allocation2 + $0xff0] sm:$0xff]  ;;  %v2618_v2 = vld [vmem:[#allocation2 + $0x1028] sm:$0xff] }
 0x83a   :  { %4916 = vpow2.f32 %v4050_v35  ;;  %v2620_v4 = vld [vmem:[#allocation2 + $0x1038] sm:$0xff]  ;;  %v2617_v35 = vld [vmem:[#allocation2 + $0x1020] sm:$0xff]  ;;  %v2619_v52 = vld [vmem:[#allocation2 + $0x1030] sm:$0xff] }
 0x83b   :  { %v2626_v62 = vld [vmem:[#allocation2 + $0x1068] sm:$0xff] }
 0x83c   :  { %3600 = vmatpush1.bf16.msra.mxu1 %v2545_v0  ;;  %3887 = vmatpush1.bf16.msra.mxu0 %v2547_v43  ;;  %v2628_v0 = vld [vmem:[#allocation2 + $0x1078] sm:$0xff]  ;;  %v2625_v43 = vld [vmem:[#allocation2 + $0x1060] sm:$0xff] }
 0x83d   :  { %3601 = vmatprep.subr.bf16.mxu1 %v2554_v7  ;;  %3888 = vmatprep.subr.bf16.mxu0 %v2556_v53  ;;  %v2627_v7 = vld [vmem:[#allocation2 + $0x1070] sm:$0xff]  ;;  %v2634_v53 = vld [vmem:[#allocation2 + $0x10a8] sm:$0xff] }
 0x840   :  { %3602 = vmatpush1.bf16.msra.mxu1 %v2553_v60  ;;  %3889 = vmatpush1.bf16.msra.mxu0 %v2555_v20  ;;  %v2636_v60 = vld [vmem:[#allocation2 + $0x10b8] sm:$0xff]  ;;  %v2633_v20 = vld [vmem:[#allocation2 + $0x10a0] sm:$0xff] }
 0x841   :  { %v4911_v23 = vpop.eup %4910  ;;  %3603 = vmatprep.subr.bf16.mxu1 %v2562_v42  ;;  %3890 = vmatprep.subr.bf16.mxu0 %v2564_v58  ;;  %v2635_v42 = vld [vmem:[#allocation2 + $0x10b0] sm:$0xff]  ;;  %v2642_v58 = vld [vmem:[#allocation2 + $0x10e8] sm:$0xff] }
 0x842   :  { %v4913_v18 = vpop.eup %4912  ;;  %v4060_v25 = vadd.f32 1.0, %v4911_v23  ;;  %v2641_v23 = vld [vmem:[#allocation2 + $0x10e0] sm:$0xff] }
 0x843   :  { %v4915_v61 = vpop.eup %4914  ;;  %v4062_v59 = vadd.f32 1.0, %v4913_v18  ;;  %v2652_v18 = vld [vmem:[#allocation2 + $0x1138] sm:$0xff] }
 0x844   :  { %v4917_v41 = vpop.eup %4916  ;;  %4918 = vrcp.f32 %v4060_v25  ;;  %v4061_v51 = vadd.f32 1.0, %v4915_v61  ;;  %3604 = vmatpush1.bf16.msra.mxu1 %v2561_v34  ;;  %3891 = vmatpush1.bf16.msra.mxu0 %v2563_v33  ;;  %v2643_v34 = vld [vmem:[#allocation2 + $0x10f0] sm:$0xff]  ;;  %v2650_v33 = vld [vmem:[#allocation2 + $0x1128] sm:$0xff]  ;;  %v2657_v61 = vld [vmem:[#allocation2 + $0x1160] sm:$0xff] }
 0x845   :  { %4920 = vrcp.f32 %v4062_v59  ;;  %v4063_v13 = vadd.f32 1.0, %v4917_v41  ;;  %3605 = vmatprep.subr.bf16.mxu1 %v2570_v44  ;;  %3892 = vmatprep.subr.bf16.mxu0 %v2572_v9  ;;  %v2651_v25 = vld [vmem:[#allocation2 + $0x1130] sm:$0xff]  ;;  %v2658_v44 = vld [vmem:[#allocation2 + $0x1168] sm:$0xff]  ;;  %v2660_v9 = vld [vmem:[#allocation2 + $0x1178] sm:$0xff] }
 0x846   :  { %4922 = vrcp.f32 %v4061_v51  ;;  %v2659_v59 = vld [vmem:[#allocation2 + $0x1170] sm:$0xff]  ;;  %v2666_v41 = vld [vmem:[#allocation2 + $0x11a8] sm:$0xff]  ;;  %v2668_v51 = vld [vmem:[#allocation2 + $0x11b8] sm:$0xff] }
 0x847   :  { %4924 = vrcp.f32 %v4063_v13  ;;  %v2665_v13 = vld [vmem:[#allocation2 + $0x11a0] sm:$0xff] }
 0x848   :  { %3606 = vmatpush1.bf16.msra.mxu1 %v2569_v19  ;;  %3893 = vmatpush1.bf16.msra.mxu0 %v2571_v8  ;;  %v2667_v19 = vld [vmem:[#allocation2 + $0x11b0] sm:$0xff]  ;;  %v2674_v8 = vld [vmem:[#allocation2 + $0x11e8] sm:$0xff] }
 0x849   :  { %3607 = vmatprep.subr.bf16.mxu1 %v2578_v36  ;;  %3894 = vmatprep.subr.bf16.mxu0 %v2580_v54  ;;  %v2676_v36 = vld [vmem:[#allocation2 + $0x11f8] sm:$0xff]  ;;  %v2673_v54 = vld [vmem:[#allocation2 + $0x11e0] sm:$0xff] }
 0x84c   :  { %3608 = vmatpush1.bf16.msra.mxu1 %v2577_v22  ;;  %3895 = vmatpush1.bf16.msra.mxu0 %v2579_v63  ;;  %v2675_v22 = vld [vmem:[#allocation2 + $0x11f0] sm:$0xff]  ;;  %v2682_v63 = vld [vmem:[#allocation2 + $0x1228] sm:$0xff] }
 0x84d   :  { %3609 = vmatprep.subr.bf16.mxu1 %v2586_v45  ;;  %3896 = vmatprep.subr.bf16.mxu0 %v2588_v12  ;;  %v2684_v45 = vld [vmem:[#allocation2 + $0x1238] sm:$0xff]  ;;  %v2681_v12 = vld [vmem:[#allocation2 + $0x1220] sm:$0xff] }
 0x84e   :  { %v4919_v39 = vpop.eup %4918 }
 0x84f   :  { %v4921_v27 = vpop.eup %4920 }
 0x850   :  { %v4923_v24 = vpop.eup %4922  ;;  %3610 = vmatpush1.bf16.msra.mxu1 %v2585_v6  ;;  %3897 = vmatpush1.bf16.msra.mxu0 %v2587_v3  ;;  %v2683_v6 = vld [vmem:[#allocation2 + $0x1230] sm:$0xff]  ;;  %v2690_v3 = vld [vmem:[#allocation2 + $0x1268] sm:$0xff] }
 0x851   :  { %v4925_v29 = vpop.eup %4924  ;;  %3611 = vmatprep.subr.bf16.mxu1 %v2594_v47  ;;  %3898 = vmatprep.subr.bf16.mxu0 %v2596_v31  ;;  %v4084_v17 = vcombine.low %v4919_v39, %v4923_v24  ;;  %v2692_v39 = vld [vmem:[#allocation2 + $0x1278] sm:$0xff]  ;;  %v2689_v47 = vld [vmem:[#allocation2 + $0x1260] sm:$0xff]  ;;  %v2691_v31 = vld [vmem:[#allocation2 + $0x1270] sm:$0xff] }
 0x852   :  { %v4085_v32 = vcombine.low %v4921_v27, %v4925_v29  ;;  %v2698_v27 = vld [vmem:[#allocation2 + $0x12a8] sm:$0xff]  ;;  %v2700_v24 = vld [vmem:[#allocation2 + $0x12b8] sm:$0xff]  ;;  %v2697_v29 = vld [vmem:[#allocation2 + $0x12a0] sm:$0xff] }
 0x853   :  { %v6453_v37 = vrot.slane %v4084_v17, %v5939_v55  ;;  %v2708_v17 = vld [vmem:[#allocation2 + $0x12f8] sm:$0xff] }
 0x854   :  { %3612 = vmatpush1.bf16.msra.mxu1 %v2593_v10  ;;  %3899 = vmatpush1.bf16.msra.mxu0 %v2595_v50  ;;  %v6456_v46 = vrot.slane %v4085_v32, %v5939_v55  ;;  %v2699_v10 = vld [vmem:[#allocation2 + $0x12b0] sm:$0xff]  ;;  %v2706_v50 = vld [vmem:[#allocation2 + $0x12e8] sm:$0xff] }
 0x855   :  { %3613 = vmatprep.subr.bf16.mxu1 %v2602_v14  ;;  %3900 = vmatprep.subr.bf16.mxu0 %v2604_v28  ;;  %v2705_v14 = vld [vmem:[#allocation2 + $0x12e0] sm:$0xff]  ;;  %v2707_v28 = vld [vmem:[#allocation2 + $0x12f0] sm:$0xff]  ;;  %v2714_v32 = vld [vmem:[#allocation2 + $0x1328] sm:$0xff] }
 0x856   :  { %v4116_v49 = vcombine.low %v6453_v37, %v6456_v46 }
 0x858   :  { %3614 = vmatpush1.bf16.msra.mxu1 %v2601_v11  ;;  %3901 = vmatpush1.bf16.msra.mxu0 %v2603_v1  ;;  %v2716_v11 = vld [vmem:[#allocation2 + $0x1338] sm:$0xff]  ;;  %v2713_v1 = vld [vmem:[#allocation2 + $0x1320] sm:$0xff] }
 0x859   :  { %3615 = vmatprep.subr.bf16.mxu1 %v2610_v48  ;;  %3902 = vmatprep.subr.bf16.mxu0 %v2612_v15  ;;  %v2715_v48 = vld [vmem:[#allocation2 + $0x1330] sm:$0xff]  ;;  %v2722_v15 = vld [vmem:[#allocation2 + $0x1368] sm:$0xff] }
 0x85c   :  { %3616 = vmatpush1.bf16.msra.mxu1 %v2609_v38  ;;  %3903 = vmatpush1.bf16.msra.mxu0 %v2611_v57  ;;  %v2724_v38 = vld [vmem:[#allocation2 + $0x1378] sm:$0xff]  ;;  %v2721_v57 = vld [vmem:[#allocation2 + $0x1360] sm:$0xff] }
 0x85d   :  { %3626 = vmatprep.subr.bf16.mxu1 %v2618_v2  ;;  %3913 = vmatprep.subr.bf16.mxu0 %v2620_v4  ;;  %v2723_v2 = vld [vmem:[#allocation2 + $0x1370] sm:$0xff]  ;;  %v2730_v4 = vld [vmem:[#allocation2 + $0x13a8] sm:$0xff] }
 0x85f   :  { %3618 = vmatmul.mubr.bf16.vlgmr.msra.gmra.mrb[36].mxu1 %v6398_v16  ;;  %3905 = vmatmul.mubr.bf16.vlgmr.msra.gmra.mrb[12].mxu0 %v6398_v16  ;;  %v2644_v16 = vld [vmem:[#allocation2 + $0x10f8] sm:$0xff] }
 0x860   :  { %3627 = vmatpush1.bf16.msra.mxu1 %v2617_v35  ;;  %3914 = vmatpush1.bf16.msra.mxu0 %v2619_v52  ;;  %v2732_v35 = vld [vmem:[#allocation2 + $0x13b8] sm:$0xff]  ;;  %v2729_v52 = vld [vmem:[#allocation2 + $0x13a0] sm:$0xff] }
 0x861   :  { %3628 = vmatprep.subr.bf16.mxu1 %v2626_v62  ;;  %3915 = vmatprep.subr.bf16.mxu0 %v2628_v0  ;;  %v2731_v62 = vld [vmem:[#allocation2 + $0x13b0] sm:$0xff]  ;;  %v2738_v0 = vld [vmem:[#allocation2 + $0x13e8] sm:$0xff] }
 0x862   :  { %3658 = vmatprep.mubr.bf16.mxu1 %v6400_v56  ;;  %3945 = vmatprep.mubr.bf16.mxu0 %v6400_v56  ;;  %v2649_v56 = vld [vmem:[#allocation2 + $0x1120] sm:$0xff] }
 0x864   :  { %3629 = vmatpush1.bf16.msra.mxu1 %v2625_v43  ;;  %3916 = vmatpush1.bf16.msra.mxu0 %v2627_v7  ;;  %v2740_v43 = vld [vmem:[#allocation2 + $0x13f8] sm:$0xff]  ;;  %v2737_v7 = vld [vmem:[#allocation2 + $0x13e0] sm:$0xff] }
 0x865   :  { %3630 = vmatprep.subr.bf16.mxu1 %v2634_v53  ;;  %3917 = vmatprep.subr.bf16.mxu0 %v2636_v60  ;;  %v2739_v53 = vld [vmem:[#allocation2 + $0x13f0] sm:$0xff]  ;;  %v2746_v60 = vld [vmem:[#allocation2 + $0x1428] sm:$0xff] }
 0x868   :  { %3631 = vmatpush1.bf16.msra.mxu1 %v2633_v20  ;;  %3918 = vmatpush1.bf16.msra.mxu0 %v2635_v42  ;;  %v2748_v20 = vld [vmem:[#allocation2 + $0x1438] sm:$0xff]  ;;  %v2745_v42 = vld [vmem:[#allocation2 + $0x1420] sm:$0xff] }
 0x869   :  { %3632 = vmatprep.subr.bf16.mxu1 %v2642_v58  ;;  %3919 = vmatprep.subr.bf16.mxu0 %v2644_v16  ;;  %v2747_v58 = vld [vmem:[#allocation2 + $0x1430] sm:$0xff]  ;;  %v2754_v16 = vld [vmem:[#allocation2 + $0x1468] sm:$0xff] }
 0x86c   :  { %3633 = vmatpush1.bf16.msra.mxu1 %v2641_v23  ;;  %3920 = vmatpush1.bf16.msra.mxu0 %v2643_v34  ;;  %v2756_v23 = vld [vmem:[#allocation2 + $0x1478] sm:$0xff]  ;;  %v2753_v34 = vld [vmem:[#allocation2 + $0x1460] sm:$0xff] }
 0x86d   :  { %3634 = vmatprep.subr.bf16.mxu1 %v2650_v33  ;;  %3921 = vmatprep.subr.bf16.mxu0 %v2652_v18  ;;  %v2755_v33 = vld [vmem:[#allocation2 + $0x1470] sm:$0xff]  ;;  %v2762_v18 = vld [vmem:[#allocation2 + $0x14a8] sm:$0xff] }
 0x870   :  { %3635 = vmatpush1.bf16.msra.mxu1 %v2649_v56  ;;  %3922 = vmatpush1.bf16.msra.mxu0 %v2651_v25  ;;  %v2764_v56 = vld [vmem:[#allocation2 + $0x14b8] sm:$0xff]  ;;  %v2761_v25 = vld [vmem:[#allocation2 + $0x14a0] sm:$0xff] }
 0x871   :  { %3636 = vmatprep.subr.bf16.mxu1 %v2658_v44  ;;  %3923 = vmatprep.subr.bf16.mxu0 %v2660_v9  ;;  %v2763_v44 = vld [vmem:[#allocation2 + $0x14b0] sm:$0xff]  ;;  %v2770_v9 = vld [vmem:[#allocation2 + $0x14e8] sm:$0xff] }
 0x874   :  { %3637 = vmatpush1.bf16.msra.mxu1 %v2657_v61  ;;  %3924 = vmatpush1.bf16.msra.mxu0 %v2659_v59  ;;  %v2769_v61 = vld [vmem:[#allocation2 + $0x14e0] sm:$0xff]  ;;  %v2771_v59 = vld [vmem:[#allocation2 + $0x14f0] sm:$0xff] }
 0x875   :  { %3638 = vmatprep.subr.bf16.mxu1 %v2666_v41  ;;  %3925 = vmatprep.subr.bf16.mxu0 %v2668_v51  ;;  %v2778_v41 = vld [vmem:[#allocation2 + $0x1528] sm:$0xff]  ;;  %v2780_v51 = vld [vmem:[#allocation2 + $0x1538] sm:$0xff] }
 0x878   :  { %3639 = vmatpush1.bf16.msra.mxu1 %v2665_v13  ;;  %3926 = vmatpush1.bf16.msra.mxu0 %v2667_v19  ;;  %v2779_v13 = vld [vmem:[#allocation2 + $0x1530] sm:$0xff]  ;;  %v2786_v19 = vld [vmem:[#allocation2 + $0x1568] sm:$0xff] }
 0x879   :  { %3640 = vmatprep.subr.bf16.mxu1 %v2674_v8  ;;  %3927 = vmatprep.subr.bf16.mxu0 %v2676_v36  ;;  %v2788_v8 = vld [vmem:[#allocation2 + $0x1578] sm:$0xff]  ;;  %v2785_v36 = vld [vmem:[#allocation2 + $0x1560] sm:$0xff] }
 0x87c   :  { %3641 = vmatpush1.bf16.msra.mxu1 %v2673_v54  ;;  %3928 = vmatpush1.bf16.msra.mxu0 %v2675_v22  ;;  %v2787_v54 = vld [vmem:[#allocation2 + $0x1570] sm:$0xff]  ;;  %v2794_v22 = vld [vmem:[#allocation2 + $0x15a8] sm:$0xff] }
 0x87d   :  { %3642 = vmatprep.subr.bf16.mxu1 %v2682_v63  ;;  %3929 = vmatprep.subr.bf16.mxu0 %v2684_v45  ;;  %v2796_v63 = vld [vmem:[#allocation2 + $0x15b8] sm:$0xff]  ;;  %v2793_v45 = vld [vmem:[#allocation2 + $0x15a0] sm:$0xff] }
 0x880   :  { %3643 = vmatpush1.bf16.msra.mxu1 %v2681_v12  ;;  %3930 = vmatpush1.bf16.msra.mxu0 %v2683_v6  ;;  %v2795_v12 = vld [vmem:[#allocation2 + $0x15b0] sm:$0xff]  ;;  %v2802_v6 = vld [vmem:[#allocation2 + $0x15e8] sm:$0xff] }
 0x881   :  { %3644 = vmatprep.subr.bf16.mxu1 %v2690_v3  ;;  %3931 = vmatprep.subr.bf16.mxu0 %v2692_v39  ;;  %v2804_v3 = vld [vmem:[#allocation2 + $0x15f8] sm:$0xff]  ;;  %v2801_v39 = vld [vmem:[#allocation2 + $0x15e0] sm:$0xff] }
 0x884   :  { %3645 = vmatpush1.bf16.msra.mxu1 %v2689_v47  ;;  %3932 = vmatpush1.bf16.msra.mxu0 %v2691_v31  ;;  %v2803_v47 = vld [vmem:[#allocation2 + $0x15f0] sm:$0xff]  ;;  %v2810_v31 = vld [vmem:[#allocation2 + $0x1628] sm:$0xff] }
 0x885   :  { %3646 = vmatprep.subr.bf16.mxu1 %v2698_v27  ;;  %3933 = vmatprep.subr.bf16.mxu0 %v2700_v24  ;;  %v2812_v27 = vld [vmem:[#allocation2 + $0x1638] sm:$0xff]  ;;  %v2809_v24 = vld [vmem:[#allocation2 + $0x1620] sm:$0xff] }
 0x888   :  { %3647 = vmatpush1.bf16.msra.mxu1 %v2697_v29  ;;  %3934 = vmatpush1.bf16.msra.mxu0 %v2699_v10  ;;  %v2811_v29 = vld [vmem:[#allocation2 + $0x1630] sm:$0xff]  ;;  %v2818_v10 = vld [vmem:[#allocation2 + $0x1668] sm:$0xff] }
 0x889   :  { %3648 = vmatprep.subr.bf16.mxu1 %v2706_v50  ;;  %3935 = vmatprep.subr.bf16.mxu0 %v2708_v17  ;;  %v2820_v50 = vld [vmem:[#allocation2 + $0x1678] sm:$0xff]  ;;  %v2817_v17 = vld [vmem:[#allocation2 + $0x1660] sm:$0xff] }
 0x88c   :  { %3649 = vmatpush1.bf16.msra.mxu1 %v2705_v14  ;;  %3936 = vmatpush1.bf16.msra.mxu0 %v2707_v28  ;;  %v2819_v14 = vld [vmem:[#allocation2 + $0x1670] sm:$0xff]  ;;  %v2826_v28 = vld [vmem:[#allocation2 + $0x16a8] sm:$0xff] }
 0x88d   :  { %3650 = vmatprep.subr.bf16.mxu1 %v2714_v32  ;;  %3937 = vmatprep.subr.bf16.mxu0 %v2716_v11  ;;  %v2828_v32 = vld [vmem:[#allocation2 + $0x16b8] sm:$0xff]  ;;  %v2825_v11 = vld [vmem:[#allocation2 + $0x16a0] sm:$0xff] }
 0x890   :  { %3651 = vmatpush1.bf16.msra.mxu1 %v2713_v1  ;;  %3938 = vmatpush1.bf16.msra.mxu0 %v2715_v48  ;;  %v2827_v1 = vld [vmem:[#allocation2 + $0x16b0] sm:$0xff]  ;;  %v2834_v48 = vld [vmem:[#allocation2 + $0x16e8] sm:$0xff] }
 0x891   :  { %3652 = vmatprep.subr.bf16.mxu1 %v2722_v15  ;;  %3939 = vmatprep.subr.bf16.mxu0 %v2724_v38  ;;  %v2836_v15 = vld [vmem:[#allocation2 + $0x16f8] sm:$0xff]  ;;  %v2833_v38 = vld [vmem:[#allocation2 + $0x16e0] sm:$0xff] }
 0x894   :  { %3653 = vmatpush1.bf16.msra.mxu1 %v2721_v57  ;;  %3940 = vmatpush1.bf16.msra.mxu0 %v2723_v2  ;;  %v2835_v57 = vld [vmem:[#allocation2 + $0x16f0] sm:$0xff]  ;;  %v2842_v2 = vld [vmem:[#allocation2 + $0x1728] sm:$0xff] }
 0x895   :  { %3654 = vmatprep.subr.bf16.mxu1 %v2730_v4  ;;  %3941 = vmatprep.subr.bf16.mxu0 %v2732_v35  ;;  %v2844_v4 = vld [vmem:[#allocation2 + $0x1738] sm:$0xff]  ;;  %v2841_v35 = vld [vmem:[#allocation2 + $0x1720] sm:$0xff] }
 0x898   :  { %3655 = vmatpush1.bf16.msra.mxu1 %v2729_v52  ;;  %3942 = vmatpush1.bf16.msra.mxu0 %v2731_v62  ;;  %v2843_v52 = vld [vmem:[#allocation2 + $0x1730] sm:$0xff]  ;;  %v2850_v62 = vld [vmem:[#allocation2 + $0x1768] sm:$0xff] }
 0x899   :  { %3656 = vmatprep.subr.bf16.mxu1 %v2738_v0  ;;  %3943 = vmatprep.subr.bf16.mxu0 %v2740_v43  ;;  %v2852_v0 = vld [vmem:[#allocation2 + $0x1778] sm:$0xff]  ;;  %v2849_v43 = vld [vmem:[#allocation2 + $0x1760] sm:$0xff] }
 0x89c   :  { %3657 = vmatpush1.bf16.msra.mxu1 %v2737_v7  ;;  %3944 = vmatpush1.bf16.msra.mxu0 %v2739_v53  ;;  %v2851_v7 = vld [vmem:[#allocation2 + $0x1770] sm:$0xff]  ;;  %v2858_v53 = vld [vmem:[#allocation2 + $0x17a8] sm:$0xff] }
 0x89d   :  { %3667 = vmatprep.subr.bf16.mxu1 %v2746_v60  ;;  %3954 = vmatprep.subr.bf16.mxu0 %v2748_v20  ;;  %v2860_v60 = vld [vmem:[#allocation2 + $0x17b8] sm:$0xff]  ;;  %v2857_v20 = vld [vmem:[#allocation2 + $0x17a0] sm:$0xff] }
 0x89f   :  { %3659 = vmatmul.mubr.bf16.vlgmr.msra.gmra.mrb[36].mxu1 %v6412_v40  ;;  %3946 = vmatmul.mubr.bf16.vlgmr.msra.gmra.mrb[12].mxu0 %v6412_v40  ;;  %v2772_v40 = vld [vmem:[#allocation2 + $0x14f8] sm:$0xff] }
 0x8a0   :  { %3668 = vmatpush1.bf16.msra.mxu1 %v2745_v42  ;;  %3955 = vmatpush1.bf16.msra.mxu0 %v2747_v58  ;;  %v2859_v42 = vld [vmem:[#allocation2 + $0x17b0] sm:$0xff]  ;;  %v2866_v58 = vld [vmem:[#allocation2 + $0x17e8] sm:$0xff] }
 0x8a1   :  { %3669 = vmatprep.subr.bf16.mxu1 %v2754_v16  ;;  %3956 = vmatprep.subr.bf16.mxu0 %v2756_v23  ;;  %v2868_v16 = vld [vmem:[#allocation2 + $0x17f8] sm:$0xff]  ;;  %v2865_v23 = vld [vmem:[#allocation2 + $0x17e0] sm:$0xff] }
 0x8a2   :  { %3699 = vmatprep.mubr.bf16.mxu1 %v6414_v26  ;;  %3986 = vmatprep.mubr.bf16.mxu0 %v6414_v26  ;;  %v2777_v26 = vld [vmem:[#allocation2 + $0x1520] sm:$0xff] }
 0x8a4   :  { %3670 = vmatpush1.bf16.msra.mxu1 %v2753_v34  ;;  %3957 = vmatpush1.bf16.msra.mxu0 %v2755_v33  ;;  %v2867_v34 = vld [vmem:[#allocation2 + $0x17f0] sm:$0xff]  ;;  %v2874_v33 = vld [vmem:[#allocation2 + $0x1828] sm:$0xff] }
 0x8a5   :  { %3671 = vmatprep.subr.bf16.mxu1 %v2762_v18  ;;  %3958 = vmatprep.subr.bf16.mxu0 %v2764_v56  ;;  %v2876_v18 = vld [vmem:[#allocation2 + $0x1838] sm:$0xff]  ;;  %v2873_v56 = vld [vmem:[#allocation2 + $0x1820] sm:$0xff] }
 0x8a8   :  { %3672 = vmatpush1.bf16.msra.mxu1 %v2761_v25  ;;  %3959 = vmatpush1.bf16.msra.mxu0 %v2763_v44  ;;  %v2875_v25 = vld [vmem:[#allocation2 + $0x1830] sm:$0xff]  ;;  %v2882_v44 = vld [vmem:[#allocation2 + $0x1868] sm:$0xff] }
 0x8a9   :  { %3673 = vmatprep.subr.bf16.mxu1 %v2770_v9  ;;  %3960 = vmatprep.subr.bf16.mxu0 %v2772_v40  ;;  %v2884_v9 = vld [vmem:[#allocation2 + $0x1878] sm:$0xff]  ;;  %v2881_v40 = vld [vmem:[#allocation2 + $0x1860] sm:$0xff] }
 0x8ac   :  { %3674 = vmatpush1.bf16.msra.mxu1 %v2769_v61  ;;  %3961 = vmatpush1.bf16.msra.mxu0 %v2771_v59  ;;  %v2883_v61 = vld [vmem:[#allocation2 + $0x1870] sm:$0xff] }
 0x8ad   :  { %3675 = vmatprep.subr.bf16.mxu1 %v2778_v41  ;;  %3962 = vmatprep.subr.bf16.mxu0 %v2780_v51 }
 0x8b0   :  { %3676 = vmatpush1.bf16.msra.mxu1 %v2777_v26  ;;  %3963 = vmatpush1.bf16.msra.mxu0 %v2779_v13 }
 0x8b1   :  { %3677 = vmatprep.subr.bf16.mxu1 %v2786_v19  ;;  %3964 = vmatprep.subr.bf16.mxu0 %v2788_v8 }
 0x8b4   :  { %3678 = vmatpush1.bf16.msra.mxu1 %v2785_v36  ;;  %3965 = vmatpush1.bf16.msra.mxu0 %v2787_v54 }
 0x8b5   :  { %3679 = vmatprep.subr.bf16.mxu1 %v2794_v22  ;;  %3966 = vmatprep.subr.bf16.mxu0 %v2796_v63 }
 0x8b8   :  { %3680 = vmatpush1.bf16.msra.mxu1 %v2793_v45  ;;  %3967 = vmatpush1.bf16.msra.mxu0 %v2795_v12 }
 0x8b9   :  { %3681 = vmatprep.subr.bf16.mxu1 %v2802_v6  ;;  %3968 = vmatprep.subr.bf16.mxu0 %v2804_v3 }
 0x8bc   :  { %3682 = vmatpush1.bf16.msra.mxu1 %v2801_v39  ;;  %3969 = vmatpush1.bf16.msra.mxu0 %v2803_v47 }
 0x8bd   :  { %3683 = vmatprep.subr.bf16.mxu1 %v2810_v31  ;;  %3970 = vmatprep.subr.bf16.mxu0 %v2812_v27 }
 0x8c0   :  { %3684 = vmatpush1.bf16.msra.mxu1 %v2809_v24  ;;  %3971 = vmatpush1.bf16.msra.mxu0 %v2811_v29 }
 0x8c1   :  { %3685 = vmatprep.subr.bf16.mxu1 %v2818_v10  ;;  %3972 = vmatprep.subr.bf16.mxu0 %v2820_v50 }
 0x8c4   :  { %3686 = vmatpush1.bf16.msra.mxu1 %v2817_v17  ;;  %3973 = vmatpush1.bf16.msra.mxu0 %v2819_v14 }
 0x8c5   :  { %3687 = vmatprep.subr.bf16.mxu1 %v2826_v28  ;;  %3974 = vmatprep.subr.bf16.mxu0 %v2828_v32 }
 0x8c8   :  { %3688 = vmatpush1.bf16.msra.mxu1 %v2825_v11  ;;  %3975 = vmatpush1.bf16.msra.mxu0 %v2827_v1 }
 0x8c9   :  { %3689 = vmatprep.subr.bf16.mxu1 %v2834_v48  ;;  %3976 = vmatprep.subr.bf16.mxu0 %v2836_v15  ;;  %v4124_v15 = vrot.slane %v4116_v49, %v5939_v55 }
 0x8cc   :  { %3690 = vmatpush1.bf16.msra.mxu1 %v2833_v38  ;;  %3977 = vmatpush1.bf16.msra.mxu0 %v2835_v57 }
 0x8cd   :  { %3691 = vmatprep.subr.bf16.mxu1 %v2842_v2  ;;  %3978 = vmatprep.subr.bf16.mxu0 %v2844_v4 }
 0x8d0   :  { %3692 = vmatpush1.bf16.msra.mxu1 %v2841_v35  ;;  %3979 = vmatpush1.bf16.msra.mxu0 %v2843_v52 }
 0x8d1   :  { %3693 = vmatprep.subr.bf16.mxu1 %v2850_v62  ;;  %3980 = vmatprep.subr.bf16.mxu0 %v2852_v0 }
 0x8d4   :  { %3694 = vmatpush1.bf16.msra.mxu1 %v2849_v43  ;;  %3981 = vmatpush1.bf16.msra.mxu0 %v2851_v7 }
 0x8d5   :  { %3695 = vmatprep.subr.bf16.mxu1 %v2858_v53  ;;  %3982 = vmatprep.subr.bf16.mxu0 %v2860_v60 }
 0x8d8   :  { %3696 = vmatpush1.bf16.msra.mxu1 %v2857_v20  ;;  %3983 = vmatpush1.bf16.msra.mxu0 %v2859_v42 }
 0x8d9   :  { %3697 = vmatprep.subr.bf16.mxu1 %v2866_v58  ;;  %3984 = vmatprep.subr.bf16.mxu0 %v2868_v16 }
 0x8dc   :  { %3698 = vmatpush1.bf16.msra.mxu1 %v2865_v23  ;;  %3985 = vmatpush1.bf16.msra.mxu0 %v2867_v34 }
 0x8dd   :  { %3708 = vmatprep.subr.bf16.mxu1 %v2874_v33  ;;  %3995 = vmatprep.subr.bf16.mxu0 %v2876_v18 }
 0x8df   :  { %3700 = vmatmul.mubr.bf16.vlgmr.msra.gmra.mrb[36].mxu1 %v6423_v30  ;;  %3987 = vmatmul.mubr.bf16.vlgmr.msra.gmra.mrb[12].mxu0 %v6423_v30 }
 0x8e0   :  { %3709 = vmatpush1.bf16.msra.mxu1 %v2873_v56  ;;  %3996 = vmatpush1.bf16.msra.mxu0 %v2875_v25 }
 0x8e1   :  { %3710 = vmatprep.subr.bf16.mxu1 %v2882_v44  ;;  %3997 = vmatprep.subr.bf16.mxu0 %v2884_v9 }
 0x8e2   :  { %3740 = vmatprep.mubr.bf16.mxu1 %v5048_v5  ;;  %4027 = vmatprep.mubr.bf16.mxu0 %v5048_v5 }
 0x8e4   :  { %3711 = vmatpush1.bf16.msra.mxu1 %v2881_v40  ;;  %3998 = vmatpush1.bf16.msra.mxu0 %v2883_v61 }
 0x8eb   :  { %4180 = vmatmul.mubr.msk.bf16.vlgmr.msra.gmra.mrb[36].mxu1 %vm6602_vm7, %v6432_v21  ;;  %4181 = vmatmul.mubr.msk.bf16.vlgmr.msra.gmra.mrb[12].mxu0 %vm6603_vm8, %v6432_v21 }
 0x9be   :  { %v3742_v59 = vpop.f32.mrb[36].mxu1  ;;  %v4029_v30 = vpop.f32.mrb[12].mxu0 }
 0x9bf   :  { %v4040_v41 = vsub.f32 0.0, %v3742_v59  ;;  %v4042_v51 = vsub.f32 0.0, %v4029_v30  ;;  %v3744_v26 = vpop.f32.mrb[37].mxu1  ;;  %v4031_v13 = vpop.f32.mrb[13].mxu0 }
 0x9c0   :  { %v4041_v19 = vsub.f32 0.0, %v3744_v26  ;;  %v4043_v8 = vsub.f32 0.0, %v4031_v13  ;;  %v3746_v36 = vpop.f32.mrb[38].mxu1  ;;  %v4033_v54 = vpop.f32.mrb[14].mxu0 }
 0x9c1   :  { %v4052_v22 = vmul.f32 1.442695, %v4040_v41  ;;  %v4056_v5 = vmul.f32 1.442695, %v4042_v51  ;;  %v3747_v63 = vpop.f32.mrb[39].mxu1  ;;  %v4034_v45 = vpop.f32.mrb[15].mxu0 }
 0x9c2   :  { %v4054_v12 = vmul.f32 1.442695, %v4041_v19  ;;  %v4058_v6 = vmul.f32 1.442695, %v4043_v8 }
 0x9c3   :  { %4926 = vpow2.f32 %v4052_v22 }
 0x9c4   :  { %4928 = vpow2.f32 %v4056_v5 }
 0x9c5   :  { %4930 = vpow2.f32 %v4054_v12 }
 0x9c6   :  { %4932 = vpow2.f32 %v4058_v6 }
 0x9cd   :  { %v4927_v21 = vpop.eup %4926 }
 0x9ce   :  { %v4929_v3 = vpop.eup %4928  ;;  %v4064_v39 = vadd.f32 1.0, %v4927_v21 }
 0x9cf   :  { %v4931_v47 = vpop.eup %4930  ;;  %v4066_v31 = vadd.f32 1.0, %v4929_v3 }
 0x9d0   :  { %v4933_v27 = vpop.eup %4932  ;;  %4934 = vrcp.f32 %v4064_v39  ;;  %v4065_v24 = vadd.f32 1.0, %v4931_v47 }
 0x9d1   :  { %4936 = vrcp.f32 %v4066_v31  ;;  %v4067_v29 = vadd.f32 1.0, %v4933_v27 }
 0x9d2   :  { %4938 = vrcp.f32 %v4065_v24 }
 0x9d3   :  { %4940 = vrcp.f32 %v4067_v29 }
 0x9da   :  { %v4935_v10 = vpop.eup %4934 }
 0x9db   :  { %v4937_v50 = vpop.eup %4936 }
 0x9dc   :  { %v4939_v17 = vpop.eup %4938 }
 0x9dd   :  { %v4941_v14 = vpop.eup %4940  ;;  %v4086_v28 = vcombine.low %v4935_v10, %v4939_v17 }
 0x9de   :  { %v4087_v32 = vcombine.low %v4937_v50, %v4941_v14 }
 0x9df   :  { %v4108_v11 = vrot.slane %v4086_v28, %v5939_v55 }
 0x9e0   :  { %v4115_v1 = vrot.slane %v4087_v32, %v5939_v55 }
 0x9e2   :  { %v4117_v48 = vcombine.low %v4108_v11, %v4115_v1 }
 0x9e4   :  { %v4131_v38 = vrot.slane %v4117_v48, %v5939_v55 }
 0x9e6   :  { %v4132_v57 = vcombine.low %v4124_v15, %v4131_v38 }
 0x9e8   :  { %4134 = vst [vmem:[#allocation8] sm:$0xff] %v4132_v57 }
 0x9e9   :  { %4975 = shalt.err (!%p4972_p12)
}
 0x9ea   :  { %s4976_s3 = scalar_lea.hbm %s6500_s5, 128 }
 0x9eb   :  { %p4977_p13 = scmp.ne.s32.totalorder %s6500_s5, %s4976_s3  ;;  %p4980_p0 = scmp.lt.u32.totalorder %s4976_s3, %s6500_s5 }
 0x9ed   :  { %p4982_p1 = pnand %p4980_p0, %p4977_p13 }
 0x9ef   :  { %4985 = shalt.err (!%p4982_p1)
}
 0x9f0   :  { %4144 = dma.vmem_to_hbm [thread:$0]  %s4142_s19, 128, %s6500_s5, [#allocation7]  }
 0x9f1   :  { %4990 = dma.done.wait [#allocation7], 128  }
 0x9f2   :  { %4991 = vsyncadd [#allocation7], 4294967168 }
 0x9f3   :  { %4148 = vsyncpa [#allocation6], 1 }
 0x9f4   :  { %4149 = vsyncpa [#allocation7], 1 }
 0x9f5   :  { %4150 = vsyncmov [#allocation4] }
 0x9f8   :  { %s4151_s14 = vpop.sfrf %4150 }
 0x9f9   :  { %p4182_p2 = scmp.ne.s32.totalorder %s4151_s14, 0 }
 0x9fb   :  { %4155 = shalt.err (%p4182_p2)  }

</bundles_post_ra>
